<compile_context>
chip_gen: v6e
topology: v6e:2x2x1
jax: 0.10.0
libtpu: 0.0.40
codegen_flags: <defaults>
</compile_context>

<pallas_src>
import jax
import jax.numpy as jnp
from jax import lax
from jax.experimental import pallas as pl
from jax.experimental.pallas import tpu as pltpu


# -----------------------------------------------------------------------------
# Kernel
# -----------------------------------------------------------------------------
def _generator_kernel(z_ref, w1_ref, w2_ref, w3_ref, w4_ref, w5_ref, vec_ref,
                      out_ref):
    eps = jnp.float32(0.8)

    d1 = w1_ref.shape[1]
    d2 = w2_ref.shape[1]
    d3 = w3_ref.shape[1]
    d4 = w4_ref.shape[1]
    d5 = w5_ref.shape[1]          # already lane-padded to a multiple of 128

    # packed (1, N) vector table, every segment is a multiple of 128 lanes:
    # [b1 b2 b3 b4 b5 | g2 g3 g4 | be2 be3 be4 | s3 s4 s5]
    o_b1 = 0
    o_b2 = o_b1 + d1
    o_b3 = o_b2 + d2
    o_b4 = o_b3 + d3
    o_b5 = o_b4 + d4
    o_g2 = o_b5 + d5
    o_g3 = o_g2 + d2
    o_g4 = o_g3 + d3
    o_be2 = o_g4 + d4
    o_be3 = o_be2 + d2
    o_be4 = o_be3 + d3
    o_s3 = o_be4 + d4
    o_s4 = o_s3 + d3
    o_s5 = o_s4 + d4

    def vec(off, size):
        # static, 128-aligned lane slice -> free ref view
        return vec_ref[:, off:off + size]

    def linear_bf16(x, w_ref, b):
        # bf16 x bf16 on the MXU, f32 accumulation, f32 bias add.
        return jnp.dot(x.astype(jnp.bfloat16), w_ref[...],
                       preferred_element_type=jnp.float32) + b

    def linear_q(x, wq_ref, s, b):
        # int8 weight -> bf16 (exact), bf16 MXU matmul, per-column scale folded
        # into the small (B, dout) f32 result.
        w = wq_ref[...].astype(jnp.float32).astype(jnp.bfloat16)
        y = jnp.dot(x.astype(jnp.bfloat16), w, preferred_element_type=jnp.float32)
        return y * s + b

    def bn_relu(y, g, be):
        # biased batch stats (training-mode BatchNorm1d), centered variance,
        # folded scale/shift -> one FMA per element.
        mean = jnp.mean(y, axis=0, keepdims=True)
        var = jnp.mean((y - mean) * (y - mean), axis=0, keepdims=True)
        scale = g * lax.rsqrt(var + eps)
        shift = be - mean * scale
        return jnp.maximum(y * scale + shift, 0.0)

    x = z_ref[...].astype(jnp.float32)

    # Layer 1: Linear + ReLU
    h = jnp.maximum(linear_bf16(x, w1_ref, vec(o_b1, d1)), 0.0)
    # Layer 2: Linear + BN + ReLU   (bf16 weight)
    h = bn_relu(linear_bf16(h, w2_ref, vec(o_b2, d2)), vec(o_g2, d2), vec(o_be2, d2))
    # Layer 3: Linear + BN + ReLU   (int8 weight, per-column scale)
    h = bn_relu(linear_q(h, w3_ref, vec(o_s3, d3), vec(o_b3, d3)),
                vec(o_g3, d3), vec(o_be3, d3))
    # Layer 4: Linear + BN + ReLU
    h = bn_relu(linear_q(h, w4_ref, vec(o_s4, d4), vec(o_b4, d4)),
                vec(o_g4, d4), vec(o_be4, d4))
    # Layer 5: Linear + Sigmoid     sigmoid(x) = 0.5*tanh(0.5*x)+0.5 (single EUP push)
    logits = linear_q(h, w5_ref, vec(o_s5, d5), vec(o_b5, d5))
    out_ref[...] = 0.5 * jnp.tanh(0.5 * logits) + 0.5


# -----------------------------------------------------------------------------
# Wrapper
# -----------------------------------------------------------------------------
@jax.jit
def _generator_1_flat(z, w1, w2, w3q, w4q, w5q, vec):
    b = z.shape[0]
    d5p = w5q.shape[1]

    inputs = (z, w1, w2, w3q, w4q, w5q, vec)
    io_bytes = sum(int(a.size) * a.dtype.itemsize for a in inputs) + b * d5p * 4
    flops = 2 * b * sum(int(w.shape[0]) * int(w.shape[1])
                        for w in (w1, w2, w3q, w4q, w5q))
    # in-kernel dequant temporaries (f32 + bf16 copies of the largest int8 weight)
    dequant_tmp = 6 * max(int(w.size) for w in (w3q, w4q, w5q))
    try:
        vmem_cap = int(pltpu.get_tpu_info().vmem_capacity_bytes) * 7 // 8
    except Exception:
        vmem_cap = 56 << 20          # safe on every generation (v7x = 64 MiB physical)
    vmem_limit = int(min(max(2 * io_bytes + dequant_tmp + (8 << 20), 32 << 20),
                         vmem_cap))

    vmem = pl.BlockSpec(memory_space=pltpu.MemorySpace.VMEM)
    return pl.pallas_call(
        _generator_kernel,
        out_shape=jax.ShapeDtypeStruct((b, d5p), jnp.float32),
        in_specs=[vmem] * 7,
        out_specs=vmem,
        compiler_params=pltpu.CompilerParams(vmem_limit_bytes=vmem_limit),
        cost_estimate=pl.CostEstimate(flops=flops,
                                      transcendentals=b * d5p,
                                      bytes_accessed=io_bytes),
    )(z, w1, w2, w3q, w4q, w5q, vec)


def generator_1_forward(z, params, img_shape):
    """Full Generator_1 forward.  The kernel emits a lane-dense (B, pad128(prod(img_shape)))
    slab; padding is sliced off and the NCHW view (img.view(B, *img_shape)) applied outside."""
    flat = _generator_1_flat(z, params["w1"], params["w2"], params["w3q"],
                             params["w4q"], params["w5q"], params["vec"])
    out_dim = params["out_dim"]
    return flat[:, :out_dim].reshape((z.shape[0],) + tuple(img_shape))


# -----------------------------------------------------------------------------
# Parameters (deterministic synthetic), packing & quantization
# -----------------------------------------------------------------------------
def _pad128(n):
    return ((int(n) + 127) // 128) * 128


def _quantize_int8(w):
    """Per-output-column symmetric int8 quantization: w ~= w_int8 * scale."""
    amax = jnp.max(jnp.abs(w), axis=0, keepdims=True)
    scale = jnp.maximum(amax / 127.0, 1e-8)
    wq = jnp.clip(jnp.round(w / scale), -127.0, 127.0).astype(jnp.int8)
    return wq, scale.astype(jnp.float32)


def init_params(key, latent_dim, img_shape):
    """PyTorch Linear computed as x @ W + b with W stored (in, out).
    w1/w2 bf16; w3/w4/w5 int8 + per-column f32 scale; all (1, dout) vectors packed into one
    lane-aligned (1, N) table.  The final output dim is padded to a multiple of 128."""
    out_dim = 1
    for s in img_shape:
        out_dim *= int(s)
    out_dim_p = _pad128(out_dim)

    dims = [latent_dim, 128, 256, 512, 1024, out_dim_p]
    keys = jax.random.split(key, 16)
    p = {"out_dim": out_dim, "out_dim_padded": out_dim_p}
    ki = 0
    for li, (din, dout) in enumerate(zip(dims[:-1], dims[1:]), start=1):
        w = 0.05 * jax.random.normal(keys[ki], (din, dout), jnp.float32)
        ki += 1
        b = 0.01 * jax.random.normal(keys[ki], (1, dout), jnp.float32)
        ki += 1
        if li == 5:
            # zero the lane-padding columns so padded logits are exactly 0 (sliced off later)
            col = jnp.arange(dout)[None, :]
            w = jnp.where(col < out_dim, w, 0.0)
            b = jnp.where(col < out_dim, b, 0.0)
        if li in (3, 4, 5):
            p[f"w{li}q"], p[f"s{li}"] = _quantize_int8(w)
        else:
            p[f"w{li}"] = w.astype(jnp.bfloat16)
        p[f"b{li}"] = b
        if li in (2, 3, 4):  # layers followed by BatchNorm1d
            p[f"g{li}"] = 1.0 + 0.1 * jax.random.normal(keys[ki], (1, dout), jnp.float32)
            ki += 1
            p[f"be{li}"] = 0.1 * jax.random.normal(keys[ki], (1, dout), jnp.float32)
            ki += 1

    p["vec"] = jnp.concatenate(
        [p["b1"], p["b2"], p["b3"], p["b4"], p["b5"],
         p["g2"], p["g3"], p["g4"],
         p["be2"], p["be3"], p["be4"],
         p["s3"], p["s4"], p["s5"]], axis=1)
    return p


# -----------------------------------------------------------------------------
# Pure-JAX reference (same quantized weights / same precision choices)
# -----------------------------------------------------------------------------
def reference_forward(z, params, img_shape):
    eps = 0.8

    def lin_bf16(x, w_bf16, b):
        return jnp.dot(x.astype(jnp.bfloat16), w_bf16,
                       preferred_element_type=jnp.float32) + b

    def lin_q(x, wq, s, b):
        y = jnp.dot(x.astype(jnp.bfloat16), wq.astype(jnp.bfloat16),
                    preferred_element_type=jnp.float32)
        return y * s + b

    def bn_relu(y, g, be):
        mean = jnp.mean(y, axis=0, keepdims=True)
        var = jnp.mean((y - mean) ** 2, axis=0, keepdims=True)
        y_hat = (y - mean) / jnp.sqrt(var + eps)
        return jnp.maximum(y_hat * g + be, 0.0)

    h = jnp.maximum(lin_bf16(z, params["w1"], params["b1"]), 0.0)
    h = bn_relu(lin_bf16(h, params["w2"], params["b2"]), params["g2"], params["be2"])
    h = bn_relu(lin_q(h, params["w3q"], params["s3"], params["b3"]),
                params["g3"], params["be3"])
    h = bn_relu(lin_q(h, params["w4q"], params["s4"], params["b4"]),
                params["g4"], params["be4"])
    logits = lin_q(h, params["w5q"], params["s5"], params["b5"])
    img = jax.nn.sigmoid(logits)[:, :params["out_dim"]]
    return img.reshape((z.shape[0],) + tuple(img_shape))


# -----------------------------------------------------------------------------
if __name__ == "__main__":
    latent_dim = 32
    img_shape = (1, 28, 28)   # C, H, W -> prod = 784 (padded to 896 inside the kernel)
    batch = 8

    key = jax.random.PRNGKey(0)
    k_params, k_z = jax.random.split(key)

    params = init_params(k_params, latent_dim, img_shape)
    z = jax.random.normal(k_z, (batch, latent_dim), jnp.float32)

    img = generator_1_forward(z, params, img_shape)
    img = jax.block_until_ready(img)

    ref = jax.block_until_ready(reference_forward(z, params, img_shape))
    assert img.shape == (batch,) + img_shape, img.shape
    max_err = float(jnp.max(jnp.abs(img - ref)))
    # bf16 matmuls + rsqrt-folded BN vs reference; int8 weights are shared with the
    # reference so quantization itself does not contribute to the error.
    assert max_err < 2e-2, max_err

    print("KERNEL_OK")
</pallas_src>

<mosaic_0001>
module attributes {stable_mosaic.version = 11 : i64} {
  func.func @_generator_kernel(%arg0: memref<8x32xf32, #tpu.memory_space<vmem>>, %arg1: memref<32x128xbf16, #tpu.memory_space<vmem>>, %arg2: memref<128x256xbf16, #tpu.memory_space<vmem>>, %arg3: memref<256x512xi8, #tpu.memory_space<vmem>>, %arg4: memref<512x1024xi8, #tpu.memory_space<vmem>>, %arg5: memref<1024x896xi8, #tpu.memory_space<vmem>>, %arg6: memref<1x8832xf32, #tpu.memory_space<vmem>>, %arg7: memref<8x896xf32, #tpu.memory_space<vmem>>) attributes {dimension_semantics = [], scalar_prefetch = 0 : i64, scratch_operands = 0 : i64, tpu.core_type = #tpu.core_type<tc>} {
    %c0 = arith.constant 0 : index
    %c0_0 = arith.constant 0 : index
    %0 = vector.load %arg0[%c0, %c0_0] : memref<8x32xf32, #tpu.memory_space<vmem>>, vector<8x32xf32>
    %c0_1 = arith.constant 0 : index
    %c0_2 = arith.constant 0 : index
    %1 = vector.load %arg6[%c0_1, %c0_2] : memref<1x8832xf32, #tpu.memory_space<vmem>>, vector<1x128xf32>
    %2 = arith.truncf %0 : vector<8x32xf32> to vector<8x32xbf16>
    %c0_3 = arith.constant 0 : index
    %c0_4 = arith.constant 0 : index
    %3 = vector.load %arg1[%c0_3, %c0_4] : memref<32x128xbf16, #tpu.memory_space<vmem>>, vector<32x128xbf16>
    %cst = arith.constant dense<0.000000e+00> : vector<8x128xf32>
    %4 = tpu.matmul %2, %3, %cst {dimension_numbers = #tpu.dot_dimension_numbers<[1], [0], [0], [1], [0, 0, 1, 1], [], []>} : vector<8x32xbf16>, vector<32x128xbf16>, vector<8x128xf32> -> vector<8x128xf32>
    %5 = vector.broadcast %1 : vector<1x128xf32> to vector<8x128xf32>
    %6 = arith.addf %4, %5 : vector<8x128xf32>
    %cst_5 = arith.constant 0.000000e+00 : f32
    %7 = vector.broadcast %cst_5 : f32 to vector<8x128xf32>
    %8 = arith.maximumf %6, %7 : vector<8x128xf32>
    %c0_6 = arith.constant 0 : index
    %c128 = arith.constant 128 : index
    %9 = vector.load %arg6[%c0_6, %c128] : memref<1x8832xf32, #tpu.memory_space<vmem>>, vector<1x256xf32>
    %10 = arith.truncf %8 : vector<8x128xf32> to vector<8x128xbf16>
    %c0_7 = arith.constant 0 : index
    %c0_8 = arith.constant 0 : index
    %11 = vector.load %arg2[%c0_7, %c0_8] : memref<128x256xbf16, #tpu.memory_space<vmem>>, vector<128x256xbf16>
    %cst_9 = arith.constant dense<0.000000e+00> : vector<8x256xf32>
    %12 = tpu.matmul %10, %11, %cst_9 {dimension_numbers = #tpu.dot_dimension_numbers<[1], [0], [0], [1], [0, 0, 1, 1], [], []>} : vector<8x128xbf16>, vector<128x256xbf16>, vector<8x256xf32> -> vector<8x256xf32>
    %13 = vector.broadcast %9 : vector<1x256xf32> to vector<8x256xf32>
    %14 = arith.addf %12, %13 : vector<8x256xf32>
    %c0_10 = arith.constant 0 : index
    %c2816 = arith.constant 2816 : index
    %15 = vector.load %arg6[%c0_10, %c2816] : memref<1x8832xf32, #tpu.memory_space<vmem>>, vector<1x256xf32>
    %c0_11 = arith.constant 0 : index
    %c4608 = arith.constant 4608 : index
    %16 = vector.load %arg6[%c0_11, %c4608] : memref<1x8832xf32, #tpu.memory_space<vmem>>, vector<1x256xf32>
    %cst_12 = arith.constant dense<0.000000e+00> : vector<256xf32>
    %17 = vector.multi_reduction <add>, %14, %cst_12 [0] : vector<8x256xf32> to vector<256xf32>
    %18 = vector.shape_cast %17 : vector<256xf32> to vector<1x256xf32>
    %cst_13 = arith.constant 8.000000e+00 : f32
    %19 = vector.broadcast %cst_13 : f32 to vector<1x256xf32>
    %20 = arith.divf %18, %19 : vector<1x256xf32>
    %21 = vector.broadcast %20 : vector<1x256xf32> to vector<8x256xf32>
    %22 = arith.subf %14, %21 : vector<8x256xf32>
    %23 = vector.broadcast %20 : vector<1x256xf32> to vector<8x256xf32>
    %24 = arith.subf %14, %23 : vector<8x256xf32>
    %25 = arith.mulf %22, %24 : vector<8x256xf32>
    %cst_14 = arith.constant dense<0.000000e+00> : vector<256xf32>
    %26 = vector.multi_reduction <add>, %25, %cst_14 [0] : vector<8x256xf32> to vector<256xf32>
    %27 = vector.shape_cast %26 : vector<256xf32> to vector<1x256xf32>
    %cst_15 = arith.constant 8.000000e+00 : f32
    %28 = vector.broadcast %cst_15 : f32 to vector<1x256xf32>
    %29 = arith.divf %27, %28 : vector<1x256xf32>
    %cst_16 = arith.constant 8.000000e-01 : f32
    %30 = vector.broadcast %cst_16 : f32 to vector<1x256xf32>
    %31 = arith.addf %29, %30 : vector<1x256xf32>
    %32 = math.rsqrt %31 : vector<1x256xf32>
    %33 = arith.mulf %15, %32 : vector<1x256xf32>
    %34 = arith.mulf %20, %33 : vector<1x256xf32>
    %35 = arith.subf %16, %34 : vector<1x256xf32>
    %36 = vector.broadcast %33 : vector<1x256xf32> to vector<8x256xf32>
    %37 = arith.mulf %14, %36 : vector<8x256xf32>
    %38 = vector.broadcast %35 : vector<1x256xf32> to vector<8x256xf32>
    %39 = arith.addf %37, %38 : vector<8x256xf32>
    %cst_17 = arith.constant 0.000000e+00 : f32
    %40 = vector.broadcast %cst_17 : f32 to vector<8x256xf32>
    %41 = arith.maximumf %39, %40 : vector<8x256xf32>
    %c0_18 = arith.constant 0 : index
    %c6400 = arith.constant 6400 : index
    %42 = vector.load %arg6[%c0_18, %c6400] : memref<1x8832xf32, #tpu.memory_space<vmem>>, vector<1x512xf32>
    %c0_19 = arith.constant 0 : index
    %c384 = arith.constant 384 : index
    %43 = vector.load %arg6[%c0_19, %c384] : memref<1x8832xf32, #tpu.memory_space<vmem>>, vector<1x512xf32>
    %c0_20 = arith.constant 0 : index
    %c0_21 = arith.constant 0 : index
    %44 = vector.load %arg3[%c0_20, %c0_21] : memref<256x512xi8, #tpu.memory_space<vmem>>, vector<256x512xi8>
    %45 = arith.sitofp %44 : vector<256x512xi8> to vector<256x512xf32>
    %46 = arith.truncf %45 : vector<256x512xf32> to vector<256x512xbf16>
    %47 = arith.truncf %41 : vector<8x256xf32> to vector<8x256xbf16>
    %cst_22 = arith.constant dense<0.000000e+00> : vector<8x512xf32>
    %48 = tpu.matmul %47, %46, %cst_22 {dimension_numbers = #tpu.dot_dimension_numbers<[1], [0], [0], [1], [0, 0, 1, 1], [], []>} : vector<8x256xbf16>, vector<256x512xbf16>, vector<8x512xf32> -> vector<8x512xf32>
    %49 = vector.broadcast %42 : vector<1x512xf32> to vector<8x512xf32>
    %50 = arith.mulf %48, %49 : vector<8x512xf32>
    %51 = vector.broadcast %43 : vector<1x512xf32> to vector<8x512xf32>
    %52 = arith.addf %50, %51 : vector<8x512xf32>
    %c0_23 = arith.constant 0 : index
    %c3072 = arith.constant 3072 : index
    %53 = vector.load %arg6[%c0_23, %c3072] : memref<1x8832xf32, #tpu.memory_space<vmem>>, vector<1x512xf32>
    %c0_24 = arith.constant 0 : index
    %c4864 = arith.constant 4864 : index
    %54 = vector.load %arg6[%c0_24, %c4864] : memref<1x8832xf32, #tpu.memory_space<vmem>>, vector<1x512xf32>
    %cst_25 = arith.constant dense<0.000000e+00> : vector<512xf32>
    %55 = vector.multi_reduction <add>, %52, %cst_25 [0] : vector<8x512xf32> to vector<512xf32>
    %56 = vector.shape_cast %55 : vector<512xf32> to vector<1x512xf32>
    %cst_26 = arith.constant 8.000000e+00 : f32
    %57 = vector.broadcast %cst_26 : f32 to vector<1x512xf32>
    %58 = arith.divf %56, %57 : vector<1x512xf32>
    %59 = vector.broadcast %58 : vector<1x512xf32> to vector<8x512xf32>
    %60 = arith.subf %52, %59 : vector<8x512xf32>
    %61 = vector.broadcast %58 : vector<1x512xf32> to vector<8x512xf32>
    %62 = arith.subf %52, %61 : vector<8x512xf32>
    %63 = arith.mulf %60, %62 : vector<8x512xf32>
    %cst_27 = arith.constant dense<0.000000e+00> : vector<512xf32>
    %64 = vector.multi_reduction <add>, %63, %cst_27 [0] : vector<8x512xf32> to vector<512xf32>
    %65 = vector.shape_cast %64 : vector<512xf32> to vector<1x512xf32>
    %cst_28 = arith.constant 8.000000e+00 : f32
    %66 = vector.broadcast %cst_28 : f32 to vector<1x512xf32>
    %67 = arith.divf %65, %66 : vector<1x512xf32>
    %cst_29 = arith.constant 8.000000e-01 : f32
    %68 = vector.broadcast %cst_29 : f32 to vector<1x512xf32>
    %69 = arith.addf %67, %68 : vector<1x512xf32>
    %70 = math.rsqrt %69 : vector<1x512xf32>
    %71 = arith.mulf %53, %70 : vector<1x512xf32>
    %72 = arith.mulf %58, %71 : vector<1x512xf32>
    %73 = arith.subf %54, %72 : vector<1x512xf32>
    %74 = vector.broadcast %71 : vector<1x512xf32> to vector<8x512xf32>
    %75 = arith.mulf %52, %74 : vector<8x512xf32>
    %76 = vector.broadcast %73 : vector<1x512xf32> to vector<8x512xf32>
    %77 = arith.addf %75, %76 : vector<8x512xf32>
    %cst_30 = arith.constant 0.000000e+00 : f32
    %78 = vector.broadcast %cst_30 : f32 to vector<8x512xf32>
    %79 = arith.maximumf %77, %78 : vector<8x512xf32>
    %c0_31 = arith.constant 0 : index
    %c6912 = arith.constant 6912 : index
    %80 = vector.load %arg6[%c0_31, %c6912] : memref<1x8832xf32, #tpu.memory_space<vmem>>, vector<1x1024xf32>
    %c0_32 = arith.constant 0 : index
    %c896 = arith.constant 896 : index
    %81 = vector.load %arg6[%c0_32, %c896] : memref<1x8832xf32, #tpu.memory_space<vmem>>, vector<1x1024xf32>
    %c0_33 = arith.constant 0 : index
    %c0_34 = arith.constant 0 : index
    %82 = vector.load %arg4[%c0_33, %c0_34] : memref<512x1024xi8, #tpu.memory_space<vmem>>, vector<512x1024xi8>
    %83 = arith.sitofp %82 : vector<512x1024xi8> to vector<512x1024xf32>
    %84 = arith.truncf %83 : vector<512x1024xf32> to vector<512x1024xbf16>
    %85 = arith.truncf %79 : vector<8x512xf32> to vector<8x512xbf16>
    %cst_35 = arith.constant dense<0.000000e+00> : vector<8x1024xf32>
    %86 = tpu.matmul %85, %84, %cst_35 {dimension_numbers = #tpu.dot_dimension_numbers<[1], [0], [0], [1], [0, 0, 1, 1], [], []>} : vector<8x512xbf16>, vector<512x1024xbf16>, vector<8x1024xf32> -> vector<8x1024xf32>
    %87 = vector.broadcast %80 : vector<1x1024xf32> to vector<8x1024xf32>
    %88 = arith.mulf %86, %87 : vector<8x1024xf32>
    %89 = vector.broadcast %81 : vector<1x1024xf32> to vector<8x1024xf32>
    %90 = arith.addf %88, %89 : vector<8x1024xf32>
    %c0_36 = arith.constant 0 : index
    %c3584 = arith.constant 3584 : index
    %91 = vector.load %arg6[%c0_36, %c3584] : memref<1x8832xf32, #tpu.memory_space<vmem>>, vector<1x1024xf32>
    %c0_37 = arith.constant 0 : index
    %c5376 = arith.constant 5376 : index
    %92 = vector.load %arg6[%c0_37, %c5376] : memref<1x8832xf32, #tpu.memory_space<vmem>>, vector<1x1024xf32>
    %cst_38 = arith.constant dense<0.000000e+00> : vector<1024xf32>
    %93 = vector.multi_reduction <add>, %90, %cst_38 [0] : vector<8x1024xf32> to vector<1024xf32>
    %94 = vector.shape_cast %93 : vector<1024xf32> to vector<1x1024xf32>
    %cst_39 = arith.constant 8.000000e+00 : f32
    %95 = vector.broadcast %cst_39 : f32 to vector<1x1024xf32>
    %96 = arith.divf %94, %95 : vector<1x1024xf32>
    %97 = vector.broadcast %96 : vector<1x1024xf32> to vector<8x1024xf32>
    %98 = arith.subf %90, %97 : vector<8x1024xf32>
    %99 = vector.broadcast %96 : vector<1x1024xf32> to vector<8x1024xf32>
    %100 = arith.subf %90, %99 : vector<8x1024xf32>
    %101 = arith.mulf %98, %100 : vector<8x1024xf32>
    %cst_40 = arith.constant dense<0.000000e+00> : vector<1024xf32>
    %102 = vector.multi_reduction <add>, %101, %cst_40 [0] : vector<8x1024xf32> to vector<1024xf32>
    %103 = vector.shape_cast %102 : vector<1024xf32> to vector<1x1024xf32>
    %cst_41 = arith.constant 8.000000e+00 : f32
    %104 = vector.broadcast %cst_41 : f32 to vector<1x1024xf32>
    %105 = arith.divf %103, %104 : vector<1x1024xf32>
    %cst_42 = arith.constant 8.000000e-01 : f32
    %106 = vector.broadcast %cst_42 : f32 to vector<1x1024xf32>
    %107 = arith.addf %105, %106 : vector<1x1024xf32>
    %108 = math.rsqrt %107 : vector<1x1024xf32>
    %109 = arith.mulf %91, %108 : vector<1x1024xf32>
    %110 = arith.mulf %96, %109 : vector<1x1024xf32>
    %111 = arith.subf %92, %110 : vector<1x1024xf32>
    %112 = vector.broadcast %109 : vector<1x1024xf32> to vector<8x1024xf32>
    %113 = arith.mulf %90, %112 : vector<8x1024xf32>
    %114 = vector.broadcast %111 : vector<1x1024xf32> to vector<8x1024xf32>
    %115 = arith.addf %113, %114 : vector<8x1024xf32>
    %cst_43 = arith.constant 0.000000e+00 : f32
    %116 = vector.broadcast %cst_43 : f32 to vector<8x1024xf32>
    %117 = arith.maximumf %115, %116 : vector<8x1024xf32>
    %c0_44 = arith.constant 0 : index
    %c7936 = arith.constant 7936 : index
    %118 = vector.load %arg6[%c0_44, %c7936] : memref<1x8832xf32, #tpu.memory_space<vmem>>, vector<1x896xf32>
    %c0_45 = arith.constant 0 : index
    %c1920 = arith.constant 1920 : index
    %119 = vector.load %arg6[%c0_45, %c1920] : memref<1x8832xf32, #tpu.memory_space<vmem>>, vector<1x896xf32>
    %c0_46 = arith.constant 0 : index
    %c0_47 = arith.constant 0 : index
    %120 = vector.load %arg5[%c0_46, %c0_47] : memref<1024x896xi8, #tpu.memory_space<vmem>>, vector<1024x896xi8>
    %121 = arith.sitofp %120 : vector<1024x896xi8> to vector<1024x896xf32>
    %122 = arith.truncf %121 : vector<1024x896xf32> to vector<1024x896xbf16>
    %123 = arith.truncf %117 : vector<8x1024xf32> to vector<8x1024xbf16>
    %cst_48 = arith.constant dense<0.000000e+00> : vector<8x896xf32>
    %124 = tpu.matmul %123, %122, %cst_48 {dimension_numbers = #tpu.dot_dimension_numbers<[1], [0], [0], [1], [0, 0, 1, 1], [], []>} : vector<8x1024xbf16>, vector<1024x896xbf16>, vector<8x896xf32> -> vector<8x896xf32>
    %125 = vector.broadcast %118 : vector<1x896xf32> to vector<8x896xf32>
    %126 = arith.mulf %124, %125 : vector<8x896xf32>
    %127 = vector.broadcast %119 : vector<1x896xf32> to vector<8x896xf32>
    %128 = arith.addf %126, %127 : vector<8x896xf32>
    %cst_49 = arith.constant 5.000000e-01 : f32
    %129 = vector.broadcast %cst_49 : f32 to vector<8x896xf32>
    %130 = arith.mulf %129, %128 : vector<8x896xf32>
    %131 = math.tanh %130 : vector<8x896xf32>
    %cst_50 = arith.constant 5.000000e-01 : f32
    %132 = vector.broadcast %cst_50 : f32 to vector<8x896xf32>
    %133 = arith.mulf %132, %131 : vector<8x896xf32>
    %cst_51 = arith.constant 5.000000e-01 : f32
    %134 = vector.broadcast %cst_51 : f32 to vector<8x896xf32>
    %135 = arith.addf %133, %134 : vector<8x896xf32>
    %c0_52 = arith.constant 0 : index
    %c0_53 = arith.constant 0 : index
    %136 = vector.load %arg7[%c0_52, %c0_53] : memref<8x896xf32, #tpu.memory_space<vmem>>, vector<8x896xf32>
    tpu.vector_store %arg7[%c0_52, %c0_53], %135 {strides = array<i32>} : memref<8x896xf32, #tpu.memory_space<vmem>>, vector<8x896xf32>,
    return
  }
}

</mosaic_0001>

<bundles_post_ra>
// kernel: _generator_1_flat.1
= control target key start
LH: loop header
LB: loop body
LE: loop exit
PB: predicated region body
PF: predicated region fallthrough
CT: control target
= control target key end

     0   :  { %12 = vsyncpa [#allocation3], 0  ;;  %s4418_s0 = inlined_call_operand.hbm [shape: f32[8,32], index: 0, kind: input, shape index: {}]   ;;  %s4419_s1 = inlined_call_operand.hbm [shape: bf16[32,128], index: 1, kind: input, shape index: {}]   ;;  %s4420_s2 = inlined_call_operand.hbm [shape: bf16[128,256], index: 2, kind: input, shape index: {}]   ;;  %s4421_s3 = inlined_call_operand.hbm [shape: s8[256,512], index: 3, kind: input, shape index: {}]   ;;  %s4422_s4 = inlined_call_operand.hbm [shape: s8[512,1024], index: 4, kind: input, shape index: {}]   ;;  %s4423_s5 = inlined_call_operand.hbm [shape: s8[1024,896], index: 5, kind: input, shape index: {}]   ;;  %s4424_s6 = inlined_call_operand.hbm [shape: f32[1,8832], index: 6, kind: input, shape index: {}]   ;;  %s4425_s7 = inlined_call_operand.hbm [shape: f32[8,896], index: 7, kind: output, shape index: {}]  }
   0x1   :  { %13 = vsyncpa [#allocation6], 0 }
   0x2   :  { %14 = vsyncpa [#allocation9], 0 }
   0x3   :  { %15 = vsyncpa [#allocation12], 0 }
   0x4   :  { %16 = vsyncpa [#allocation4], 0  ;;  %s3915_s24 = smov [#allocation5]  }
   0x5   :  { %s32_s25 = sshll.u32 %s3915_s24, 4  ;;  %s33_s25 = int_to_ptr.vmem [resolvable:$true] %s32_s25 }
   0x6   :  { %s3753_s26 = scalar_lea.vmem %s33_s25, 256  ;;  %p3758_p1 = scmp.lt.s32.totalorder %s33_s25, %s33_s25 }
   0x7   :  { %p3754_p0 = scmp.ne.s32.totalorder %s33_s25, %s3753_s26  ;;  %p3759_p2 = scmp.lt.s32.totalorder %s3753_s26, %s3753_s26 }
   0x9   :  { %p3760_p3 = por %p3759_p2, %p3758_p1 }
   0xb   :  { %p3761_p4 = pnand %p3760_p3, %p3754_p0 }
   0xd   :  { %3764 = shalt.err (!%p3761_p4)
}
   0xe   :  { %s3916_s27 = smov 64   ;;  %s3917_s28 = smov 4  }
   0xf   :  { %38 = dma.hbm_to_vmem [thread:$0]  %s4419_s1, 256, %s33_s25, [#allocation6], %s3916_s27, %s3916_s27, %s3917_s28  }
  0x10   :  { %s3918_s8 = smov [#allocation8]  }
  0x11   :  { %s56_s9 = sshll.u32 %s3918_s8, 4  ;;  %s57_s9 = int_to_ptr.vmem [resolvable:$true] %s56_s9 }
  0x12   :  { %s3773_s10 = scalar_lea.vmem %s57_s9, 4096  ;;  %p3778_p6 = scmp.lt.s32.totalorder %s57_s9, %s57_s9 }
  0x13   :  { %p3774_p5 = scmp.ne.s32.totalorder %s57_s9, %s3773_s10  ;;  %p3779_p7 = scmp.lt.s32.totalorder %s3773_s10, %s3773_s10 }
  0x15   :  { %p3780_p8 = por %p3779_p7, %p3778_p6 }
  0x17   :  { %p3781_p9 = pnand %p3780_p8, %p3774_p5 }
  0x19   :  { %3784 = shalt.err (!%p3781_p9)
}
  0x1a   :  { %s3919_s11 = smov 512   ;;  %s3920_s12 = smov 32  }
  0x1b   :  { %62 = dma.hbm_to_vmem [thread:$0]  %s4421_s3, 4096, %s57_s9, [#allocation9], %s3919_s11, %s3919_s11, %s3920_s12  }
  0x1c   :  { %s3921_s15 = smov [#allocation11]  }
  0x1d   :  { %s80_s16 = sshll.u32 %s3921_s15, 4  ;;  %s81_s16 = int_to_ptr.vmem [resolvable:$true] %s80_s16 }
  0x1e   :  { %s3793_s1 = scalar_lea.vmem %s81_s16, 28672  ;;  %p3798_p11 = scmp.lt.s32.totalorder %s81_s16, %s81_s16 }
  0x1f   :  { %p3794_p10 = scmp.ne.s32.totalorder %s81_s16, %s3793_s1  ;;  %p3799_p12 = scmp.lt.s32.totalorder %s3793_s1, %s3793_s1 }
  0x21   :  { %p3800_p13 = por %p3799_p12, %p3798_p11 }
  0x23   :  { %p3801_p0 = pnand %p3800_p13, %p3794_p10 }
  0x25   :  { %3804 = shalt.err (!%p3801_p0)
}
  0x26   :  { %s3922_s17 = smov 896   ;;  %s3923_s18 = smov 56  }
  0x27   :  { %86 = dma.hbm_to_vmem [thread:$0]  %s4423_s5, 28672, %s81_s16, [#allocation12], %s3922_s17, %s3922_s17, %s3923_s18  }
  0x28   :  { %s3924_s21 = smov [#allocation2]   ;;  %s3925_s3 = smov [#allocation7]  }
  0x29   :  { %s23_s22 = sshll.u32 %s3924_s21, 4  ;;  %s44_s23 = sshll.u32 %s3925_s3, 4  ;;  %s24_s22 = int_to_ptr.vmem [resolvable:$true] %s23_s22  ;;  %s45_s23 = int_to_ptr.vmem [resolvable:$true] %s44_s23 }
  0x2a   :  { %s3813_s24 = scalar_lea.vmem %s24_s22, 128  ;;  %p3818_p2 = scmp.lt.s32.totalorder %s24_s22, %s24_s22 }
  0x2b   :  { %p3814_p1 = scmp.ne.s32.totalorder %s24_s22, %s3813_s24  ;;  %p3819_p3 = scmp.lt.s32.totalorder %s3813_s24, %s3813_s24 }
  0x2d   :  { %p3820_p4 = por %p3819_p3, %p3818_p2 }
  0x2f   :  { %p3821_p5 = pnand %p3820_p4, %p3814_p1 }
  0x31   :  { %3824 = shalt.err (!%p3821_p5)
}
  0x32   :  { %26 = dma.hbm_to_vmem [thread:$0]  %s4418_s0, 128, %s24_s22, [#allocation3]  }
  0x33   :  { %s3833_s28 = scalar_lea.vmem %s45_s23, 2048  ;;  %p3838_p7 = scmp.lt.s32.totalorder %s45_s23, %s45_s23 }
  0x34   :  { %p3834_p6 = scmp.ne.s32.totalorder %s45_s23, %s3833_s28  ;;  %p3839_p8 = scmp.lt.s32.totalorder %s3833_s28, %s3833_s28 }
  0x36   :  { %p3840_p9 = por %p3839_p8, %p3838_p7 }
  0x38   :  { %p3841_p10 = pnand %p3840_p9, %p3834_p6 }
  0x3a   :  { %3844 = shalt.err (!%p3841_p10)
}
  0x3b   :  { %s3926_s5 = smov 128   ;;  %s3927_s29 = smov 8  }
  0x3c   :  { %50 = dma.hbm_to_vmem [thread:$0]  %s4420_s2, 2048, %s45_s23, [#allocation6], %s3926_s5, %s3926_s5, %s3927_s29  }
  0x3d   :  { %s3928_s9 = smov [#allocation10]  }
  0x3e   :  { %s68_s10 = sshll.u32 %s3928_s9, 4  ;;  %s69_s10 = int_to_ptr.vmem [resolvable:$true] %s68_s10 }
  0x3f   :  { %s3853_s11 = scalar_lea.vmem %s69_s10, 16384  ;;  %p3858_p12 = scmp.lt.s32.totalorder %s69_s10, %s69_s10 }
  0x40   :  { %p3854_p11 = scmp.ne.s32.totalorder %s69_s10, %s3853_s11  ;;  %p3859_p13 = scmp.lt.s32.totalorder %s3853_s11, %s3853_s11 }
  0x42   :  { %p3860_p0 = por %p3859_p13, %p3858_p12 }
  0x44   :  { %p3861_p1 = pnand %p3860_p0, %p3854_p11 }
  0x46   :  { %3864 = shalt.err (!%p3861_p1)
}
  0x47   :  { %s3929_s0 = smov 1024   ;;  %s3930_s14 = smov [#allocation13]  }
  0x48   :  { %74 = dma.hbm_to_vmem [thread:$0]  %s4422_s4, 16384, %s69_s10, [#allocation9], %s3929_s0, %s3929_s0, %s3916_s27  }
  0x49   :  { %s93_s15 = sshll.u32 %s3930_s14, 4  ;;  %s94_s15 = int_to_ptr.vmem [resolvable:$true] %s93_s15 }
  0x4a   :  { %s3873_s2 = scalar_lea.vmem %s94_s15, 1104  ;;  %s3877_s16 = scalar_lea.vmem %s94_s15, 1120 }
  0x4b   :  { %p3874_p2 = scmp.ne.s32.totalorder %s94_s15, %s3873_s2  ;;  %p3878_p3 = scmp.lt.s32.totalorder %s94_s15, %s94_s15 }
  0x4c   :  { %p3879_p4 = scmp.lt.s32.totalorder %s3877_s16, %s3873_s2 }
  0x4e   :  { %p3880_p5 = por %p3879_p4, %p3878_p3 }
  0x50   :  { %p3881_p6 = pnand %p3880_p5, %p3874_p2 }
  0x52   :  { %3884 = shalt.err (!%p3881_p6)
}
  0x53   :  { %96 = dma.hbm_to_vmem [thread:$0]  %s4424_s6, 1104, %s94_s15, [#allocation12]  }
  0x54   :  { %3905 = dma.done.wait [#allocation3], 128  }
  0x55   :  { %3906 = vsyncadd [#allocation3], 4294967168 }
  0x56   :  { %3907 = dma.done.wait [#allocation6], 2304  }
  0x57   :  { %3908 = vsyncadd [#allocation6], 4294964992 }
  0x58   :  { %3909 = dma.done.wait [#allocation9], 20480  }
  0x59   :  { %3910 = vsyncadd [#allocation9], 4294946816 }
  0x5a   :  { %3911 = dma.done.wait [#allocation12], 29776  }
  0x5b   :  { %3912 = vsyncadd [#allocation12], 4294937520  ;;  %v3931_v0 = vmov 0.0   ;;  %vm3932_vm0 = vmmov 0   ;;  %v3677_v1 = vld [vmem:[#allocation5 + $0x8] sm:$0xff]   ;;  %v3678_v2 = vld [vmem:[#allocation5] sm:$0xff]  }
  0x5c   :  { %3648 = vmatprep.subr.bf16.mxu0 %v3931_v0  ;;  %3652 = vmatprep.mubr.msk.bf16.mxu0 %vm3932_vm0, %v3931_v0  ;;  %v119_v3 = vld [vmem:[#allocation2] sm:$0xff]  ;;  %v3679_v4 = vld [vmem:[#allocation7 + $0x74] ss:$8 sps:$4 sm:$0xff]   ;;  %v3681_v5 = vld [vmem:[#allocation7 + $0x70] ss:$8 sps:$4 sm:$0xff]   ;;  %vm144_vm1 = vcmask 261120  }
  0x5d   :  { %3649 = vmatpush3.bf16.msra.mxu0 %v3677_v1  ;;  %v3682_v6 = vld [vmem:[#allocation7 + $0x64] ss:$8 sps:$4 sm:$0xff]   ;;  %v121_v7 = vpack.c.bf16 %v119_v3, %v119_v3  ;;  %298 = vmatprep.subr.bf16.mxu1 %v3679_v4  ;;  %v3684_v8 = vld [vmem:[#allocation7 + $0x60] ss:$8 sps:$4 sm:$0xff]   ;;  %v3685_v9 = vld [vmem:[#allocation7 + $0x54] ss:$8 sps:$4 sm:$0xff]  }
  0x5e   :  { %3650 = vmatprep.subr.bf16.mxu0 %v3931_v0  ;;  %299 = vmatpush1.bf16.msra.mxu1 %v3681_v5  ;;  %v3687_v10 = vld [vmem:[#allocation7 + $0x50] ss:$8 sps:$4 sm:$0xff]   ;;  %v3688_v11 = vld [vmem:[#allocation7 + $0x44] ss:$8 sps:$4 sm:$0xff]   ;;  %v3690_v12 = vld [vmem:[#allocation7 + $0x40] ss:$8 sps:$4 sm:$0xff]  }
  0x5f   :  { %300 = vmatprep.subr.bf16.mxu1 %v3682_v6  ;;  %v3691_v13 = vld [vmem:[#allocation7 + $0x34] ss:$8 sps:$4 sm:$0xff]   ;;  %v3693_v14 = vld [vmem:[#allocation7 + $0x30] ss:$8 sps:$4 sm:$0xff]   ;;  %v3694_v15 = vld [vmem:[#allocation7 + $0x24] ss:$8 sps:$4 sm:$0xff]  }
  0x60   :  { %v3696_v16 = vld [vmem:[#allocation7 + $0x20] ss:$8 sps:$4 sm:$0xff]   ;;  %v3697_v17 = vld [vmem:[#allocation7 + $0x14] ss:$8 sps:$4 sm:$0xff]   ;;  %v3699_v18 = vld [vmem:[#allocation7 + $0x10] ss:$8 sps:$4 sm:$0xff]  }
  0x61   :  { %3651 = vmatpush3.bf16.msra.mxu0 %v3678_v2  ;;  %v3700_v19 = vld [vmem:[#allocation7 + $0x4] ss:$8 sps:$4 sm:$0xff]   ;;  %v3702_v20 = vld [vmem:[#allocation7] ss:$8 sps:$4 sm:$0xff]   ;;  %v3933_v21 = vmov 0   ;;  %v463_v31 = vld [vmem:[#allocation8 + $0x78] sm:$0xff] }
  0x62   :  { %301 = vmatpush1.bf16.msra.mxu1 %v3684_v8  ;;  %330 = vmatprep.mubr.bf16.mxu1 %v3933_v21  ;;  %v3537_v22 = vld [vmem:[#allocation13] ss:$0 sm:$0xff]  ;;  %v461_v30 = vld [vmem:[#allocation8 + $0x68] sm:$0xff]  ;;  %v511_v33 = vunpack.c.h.s8.bf16 %v463_v31  ;;  %v462_v35 = vld [vmem:[#allocation8 + $0x70] sm:$0xff]  ;;  %v507_v39 = vunpack.c.l.s8.bf16 %v463_v31  ;;  %s3935_s4 = smov [#allocation14]  }
  0x63   :  { %302 = vmatprep.subr.bf16.mxu1 %v3685_v9  ;;  %v509_v32 = vunpack.c.h.s8.bf16 %v461_v30  ;;  %v460_v34 = vld [vmem:[#allocation8 + $0x60] sm:$0xff]  ;;  %v510_v37 = vunpack.c.h.s8.bf16 %v462_v35  ;;  %v505_v38 = vunpack.c.l.s8.bf16 %v461_v30  ;;  %v506_v41 = vunpack.c.l.s8.bf16 %v462_v35  ;;  %v457_v42 = vld [vmem:[#allocation8 + $0x48] sm:$0xff]  ;;  %v459_v43 = vld [vmem:[#allocation8 + $0x58] sm:$0xff]  ;;  %s3525_s6 = sshll.u32 %s3935_s4, 4  ;;  %s3526_s6 = int_to_ptr.vmem [resolvable:$true] %s3525_s6 }
  0x64   :  { %3653 = vmatmul.mubr.msk.bf16.vlgmr.msra.gmra.mxu0 %vm144_vm1, %v121_v7  ;;  %v508_v36 = vunpack.c.h.s8.bf16 %v460_v34  ;;  %v504_v40 = vunpack.c.l.s8.bf16 %v460_v34  ;;  %v501_v44 = vunpack.c.h.s8.bf16 %v457_v42  ;;  %v503_v45 = vunpack.c.h.s8.bf16 %v459_v43  ;;  %v456_v46 = vld [vmem:[#allocation8 + $0x40] sm:$0xff]  ;;  %v458_v47 = vld [vmem:[#allocation8 + $0x50] sm:$0xff]  ;;  %v453_v54 = vld [vmem:[#allocation8 + $0x28] sm:$0xff]  ;;  %s3885_s27 = scalar_lea.vmem %s3526_s6, 896  ;;  %p3890_p8 = scmp.lt.s32.totalorder %s3526_s6, %s3526_s6 }
  0x65   :  { %546 = vmatprep.subr.bf16.mxu0 %v509_v32  ;;  %v500_v48 = vunpack.c.h.s8.bf16 %v456_v46  ;;  %v502_v49 = vunpack.c.h.s8.bf16 %v458_v47  ;;  %v497_v50 = vunpack.c.l.s8.bf16 %v457_v42  ;;  %v499_v51 = vunpack.c.l.s8.bf16 %v459_v43  ;;  %v455_v55 = vld [vmem:[#allocation8 + $0x38] sm:$0xff]  ;;  %v452_v58 = vld [vmem:[#allocation8 + $0x20] sm:$0xff]  ;;  %v454_v59 = vld [vmem:[#allocation8 + $0x30] sm:$0xff]  ;;  %p3886_p7 = scmp.ne.s32.totalorder %s3526_s6, %s3885_s27  ;;  %p3891_p9 = scmp.lt.s32.totalorder %s3885_s27, %s3885_s27 }
  0x66   :  { %303 = vmatpush1.bf16.msra.mxu1 %v3687_v10  ;;  %547 = vmatpush1.bf16.msra.mxu0 %v508_v36  ;;  %v496_v52 = vunpack.c.l.s8.bf16 %v456_v46  ;;  %v498_v53 = vunpack.c.l.s8.bf16 %v458_v47  ;;  %v493_v56 = vunpack.c.h.s8.bf16 %v453_v54  ;;  %v495_v57 = vunpack.c.h.s8.bf16 %v455_v55  ;;  %v449_v2 = vld [vmem:[#allocation8 + $0x8] sm:$0xff]  ;;  %v451_v3 = vld [vmem:[#allocation8 + $0x18] sm:$0xff]  ;;  %v448_v4 = vld [vmem:[#allocation8] sm:$0xff] }
  0x67   :  { %304 = vmatprep.subr.bf16.mxu1 %v3688_v11  ;;  %548 = vmatprep.subr.bf16.mxu0 %v505_v38  ;;  %v492_v60 = vunpack.c.h.s8.bf16 %v452_v58  ;;  %v494_v61 = vunpack.c.h.s8.bf16 %v454_v59  ;;  %v489_v62 = vunpack.c.l.s8.bf16 %v453_v54  ;;  %v491_v63 = vunpack.c.l.s8.bf16 %v455_v55  ;;  %v450_v8 = vld [vmem:[#allocation8 + $0x10] sm:$0xff]  ;;  %v472_v30 = vld [vmem:[#allocation8 + $0xc0] sm:$0xff]  ;;  %v469_v36 = vld [vmem:[#allocation8 + $0xa8] sm:$0xff]  ;;  %p3892_p10 = por %p3891_p9, %p3890_p8 }
  0x68   :  { %v488_v0 = vunpack.c.l.s8.bf16 %v452_v58  ;;  %v490_v1 = vunpack.c.l.s8.bf16 %v454_v59  ;;  %v485_v5 = vunpack.c.h.s8.bf16 %v449_v2  ;;  %v487_v6 = vunpack.c.h.s8.bf16 %v451_v3  ;;  %v474_v31 = vld [vmem:[#allocation8 + $0xd0] sm:$0xff]  ;;  %v468_v42 = vld [vmem:[#allocation8 + $0xa0] sm:$0xff] }
  0x69   :  { %v484_v7 = vunpack.c.h.s8.bf16 %v448_v4  ;;  %v486_v9 = vunpack.c.h.s8.bf16 %v450_v8  ;;  %v481_v10 = vunpack.c.l.s8.bf16 %v449_v2  ;;  %v483_v11 = vunpack.c.l.s8.bf16 %v451_v3  ;;  %v470_v43 = vld [vmem:[#allocation8 + $0xb0] sm:$0xff]  ;;  %v464_v54 = vld [vmem:[#allocation8 + $0x80] sm:$0xff]  ;;  %p3893_p11 = pnand %p3892_p10, %p3886_p7 }
  0x6a   :  { %305 = vmatpush1.bf16.msra.mxu1 %v3690_v12  ;;  %549 = vmatpush1.bf16.msra.mxu0 %v504_v40  ;;  %v477_v12 = vld [vmem:[#allocation8 + $0xe8] sm:$0xff]  ;;  %v532_v32 = vunpack.c.h.s8.bf16 %v472_v30  ;;  %v528_v38 = vunpack.c.l.s8.bf16 %v472_v30  ;;  %v525_v40 = vunpack.c.h.s8.bf16 %v469_v36  ;;  %v521_v46 = vunpack.c.l.s8.bf16 %v469_v36  ;;  %v466_v55 = vld [vmem:[#allocation8 + $0x90] sm:$0xff] }
  0x6b   :  { %306 = vmatprep.subr.bf16.mxu1 %v3691_v13  ;;  %550 = vmatprep.subr.bf16.mxu0 %v501_v44  ;;  %v479_v13 = vld [vmem:[#allocation8 + $0xf8] sm:$0xff]  ;;  %v524_v44 = vunpack.c.h.s8.bf16 %v468_v42 }
  0x6e   :  { %307 = vmatpush1.bf16.msra.mxu1 %v3693_v14  ;;  %551 = vmatpush1.bf16.msra.mxu0 %v500_v48  ;;  %v480_v14 = vunpack.c.l.s8.bf16 %v448_v4  ;;  %v465_v48 = vld [vmem:[#allocation8 + $0x88] sm:$0xff] }
  0x6f   :  { %308 = vmatprep.subr.bf16.mxu1 %v3694_v15  ;;  %552 = vmatprep.subr.bf16.mxu0 %v497_v50  ;;  %v482_v15 = vunpack.c.l.s8.bf16 %v450_v8  ;;  %v520_v50 = vunpack.c.l.s8.bf16 %v468_v42  ;;  %v513_v58 = vunpack.c.l.s8.bf16 %v465_v48 }
  0x72   :  { %309 = vmatpush1.bf16.msra.mxu1 %v3696_v16  ;;  %553 = vmatpush1.bf16.msra.mxu0 %v496_v52  ;;  %v541_v16 = vunpack.c.h.s8.bf16 %v477_v12  ;;  %v517_v52 = vunpack.c.h.s8.bf16 %v465_v48 }
  0x73   :  { %310 = vmatprep.subr.bf16.mxu1 %v3697_v17  ;;  %554 = vmatprep.subr.bf16.mxu0 %v493_v56  ;;  %v543_v17 = vunpack.c.h.s8.bf16 %v479_v13  ;;  %v516_v56 = vunpack.c.h.s8.bf16 %v464_v54 }
  0x76   :  { %311 = vmatpush1.bf16.msra.mxu1 %v3699_v18  ;;  %555 = vmatpush1.bf16.msra.mxu0 %v492_v60  ;;  %v476_v18 = vld [vmem:[#allocation8 + $0xe0] sm:$0xff]  ;;  %v512_v60 = vunpack.c.l.s8.bf16 %v464_v54 }
  0x77   :  { %312 = vmatprep.subr.bf16.mxu1 %v3700_v19  ;;  %556 = vmatprep.subr.bf16.mxu0 %v489_v62  ;;  %v478_v19 = vld [vmem:[#allocation8 + $0xf0] sm:$0xff]  ;;  %v208_v62 = vlaneseq }
  0x78   :  { %v542_v21 = vunpack.c.h.s8.bf16 %v478_v19 }
  0x7a   :  { %313 = vmatpush1.bf16.msra.mxu1 %v3702_v20  ;;  %557 = vmatpush1.bf16.msra.mxu0 %v488_v0  ;;  %v540_v20 = vunpack.c.h.s8.bf16 %v476_v18 }
  0x7b   :  { %587 = vmatprep.subr.bf16.mxu1 %v511_v33  ;;  %558 = vmatprep.subr.bf16.mxu0 %v485_v5  ;;  %v534_v33 = vunpack.c.h.s8.bf16 %v474_v31 }
  0x7e   :  { %559 = vmatpush1.bf16.msra.mxu0 %v484_v7 }
  0x7f   :  { %560 = vmatprep.subr.bf16.mxu0 %v481_v10 }
  0x82   :  { %561 = vmatpush1.bf16.msra.mxu0 %v480_v14 }
  0x83   :  { %562 = vmatprep.subr.bf16.mxu0 %v541_v16 }
  0x86   :  { %563 = vmatpush2.bf16.msra.mxu0 %v540_v20 }
 0x124   :  { %v182_v23 = vpop.f32.mrf.mxu0 }
 0x125   :  { %v183_v24 = vadd.f32 %v3537_v22, %v182_v23  ;;  %v537_v22 = vunpack.c.l.s8.bf16 %v477_v12  ;;  %v539_v23 = vunpack.c.l.s8.bf16 %v479_v13 }
 0x126   :  { %v3654_v25 = vpop.f32.mrf.mxu0 }
 0x127   :  { %v188_v26 = vmax.f32 %v183_v24, 0.0  ;;  %v473_v24 = vld [vmem:[#allocation8 + $0xc8] sm:$0xff]  ;;  %v475_v25 = vld [vmem:[#allocation8 + $0xd8] sm:$0xff]  ;;  %564 = vmatprep.subr.bf16.mxu0 %v537_v22 }
 0x128   :  { %v185_v27 = vpop.f32.mrf.mxu0  ;;  %v529_v34 = vunpack.c.l.s8.bf16 %v473_v24  ;;  %v531_v35 = vunpack.c.l.s8.bf16 %v475_v25 }
 0x129   :  { %v190_v28 = vpack.c.bf16 %v188_v26, %v188_v26  ;;  %v536_v26 = vunpack.c.l.s8.bf16 %v476_v18  ;;  %v538_v27 = vunpack.c.l.s8.bf16 %v478_v19 }
 0x12a   :  { %v3655_v29 = vpop.f32.mrf.mxu0 }
 0x12b   :  { %331 = vmatmul.mubr.bf16.vlgmr.msra.gmra.mxu1 %v190_v28  ;;  %v533_v28 = vunpack.c.h.s8.bf16 %v473_v24  ;;  %v535_v29 = vunpack.c.h.s8.bf16 %v475_v25  ;;  %565 = vmatpush2.bf16.msra.mxu0 %v536_v26 }
 0x12c   :  { %588 = vmatpush1.bf16.msra.mxu1 %v510_v37  ;;  %v471_v37 = vld [vmem:[#allocation8 + $0xb8] sm:$0xff] }
 0x12d   :  { %589 = vmatprep.subr.bf16.mxu1 %v507_v39  ;;  %566 = vmatprep.subr.bf16.mxu0 %v533_v28  ;;  %v530_v39 = vunpack.c.l.s8.bf16 %v474_v31  ;;  %v523_v47 = vunpack.c.l.s8.bf16 %v471_v37 }
 0x12f   :  { %567 = vmatpush2.bf16.msra.mxu0 %v532_v32 }
 0x130   :  { %590 = vmatpush1.bf16.msra.mxu1 %v506_v41  ;;  %568 = vmatprep.subr.bf16.mxu0 %v529_v34  ;;  %v527_v41 = vunpack.c.h.s8.bf16 %v471_v37 }
 0x131   :  { %591 = vmatprep.subr.bf16.mxu1 %v503_v45  ;;  %v526_v45 = vunpack.c.h.s8.bf16 %v470_v43 }
 0x133   :  { %569 = vmatpush2.bf16.msra.mxu0 %v528_v38 }
 0x134   :  { %592 = vmatpush1.bf16.msra.mxu1 %v502_v49  ;;  %570 = vmatprep.subr.bf16.mxu0 %v525_v40  ;;  %v467_v49 = vld [vmem:[#allocation8 + $0x98] sm:$0xff] }
 0x135   :  { %593 = vmatprep.subr.bf16.mxu1 %v499_v51  ;;  %v522_v51 = vunpack.c.l.s8.bf16 %v470_v43  ;;  %v515_v59 = vunpack.c.l.s8.bf16 %v467_v49 }
 0x137   :  { %571 = vmatpush2.bf16.msra.mxu0 %v524_v44 }
 0x138   :  { %594 = vmatpush1.bf16.msra.mxu1 %v498_v53  ;;  %572 = vmatprep.subr.bf16.mxu0 %v521_v46  ;;  %v519_v53 = vunpack.c.h.s8.bf16 %v467_v49 }
 0x139   :  { %595 = vmatprep.subr.bf16.mxu1 %v495_v57  ;;  %v518_v57 = vunpack.c.h.s8.bf16 %v466_v55 }
 0x13b   :  { %573 = vmatpush2.bf16.msra.mxu0 %v520_v50 }
 0x13c   :  { %596 = vmatpush1.bf16.msra.mxu1 %v494_v61  ;;  %574 = vmatprep.subr.bf16.mxu0 %v517_v52  ;;  %v514_v61 = vunpack.c.l.s8.bf16 %v466_v55 }
 0x13d   :  { %597 = vmatprep.subr.bf16.mxu1 %v491_v63  ;;  %v4000_v63 = vshrl.u32 %v208_v62, 7  ;;  %v340_v62 = vld [vmem:[#allocation13 + $0x24] sm:$0x3] }
 0x13f   :  { %575 = vmatpush2.bf16.msra.mxu0 %v516_v56  ;;  %v4003_v0 = vsub.s32 0, %v4000_v63  ;;  %v4006_v2 = vsub.s32 1, %v4000_v63 }
 0x140   :  { %598 = vmatpush1.bf16.msra.mxu1 %v490_v1  ;;  %576 = vmatprep.subr.bf16.mxu0 %v513_v58  ;;  %v189_v1 = vld [vmem:[#allocation13 + $0x1] sm:$0x3] }
 0x141   :  { %599 = vmatprep.subr.bf16.mxu1 %v487_v6  ;;  %v211_v3 = vrot.slane %v189_v1, %v4003_v0  ;;  %v215_v4 = vrot.slane %v189_v1, %v4006_v2 }
 0x143   :  { %577 = vmatpush2.bf16.msra.mxu0 %v512_v60 }
 0x144   :  { %600 = vmatpush1.bf16.msra.mxu1 %v486_v9 }
 0x145   :  { %601 = vmatprep.subr.bf16.mxu1 %v483_v11 }
 0x148   :  { %602 = vmatpush1.bf16.msra.mxu1 %v482_v15 }
 0x149   :  { %603 = vmatprep.subr.bf16.mxu1 %v543_v17 }
 0x14c   :  { %604 = vmatpush2.bf16.msra.mxu1 %v542_v21 }
 0x14d   :  { %605 = vmatprep.subr.bf16.mxu1 %v539_v23 }
 0x150   :  { %606 = vmatpush2.bf16.msra.mxu1 %v538_v27 }
 0x151   :  { %607 = vmatprep.subr.bf16.mxu1 %v535_v29 }
 0x154   :  { %608 = vmatpush2.bf16.msra.mxu1 %v534_v33 }
 0x155   :  { %609 = vmatprep.subr.bf16.mxu1 %v531_v35 }
 0x158   :  { %610 = vmatpush2.bf16.msra.mxu1 %v530_v39 }
 0x159   :  { %611 = vmatprep.subr.bf16.mxu1 %v527_v41 }
 0x15c   :  { %612 = vmatpush2.bf16.msra.mxu1 %v526_v45  ;;  %v3934_v45 = vmov 1966171168  }
 0x15d   :  { %613 = vmatprep.subr.bf16.mxu1 %v523_v47  ;;  %v382_v46 = vunpack.c.l.s4 %v3934_v45 }
 0x15f   :  { %v383_v47 = vunpack.c.0.s8 %v382_v46 }
 0x160   :  { %614 = vmatpush2.bf16.msra.mxu1 %v522_v51 }
 0x161   :  { %615 = vmatprep.subr.bf16.mxu1 %v519_v53  ;;  %v4016_v49 = vsub.s32 %v383_v47, %v4000_v63  ;;  %v339_v53 = vld [vmem:[#allocation13 + $0x16] sm:$0x3] }
 0x164   :  { %616 = vmatpush2.bf16.msra.mxu1 %v518_v57 }
 0x165   :  { %617 = vmatprep.subr.bf16.mxu1 %v515_v59 }
 0x168   :  { %618 = vmatpush2.bf16.msra.mxu1 %v514_v61 }
 0x1eb   :  { %v332_v5 = vpop.f32.mrf.mxu1 }
 0x1ec   :  { %v4010_v6 = vadd.f32 %v332_v5, %v211_v3 }
 0x1ed   :  { %v334_v7 = vpop.f32.mrf.mxu1 }
 0x1ee   :  { %v341_v8 = vrot.slane %v4010_v6, 4  ;;  %v335_v9 = vadd.f32 %v334_v7, %v215_v4 }
 0x1ef   :  { %v336_v10 = vpop.f32.mrf.mxu1 }
 0x1f0   :  { %v342_v11 = vadd.f32 %v341_v8, %v4010_v6  ;;  %v347_v12 = vrot.slane %v335_v9, 4 }
 0x1f1   :  { %v337_v13 = vpop.f32.mrf.mxu1 }
 0x1f2   :  { %v343_v14 = vrot.slane %v342_v11, 2  ;;  %v348_v15 = vadd.f32 %v347_v12, %v335_v9 }
 0x1f4   :  { %v344_v16 = vadd.f32 %v343_v14, %v342_v11  ;;  %v349_v17 = vrot.slane %v348_v15, 2 }
 0x1f6   :  { %v345_v18 = vrot.slane %v344_v16, 1  ;;  %v350_v19 = vadd.f32 %v349_v17, %v348_v15  ;;  %v961_v17 = vld [vmem:[#allocation10 + $0x2c8] sm:$0xff] }
 0x1f8   :  { %v346_v20 = vadd.f32 %v345_v18, %v344_v16  ;;  %v351_v21 = vrot.slane %v350_v19, 1  ;;  %v897_v16 = vld [vmem:[#allocation10 + $0xc8] sm:$0xff] }
 0x1f9   :  { %v1057_v18 = vunpack.c.h.s8.bf16 %v897_v16 }
 0x1fa   :  { %v354_v22 = vmul.f32 0.125, %v346_v20  ;;  %v352_v23 = vadd.f32 %v351_v21, %v350_v19  ;;  %v896_v19 = vld [vmem:[#allocation10 + $0xc0] sm:$0xff] }
 0x1fb   :  { %v960_v20 = vld [vmem:[#allocation10 + $0x2c0] sm:$0xff]  ;;  %v1056_v21 = vunpack.c.h.s8.bf16 %v896_v19  ;;  %1260 = vmatprep.subr.bf16.mxu0 %v1057_v18 }
 0x1fc   :  { %v356_v24 = vsub.f32 %v4010_v6, %v354_v22  ;;  %v355_v25 = vmul.f32 0.125, %v352_v23  ;;  %v1177_v23 = vunpack.c.l.s8.bf16 %v961_v17 }
 0x1fe   :  { %v358_v26 = vmul.f32 %v356_v24, %v356_v24  ;;  %v357_v27 = vsub.f32 %v335_v9, %v355_v25  ;;  %v1048_v24 = vunpack.c.l.s8.bf16 %v896_v19  ;;  %v920_v19 = vld [vmem:[#allocation10 + $0x180] sm:$0xff] }
 0x200   :  { %v360_v28 = vrot.slane %v358_v26, 4  ;;  %v359_v29 = vmul.f32 %v357_v27, %v357_v27  ;;  %v953_v27 = vld [vmem:[#allocation10 + $0x288] sm:$0xff] }
 0x202   :  { %v361_v30 = vadd.f32 %v360_v28, %v358_v26  ;;  %v366_v31 = vrot.slane %v359_v29, 4  ;;  %v889_v26 = vld [vmem:[#allocation10 + $0x88] sm:$0xff] }
 0x203   :  { %v1041_v28 = vunpack.c.h.s8.bf16 %v889_v26 }
 0x204   :  { %v362_v32 = vrot.slane %v361_v30, 2  ;;  %v367_v33 = vadd.f32 %v366_v31, %v359_v29  ;;  %v1169_v29 = vunpack.c.h.s8.bf16 %v953_v27  ;;  %v952_v31 = vld [vmem:[#allocation10 + $0x280] sm:$0xff] }
 0x206   :  { %v363_v34 = vadd.f32 %v362_v32, %v361_v30  ;;  %v368_v35 = vrot.slane %v367_v33, 2  ;;  %v888_v30 = vld [vmem:[#allocation10 + $0x80] sm:$0xff] }
 0x207   :  { %v1040_v32 = vunpack.c.h.s8.bf16 %v888_v30 }
 0x208   :  { %v364_v36 = vrot.slane %v363_v34, 1  ;;  %v369_v37 = vadd.f32 %v368_v35, %v367_v33  ;;  %v1168_v33 = vunpack.c.h.s8.bf16 %v952_v31  ;;  %v1161_v35 = vunpack.c.l.s8.bf16 %v953_v27  ;;  %v977_v27 = vld [vmem:[#allocation10 + $0x348] sm:$0xff] }
 0x20a   :  { %v365_v38 = vadd.f32 %v364_v36, %v363_v34  ;;  %v370_v39 = vrot.slane %v369_v37, 1  ;;  %v1033_v34 = vunpack.c.l.s8.bf16 %v889_v26  ;;  %v1032_v36 = vunpack.c.l.s8.bf16 %v888_v30  ;;  %v913_v26 = vld [vmem:[#allocation10 + $0x148] sm:$0xff]  ;;  %v912_v30 = vld [vmem:[#allocation10 + $0x140] sm:$0xff] }
 0x20c   :  { %v372_v40 = vmul.f32 0.125, %v365_v38  ;;  %v371_v41 = vadd.f32 %v370_v39, %v369_v37  ;;  %v1160_v37 = vunpack.c.l.s8.bf16 %v952_v31  ;;  %v881_v38 = vld [vmem:[#allocation10 + $0x48] sm:$0xff]  ;;  %v976_v31 = vld [vmem:[#allocation10 + $0x340] sm:$0xff] }
 0x20d   :  { %v945_v39 = vld [vmem:[#allocation10 + $0x248] sm:$0xff]  ;;  %v1017_v46 = vunpack.c.l.s8.bf16 %v881_v38 }
 0x20e   :  { %v374_v42 = vadd.f32 0.8, %v372_v40  ;;  %v373_v43 = vmul.f32 0.125, %v371_v41  ;;  %v1025_v40 = vunpack.c.h.s8.bf16 %v881_v38  ;;  %v1153_v41 = vunpack.c.h.s8.bf16 %v945_v39 }
 0x20f   :  { %v1145_v47 = vunpack.c.l.s8.bf16 %v945_v39  ;;  %v1080_v38 = vunpack.c.l.s8.bf16 %v912_v30  ;;  %v1208_v39 = vunpack.c.l.s8.bf16 %v976_v31 }
 0x210   :  { %v375_v44 = vadd.f32 0.8, %v373_v43  ;;  %3703 = vrsqrt.f32 %v374_v42  ;;  %v880_v42 = vld [vmem:[#allocation10 + $0x40] sm:$0xff] }
 0x211   :  { %v944_v43 = vld [vmem:[#allocation10 + $0x240] sm:$0xff] }
 0x212   :  { %3705 = vrsqrt.f32 %v375_v44  ;;  %v1024_v44 = vunpack.c.h.s8.bf16 %v880_v42  ;;  %v1152_v45 = vunpack.c.h.s8.bf16 %v944_v43 }
 0x21d   :  { %v3704_v48 = vpop.eup %3703 }
 0x21f   :  { %v3706_v50 = vpop.eup %3705 }
 0x220   :  { %v380_v51 = vcombine.low %v3704_v48, %v3706_v50  ;;  %v1016_v48 = vunpack.c.l.s8.bf16 %v880_v42  ;;  %v1144_v50 = vunpack.c.l.s8.bf16 %v944_v43  ;;  %v904_v42 = vld [vmem:[#allocation10 + $0x100] sm:$0xff] }
 0x221   :  { %v968_v43 = vld [vmem:[#allocation10 + $0x300] sm:$0xff] }
 0x222   :  { %v387_v52 = vrot.slane %v380_v51, %v4016_v49  ;;  %v873_v51 = vld [vmem:[#allocation10 + $0x8] sm:$0xff] }
 0x224   :  { %v394_v54 = vrot.slane %v387_v52, %v4016_v49  ;;  %v937_v52 = vld [vmem:[#allocation10 + $0x208] sm:$0xff] }
 0x226   :  { %v396_v55 = vmul.f32 %v394_v54, %v339_v53  ;;  %v1009_v53 = vunpack.c.h.s8.bf16 %v873_v51  ;;  %v1137_v54 = vunpack.c.h.s8.bf16 %v937_v52 }
 0x228   :  { %v401_v56 = vrot.slane %v396_v55, %v4003_v0  ;;  %v405_v57 = vrot.slane %v396_v55, %v4006_v2  ;;  %v872_v55 = vld [vmem:[#allocation10] sm:$0xff] }
 0x22a   :  { %v408_v58 = vmul.f32 %v401_v56, %v354_v22  ;;  %v409_v59 = vmul.f32 %v405_v57, %v355_v25  ;;  %v430_v4 = vmul.f32 %v405_v57, %v335_v9  ;;  %v429_v7 = vmul.f32 %v401_v56, %v4010_v6  ;;  %v936_v56 = vld [vmem:[#allocation10 + $0x200] sm:$0xff] }
 0x22b   :  { %v1185_v9 = vunpack.c.h.s8.bf16 %v961_v17  ;;  %v1184_v6 = vunpack.c.h.s8.bf16 %v960_v20  ;;  %v1049_v22 = vunpack.c.l.s8.bf16 %v897_v16  ;;  %v1176_v25 = vunpack.c.l.s8.bf16 %v960_v20  ;;  %v921_v16 = vld [vmem:[#allocation10 + $0x188] sm:$0xff]  ;;  %v984_v20 = vld [vmem:[#allocation10 + $0x380] sm:$0xff] }
 0x22c   :  { %v412_v60 = vcombine.low %v408_v58, %v409_v59  ;;  %v1008_v57 = vunpack.c.h.s8.bf16 %v872_v55  ;;  %v1136_v58 = vunpack.c.h.s8.bf16 %v936_v56  ;;  %v1001_v59 = vunpack.c.l.s8.bf16 %v873_v51  ;;  %v985_v17 = vld [vmem:[#allocation10 + $0x388] sm:$0xff]  ;;  %v4027_v51 = vld [vmem:[#allocation10 + $0xd8] sm:$0xff] }
 0x22d   :  { %1301 = vmatprep.subr.bf16.mxu1 %v1185_v9  ;;  %v1105_v18 = vunpack.c.h.s8.bf16 %v921_v16  ;;  %v1233_v9 = vunpack.c.h.s8.bf16 %v985_v17 }
 0x22e   :  { %v419_v61 = vrot.slane %v412_v60, %v4016_v49  ;;  %v1129_v60 = vunpack.c.l.s8.bf16 %v937_v52  ;;  %v4029_v52 = vld [vmem:[#allocation10 + $0x2d8] sm:$0xff] }
 0x230   :  { %v426_v1 = vrot.slane %v419_v61, %v4016_v49  ;;  %v1000_v61 = vunpack.c.l.s8.bf16 %v872_v55  ;;  %v4034_v55 = vsub.s32 2, %v4000_v63 }
 0x232   :  { %v428_v3 = vsub.f32 %v340_v62, %v426_v1  ;;  %v1128_v62 = vunpack.c.l.s8.bf16 %v936_v56  ;;  %v929_v1 = vld [vmem:[#allocation10 + $0x1c8] sm:$0xff]  ;;  %v446_v56 = vld [vmem:[#allocation13 + $0x32] sm:$0xf] }
 0x234   :  { %v439_v5 = vrot.slane %v428_v3, %v4006_v2  ;;  %v435_v8 = vrot.slane %v428_v3, %v4003_v0  ;;  %v993_v3 = vld [vmem:[#allocation10 + $0x3c8] sm:$0xff] }
 0x236   :  { %v443_v10 = vadd.f32 %v439_v5, %v430_v4  ;;  %v442_v11 = vadd.f32 %v435_v8, %v429_v7  ;;  %v1121_v4 = vunpack.c.h.s8.bf16 %v929_v1  ;;  %v1249_v5 = vunpack.c.h.s8.bf16 %v993_v3  ;;  %v928_v7 = vld [vmem:[#allocation10 + $0x1c0] sm:$0xff] }
 0x237   :  { %v992_v8 = vld [vmem:[#allocation10 + $0x3c0] sm:$0xff] }
 0x238   :  { %v445_v12 = vmax.f32 %v443_v10, 0.0  ;;  %v444_v13 = vmax.f32 %v442_v11, 0.0  ;;  %v1120_v10 = vunpack.c.h.s8.bf16 %v928_v7  ;;  %v1248_v11 = vunpack.c.h.s8.bf16 %v992_v8 }
 0x23a   :  { %v545_v14 = vpack.c.bf16 %v445_v12, %v445_v12  ;;  %v544_v15 = vpack.c.bf16 %v444_v13, %v444_v13  ;;  %v1113_v12 = vunpack.c.l.s8.bf16 %v929_v1  ;;  %v1241_v13 = vunpack.c.l.s8.bf16 %v993_v3 }
 0x23b   :  { %v636_v1 = vrot.slane %v446_v56, %v4006_v2 }
 0x23c   :  { %578 = vmatprep.mubr.bf16.mxu0 %v545_v14  ;;  %619 = vmatprep.mubr.bf16.mxu1 %v545_v14  ;;  %v1112_v14 = vunpack.c.l.s8.bf16 %v928_v7 }
 0x23d   :  { %579 = vmatmul.mubr.bf16.vlgmr.msra.gmra.mxu0 %v544_v15  ;;  %620 = vmatmul.mubr.bf16.vlgmr.msra.gmra.mxu1 %v544_v15  ;;  %v1240_v15 = vunpack.c.l.s8.bf16 %v992_v8 }
 0x23e   :  { %1261 = vmatpush1.bf16.msra.mxu0 %v1056_v21  ;;  %1302 = vmatpush1.bf16.msra.mxu1 %v1184_v6  ;;  %v1104_v21 = vunpack.c.h.s8.bf16 %v920_v19  ;;  %v1232_v6 = vunpack.c.h.s8.bf16 %v984_v20 }
 0x23f   :  { %1262 = vmatprep.subr.bf16.mxu0 %v1049_v22  ;;  %1303 = vmatprep.subr.bf16.mxu1 %v1177_v23  ;;  %v1097_v22 = vunpack.c.l.s8.bf16 %v921_v16  ;;  %v1225_v23 = vunpack.c.l.s8.bf16 %v985_v17 }
 0x242   :  { %1263 = vmatpush1.bf16.msra.mxu0 %v1048_v24  ;;  %1304 = vmatpush1.bf16.msra.mxu1 %v1176_v25  ;;  %v1096_v24 = vunpack.c.l.s8.bf16 %v920_v19  ;;  %v1224_v25 = vunpack.c.l.s8.bf16 %v984_v20 }
 0x243   :  { %1264 = vmatprep.subr.bf16.mxu0 %v1041_v28  ;;  %1305 = vmatprep.subr.bf16.mxu1 %v1169_v29  ;;  %v1089_v28 = vunpack.c.h.s8.bf16 %v913_v26  ;;  %v1217_v29 = vunpack.c.h.s8.bf16 %v977_v27 }
 0x246   :  { %1265 = vmatpush1.bf16.msra.mxu0 %v1040_v32  ;;  %1306 = vmatpush1.bf16.msra.mxu1 %v1168_v33  ;;  %v1088_v32 = vunpack.c.h.s8.bf16 %v912_v30  ;;  %v1216_v33 = vunpack.c.h.s8.bf16 %v976_v31 }
 0x247   :  { %1266 = vmatprep.subr.bf16.mxu0 %v1033_v34  ;;  %1307 = vmatprep.subr.bf16.mxu1 %v1161_v35  ;;  %v1081_v34 = vunpack.c.l.s8.bf16 %v913_v26  ;;  %v1209_v35 = vunpack.c.l.s8.bf16 %v977_v27 }
 0x24a   :  { %1267 = vmatpush1.bf16.msra.mxu0 %v1032_v36  ;;  %1308 = vmatpush1.bf16.msra.mxu1 %v1160_v37  ;;  %v905_v36 = vld [vmem:[#allocation10 + $0x108] sm:$0xff] }
 0x24b   :  { %1268 = vmatprep.subr.bf16.mxu0 %v1025_v40  ;;  %1309 = vmatprep.subr.bf16.mxu1 %v1153_v41  ;;  %v969_v37 = vld [vmem:[#allocation10 + $0x308] sm:$0xff]  ;;  %v1073_v40 = vunpack.c.h.s8.bf16 %v905_v36 }
 0x24c   :  { %v1201_v41 = vunpack.c.h.s8.bf16 %v969_v37 }
 0x24e   :  { %1269 = vmatpush1.bf16.msra.mxu0 %v1024_v44  ;;  %1310 = vmatpush1.bf16.msra.mxu1 %v1152_v45  ;;  %v1072_v44 = vunpack.c.h.s8.bf16 %v904_v42  ;;  %v1200_v45 = vunpack.c.h.s8.bf16 %v968_v43 }
 0x24f   :  { %1270 = vmatprep.subr.bf16.mxu0 %v1017_v46  ;;  %1311 = vmatprep.subr.bf16.mxu1 %v1145_v47  ;;  %v1065_v46 = vunpack.c.l.s8.bf16 %v905_v36  ;;  %v1193_v47 = vunpack.c.l.s8.bf16 %v969_v37 }
 0x252   :  { %1271 = vmatpush1.bf16.msra.mxu0 %v1016_v48  ;;  %1312 = vmatpush1.bf16.msra.mxu1 %v1144_v50  ;;  %v1064_v48 = vunpack.c.l.s8.bf16 %v904_v42  ;;  %v1192_v50 = vunpack.c.l.s8.bf16 %v968_v43 }
 0x253   :  { %1272 = vmatprep.subr.bf16.mxu0 %v1009_v53  ;;  %1313 = vmatprep.subr.bf16.mxu1 %v1137_v54  ;;  %v1059_v53 = vunpack.c.h.s8.bf16 %v4027_v51  ;;  %v1187_v54 = vunpack.c.h.s8.bf16 %v4029_v52 }
 0x256   :  { %1273 = vmatpush1.bf16.msra.mxu0 %v1008_v57  ;;  %1314 = vmatpush1.bf16.msra.mxu1 %v1136_v58  ;;  %v4037_v57 = vsub.s32 3, %v4000_v63  ;;  %v447_v58 = vld [vmem:[#allocation13 + $0x3] sm:$0xf] }
 0x257   :  { %1274 = vmatprep.subr.bf16.mxu0 %v1001_v59  ;;  %1315 = vmatprep.subr.bf16.mxu1 %v1129_v60  ;;  %v632_v59 = vrot.slane %v446_v56, %v4003_v0  ;;  %v640_v60 = vrot.slane %v446_v56, %v4034_v55 }
 0x258   :  { %v644_v3 = vrot.slane %v446_v56, %v4037_v57 }
 0x25a   :  { %1275 = vmatpush1.bf16.msra.mxu0 %v1000_v61  ;;  %1316 = vmatpush1.bf16.msra.mxu1 %v1128_v62  ;;  %v657_v61 = vrot.slane %v447_v58, %v4003_v0  ;;  %v665_v62 = vrot.slane %v447_v58, %v4034_v55 }
 0x25b   :  { %1276 = vmatprep.subr.bf16.mxu0 %v1121_v4  ;;  %1317 = vmatprep.subr.bf16.mxu1 %v1249_v5 }
 0x25e   :  { %1277 = vmatpush2.bf16.msra.mxu0 %v1120_v10  ;;  %1318 = vmatpush2.bf16.msra.mxu1 %v1248_v11  ;;  %v661_v10 = vrot.slane %v447_v58, %v4006_v2  ;;  %v669_v11 = vrot.slane %v447_v58, %v4037_v57 }
 0x25f   :  { %1278 = vmatprep.subr.bf16.mxu0 %v1113_v12  ;;  %1319 = vmatprep.subr.bf16.mxu1 %v1241_v13 }
 0x262   :  { %1279 = vmatpush2.bf16.msra.mxu0 %v1112_v14  ;;  %1320 = vmatpush2.bf16.msra.mxu1 %v1240_v15 }
 0x263   :  { %1280 = vmatprep.subr.bf16.mxu0 %v1105_v18  ;;  %1321 = vmatprep.subr.bf16.mxu1 %v1233_v9 }
 0x266   :  { %1281 = vmatpush2.bf16.msra.mxu0 %v1104_v21  ;;  %1322 = vmatpush2.bf16.msra.mxu1 %v1232_v6 }
 0x267   :  { %1282 = vmatprep.subr.bf16.mxu0 %v1097_v22  ;;  %1323 = vmatprep.subr.bf16.mxu1 %v1225_v23 }
 0x26a   :  { %1283 = vmatpush2.bf16.msra.mxu0 %v1096_v24  ;;  %1324 = vmatpush2.bf16.msra.mxu1 %v1224_v25 }
 0x26b   :  { %1284 = vmatprep.subr.bf16.mxu0 %v1089_v28  ;;  %1325 = vmatprep.subr.bf16.mxu1 %v1217_v29 }
 0x26e   :  { %1285 = vmatpush2.bf16.msra.mxu0 %v1088_v32  ;;  %1326 = vmatpush2.bf16.msra.mxu1 %v1216_v33 }
 0x26f   :  { %1286 = vmatprep.subr.bf16.mxu0 %v1081_v34  ;;  %1327 = vmatprep.subr.bf16.mxu1 %v1209_v35 }
 0x272   :  { %1287 = vmatpush2.bf16.msra.mxu0 %v1080_v38  ;;  %1328 = vmatpush2.bf16.msra.mxu1 %v1208_v39 }
 0x273   :  { %1288 = vmatprep.subr.bf16.mxu0 %v1073_v40  ;;  %1329 = vmatprep.subr.bf16.mxu1 %v1201_v41 }
 0x276   :  { %1289 = vmatpush2.bf16.msra.mxu0 %v1072_v44  ;;  %1330 = vmatpush2.bf16.msra.mxu1 %v1200_v45 }
 0x277   :  { %1290 = vmatprep.subr.bf16.mxu0 %v1065_v46  ;;  %1331 = vmatprep.subr.bf16.mxu1 %v1193_v47 }
 0x27a   :  { %1291 = vmatpush2.bf16.msra.mxu0 %v1064_v48  ;;  %1332 = vmatpush2.bf16.msra.mxu1 %v1192_v50 }
 0x27b   :  { %1342 = vmatprep.subr.bf16.mxu0 %v1059_v53  ;;  %1383 = vmatprep.subr.bf16.mxu1 %v1187_v54 }
 0x2fd   :  { %v580_v4 = vpop.f32.mrf.mxu0  ;;  %v621_v5 = vpop.f32.mrf.mxu1 }
 0x2fe   :  { %v649_v7 = vmul.f32 %v632_v59, %v580_v4  ;;  %v651_v8 = vmul.f32 %v640_v60, %v621_v5 }
 0x2ff   :  { %v582_v12 = vpop.f32.mrf.mxu0  ;;  %v623_v13 = vpop.f32.mrf.mxu1 }
 0x300   :  { %v4047_v14 = vadd.f32 %v657_v61, %v649_v7  ;;  %v4049_v15 = vadd.f32 %v665_v62, %v651_v8  ;;  %v650_v16 = vmul.f32 %v636_v1, %v582_v12  ;;  %v652_v17 = vmul.f32 %v644_v3, %v623_v13 }
 0x301   :  { %v584_v18 = vpop.f32.mrf.mxu0  ;;  %v625_v9 = vpop.f32.mrf.mxu1 }
 0x302   :  { %v680_v19 = vrot.slane %v4047_v14, 4  ;;  %v692_v20 = vrot.slane %v4049_v15, 4  ;;  %v4053_v21 = vadd.f32 %v661_v10, %v650_v16  ;;  %v4055_v6 = vadd.f32 %v669_v11, %v652_v17 }
 0x303   :  { %v585_v22 = vpop.f32.mrf.mxu0  ;;  %v626_v23 = vpop.f32.mrf.mxu1 }
 0x304   :  { %v681_v24 = vadd.f32 %v680_v19, %v4047_v14  ;;  %v693_v25 = vadd.f32 %v692_v20, %v4049_v15  ;;  %v686_v26 = vrot.slane %v4053_v21, 4  ;;  %v698_v27 = vrot.slane %v4055_v6, 4 }
 0x306   :  { %v682_v28 = vrot.slane %v681_v24, 2  ;;  %v694_v29 = vrot.slane %v693_v25, 2  ;;  %v687_v30 = vadd.f32 %v686_v26, %v4053_v21  ;;  %v699_v31 = vadd.f32 %v698_v27, %v4055_v6 }
 0x308   :  { %v683_v32 = vadd.f32 %v682_v28, %v681_v24  ;;  %v695_v33 = vadd.f32 %v694_v29, %v693_v25  ;;  %v688_v34 = vrot.slane %v687_v30, 2  ;;  %v700_v35 = vrot.slane %v699_v31, 2 }
 0x30a   :  { %v684_v36 = vrot.slane %v683_v32, 1  ;;  %v696_v37 = vrot.slane %v695_v33, 1  ;;  %v689_v38 = vadd.f32 %v688_v34, %v687_v30  ;;  %v701_v39 = vadd.f32 %v700_v35, %v699_v31 }
 0x30c   :  { %v685_v40 = vadd.f32 %v684_v36, %v683_v32  ;;  %v697_v41 = vadd.f32 %v696_v37, %v695_v33  ;;  %v690_v42 = vrot.slane %v689_v38, 1  ;;  %v702_v43 = vrot.slane %v701_v39, 1 }
 0x30e   :  { %v4063_v44 = vmul.f32 0.125, %v685_v40  ;;  %v4065_v45 = vmul.f32 0.125, %v697_v41  ;;  %v691_v46 = vadd.f32 %v690_v42, %v689_v38  ;;  %v703_v47 = vadd.f32 %v702_v43, %v701_v39 }
 0x310   :  { %v708_v48 = vsub.f32 %v4047_v14, %v4063_v44  ;;  %v710_v50 = vsub.f32 %v4049_v15, %v4065_v45  ;;  %v4071_v53 = vmul.f32 0.125, %v691_v46  ;;  %v707_v54 = vmul.f32 0.125, %v703_v47 }
 0x312   :  { %v712_v56 = vmul.f32 %v708_v48, %v708_v48  ;;  %v714_v58 = vmul.f32 %v710_v50, %v710_v50  ;;  %v709_v59 = vsub.f32 %v4053_v21, %v4071_v53  ;;  %v711_v60 = vsub.f32 %v4055_v6, %v707_v54  ;;  %v678_v50 = vld [vmem:[#allocation13 + $0x18] sm:$0xf] }
 0x314   :  { %v716_v61 = vrot.slane %v712_v56, 4  ;;  %v728_v62 = vrot.slane %v714_v58, 4  ;;  %v713_v1 = vmul.f32 %v709_v59, %v709_v59  ;;  %v715_v3 = vmul.f32 %v711_v60, %v711_v60 }
 0x316   :  { %v717_v4 = vadd.f32 %v716_v61, %v712_v56  ;;  %v729_v5 = vadd.f32 %v728_v62, %v714_v58  ;;  %v722_v7 = vrot.slane %v713_v1, 4  ;;  %v734_v8 = vrot.slane %v715_v3, 4 }
 0x318   :  { %v718_v10 = vrot.slane %v717_v4, 2  ;;  %v730_v11 = vrot.slane %v729_v5, 2  ;;  %v723_v12 = vadd.f32 %v722_v7, %v713_v1  ;;  %v735_v13 = vadd.f32 %v734_v8, %v715_v3 }
 0x31a   :  { %v719_v16 = vadd.f32 %v718_v10, %v717_v4  ;;  %v731_v17 = vadd.f32 %v730_v11, %v729_v5  ;;  %v724_v18 = vrot.slane %v723_v12, 2  ;;  %v736_v9 = vrot.slane %v735_v13, 2 }
 0x31c   :  { %v720_v19 = vrot.slane %v719_v16, 1  ;;  %v732_v20 = vrot.slane %v731_v17, 1  ;;  %v725_v22 = vadd.f32 %v724_v18, %v723_v12  ;;  %v737_v23 = vadd.f32 %v736_v9, %v735_v13  ;;  %v679_v13 = vld [vmem:[#allocation13 + $0x26] sm:$0xf] }
 0x31e   :  { %v721_v24 = vadd.f32 %v720_v19, %v719_v16  ;;  %v733_v25 = vadd.f32 %v732_v20, %v731_v17  ;;  %v726_v26 = vrot.slane %v725_v22, 1  ;;  %v738_v27 = vrot.slane %v737_v23, 1 }
 0x320   :  { %v740_v28 = vmul.f32 0.125, %v721_v24  ;;  %v742_v29 = vmul.f32 0.125, %v733_v25  ;;  %v727_v30 = vadd.f32 %v726_v26, %v725_v22  ;;  %v739_v31 = vadd.f32 %v738_v27, %v737_v23  ;;  %v898_v26 = vld [vmem:[#allocation10 + $0xd0] sm:$0xff] }
 0x322   :  { %v744_v32 = vadd.f32 0.8, %v740_v28  ;;  %v746_v33 = vadd.f32 0.8, %v742_v29  ;;  %v741_v34 = vmul.f32 0.125, %v727_v30  ;;  %v743_v35 = vmul.f32 0.125, %v739_v31 }
 0x323   :  { %v1058_v29 = vunpack.c.h.s8.bf16 %v898_v26 }
 0x324   :  { %3707 = vrsqrt.f32 %v744_v32  ;;  %v745_v36 = vadd.f32 0.8, %v741_v34  ;;  %v747_v37 = vadd.f32 0.8, %v743_v35  ;;  %v1051_v34 = vunpack.c.l.s8.bf16 %v4027_v51  ;;  %v954_v51 = vld [vmem:[#allocation10 + $0x290] sm:$0xff] }
 0x325   :  { %3709 = vrsqrt.f32 %v746_v33  ;;  %v1179_v35 = vunpack.c.l.s8.bf16 %v4029_v52 }
 0x326   :  { %3711 = vrsqrt.f32 %v745_v36  ;;  %v891_v36 = vld [vmem:[#allocation10 + $0x98] sm:$0xff] }
 0x327   :  { %3713 = vrsqrt.f32 %v747_v37  ;;  %v955_v37 = vld [vmem:[#allocation10 + $0x298] sm:$0xff] }
 0x331   :  { %v3708_v38 = vpop.eup %3707 }
 0x332   :  { %v3710_v39 = vpop.eup %3709 }
 0x333   :  { %v3712_v40 = vpop.eup %3711 }
 0x334   :  { %v3714_v41 = vpop.eup %3713  ;;  %v756_v42 = vcombine.low %v3708_v38, %v3712_v40  ;;  %v1050_v38 = vunpack.c.l.s8.bf16 %v898_v26  ;;  %v1043_v40 = vunpack.c.h.s8.bf16 %v891_v36 }
 0x335   :  { %v757_v43 = vcombine.low %v3710_v39, %v3714_v41  ;;  %v1171_v41 = vunpack.c.h.s8.bf16 %v955_v37 }
 0x336   :  { %v764_v46 = vrot.slane %v756_v42, %v4016_v49  ;;  %v890_v42 = vld [vmem:[#allocation10 + $0x90] sm:$0xff] }
 0x337   :  { %v771_v47 = vrot.slane %v757_v43, %v4016_v49  ;;  %v1042_v52 = vunpack.c.h.s8.bf16 %v890_v42  ;;  %v1170_v43 = vunpack.c.h.s8.bf16 %v954_v51 }
 0x339   :  { %v772_v48 = vcombine.low %v764_v46, %v771_v47  ;;  %v1035_v46 = vunpack.c.l.s8.bf16 %v891_v36  ;;  %v1163_v47 = vunpack.c.l.s8.bf16 %v955_v37  ;;  %v922_v36 = vld [vmem:[#allocation10 + $0x190] sm:$0xff] }
 0x33a   :  { %v986_v37 = vld [vmem:[#allocation10 + $0x390] sm:$0xff] }
 0x33b   :  { %v779_v56 = vrot.slane %v772_v48, %v4016_v49  ;;  %v883_v48 = vld [vmem:[#allocation10 + $0x58] sm:$0xff] }
 0x33d   :  { %v781_v58 = vmul.f32 %v779_v56, %v678_v50  ;;  %v947_v50 = vld [vmem:[#allocation10 + $0x258] sm:$0xff]  ;;  %v1034_v56 = vunpack.c.l.s8.bf16 %v890_v42 }
 0x33e   :  { %v915_v42 = vld [vmem:[#allocation10 + $0x158] sm:$0xff] }
 0x33f   :  { %v794_v59 = vrot.slane %v781_v58, %v4034_v55  ;;  %v798_v60 = vrot.slane %v781_v58, %v4037_v57  ;;  %v786_v61 = vrot.slane %v781_v58, %v4003_v0  ;;  %v790_v62 = vrot.slane %v781_v58, %v4006_v2 }
 0x340   :  { %v1162_v58 = vunpack.c.l.s8.bf16 %v954_v51  ;;  %v979_v51 = vld [vmem:[#allocation10 + $0x358] sm:$0xff] }
 0x341   :  { %v805_v1 = vmul.f32 %v794_v59, %v4065_v45  ;;  %v806_v3 = vmul.f32 %v798_v60, %v707_v54  ;;  %v803_v4 = vmul.f32 %v786_v61, %v4063_v44  ;;  %v804_v5 = vmul.f32 %v790_v62, %v4071_v53 }
 0x342   :  { %v838_v18 = vmul.f32 %v790_v62, %v4053_v21  ;;  %v840_v45 = vmul.f32 %v798_v60, %v4055_v6  ;;  %v837_v54 = vmul.f32 %v786_v61, %v4047_v14  ;;  %v839_v44 = vmul.f32 %v794_v59, %v4049_v15  ;;  %v962_v21 = vld [vmem:[#allocation10 + $0x2d0] sm:$0xff] }
 0x343   :  { %v812_v7 = vcombine.low %v805_v1, %v806_v3  ;;  %v811_v8 = vcombine.low %v803_v4, %v804_v5  ;;  %v1186_v15 = vunpack.c.h.s8.bf16 %v962_v21  ;;  %v1178_v39 = vunpack.c.l.s8.bf16 %v962_v21  ;;  %v882_v61 = vld [vmem:[#allocation10 + $0x50] sm:$0xff] }
 0x344   :  { %v1027_v59 = vunpack.c.h.s8.bf16 %v883_v48  ;;  %v1155_v60 = vunpack.c.h.s8.bf16 %v947_v50  ;;  %v946_v62 = vld [vmem:[#allocation10 + $0x250] sm:$0xff]  ;;  %v1026_v1 = vunpack.c.h.s8.bf16 %v882_v61  ;;  %v1019_v4 = vunpack.c.l.s8.bf16 %v883_v48 }
 0x345   :  { %v826_v10 = vrot.slane %v812_v7, %v4016_v49  ;;  %v819_v11 = vrot.slane %v811_v8, %v4016_v49  ;;  %v1154_v3 = vunpack.c.h.s8.bf16 %v946_v62  ;;  %v1147_v5 = vunpack.c.l.s8.bf16 %v947_v50  ;;  %v875_v7 = vld [vmem:[#allocation10 + $0x18] sm:$0xff]  ;;  %v914_v48 = vld [vmem:[#allocation10 + $0x150] sm:$0xff] }
 0x346   :  { %v939_v8 = vld [vmem:[#allocation10 + $0x218] sm:$0xff]  ;;  %v978_v50 = vld [vmem:[#allocation10 + $0x350] sm:$0xff] }
 0x347   :  { %v827_v12 = vcombine.low %v819_v11, %v826_v10  ;;  %v1018_v10 = vunpack.c.l.s8.bf16 %v882_v61  ;;  %v1146_v11 = vunpack.c.l.s8.bf16 %v946_v62  ;;  %v907_v61 = vld [vmem:[#allocation10 + $0x118] sm:$0xff] }
 0x348   :  { %v971_v62 = vld [vmem:[#allocation10 + $0x318] sm:$0xff] }
 0x349   :  { %v834_v16 = vrot.slane %v827_v12, %v4016_v49  ;;  %v1011_v12 = vunpack.c.h.s8.bf16 %v875_v7 }
 0x34b   :  { %v836_v17 = vsub.f32 %v679_v13, %v834_v16  ;;  %v1139_v13 = vunpack.c.h.s8.bf16 %v939_v8  ;;  %v874_v16 = vld [vmem:[#allocation10 + $0x10] sm:$0xff] }
 0x34d   :  { %v849_v53 = vrot.slane %v836_v17, %v4006_v2  ;;  %v857_v9 = vrot.slane %v836_v17, %v4037_v57  ;;  %v845_v19 = vrot.slane %v836_v17, %v4003_v0  ;;  %v853_v20 = vrot.slane %v836_v17, %v4034_v55  ;;  %v938_v17 = vld [vmem:[#allocation10 + $0x210] sm:$0xff] }
 0x34f   :  { %v863_v22 = vadd.f32 %v849_v53, %v838_v18  ;;  %v865_v23 = vadd.f32 %v857_v9, %v840_v45  ;;  %v862_v24 = vadd.f32 %v845_v19, %v837_v54  ;;  %v864_v25 = vadd.f32 %v853_v20, %v839_v44  ;;  %v931_v53 = vld [vmem:[#allocation10 + $0x1d8] sm:$0xff] }
 0x350   :  { %v1010_v18 = vunpack.c.h.s8.bf16 %v874_v16  ;;  %v1138_v45 = vunpack.c.h.s8.bf16 %v938_v17  ;;  %v1003_v54 = vunpack.c.l.s8.bf16 %v875_v7  ;;  %v1131_v44 = vunpack.c.l.s8.bf16 %v939_v8  ;;  %v995_v9 = vld [vmem:[#allocation10 + $0x3d8] sm:$0xff]  ;;  %v906_v7 = vld [vmem:[#allocation10 + $0x110] sm:$0xff] }
 0x351   :  { %v867_v27 = vmax.f32 %v863_v22, 0.0  ;;  %v869_v6 = vmax.f32 %v865_v23, 0.0  ;;  %v866_v28 = vmax.f32 %v862_v24, 0.0  ;;  %v868_v14 = vmax.f32 %v864_v25, 0.0  ;;  %v930_v24 = vld [vmem:[#allocation10 + $0x1d0] sm:$0xff] }
 0x352   :  { %v1002_v19 = vunpack.c.l.s8.bf16 %v874_v16  ;;  %v1130_v20 = vunpack.c.l.s8.bf16 %v938_v17  ;;  %v1123_v22 = vunpack.c.h.s8.bf16 %v931_v53  ;;  %v1251_v23 = vunpack.c.h.s8.bf16 %v995_v9  ;;  %v994_v25 = vld [vmem:[#allocation10 + $0x3d0] sm:$0xff]  ;;  %v901_v16 = vld [vmem:[#allocation10 + $0xe8] sm:$0xff] }
 0x353   :  { %v4097_v30 = vpack.c.bf16 %v867_v27, %v867_v27  ;;  %v4099_v31 = vpack.c.bf16 %v869_v6, %v869_v6  ;;  %v4101_v32 = vpack.c.bf16 %v866_v28, %v866_v28  ;;  %v4103_v33 = vpack.c.bf16 %v868_v14, %v868_v14  ;;  %v923_v28 = vld [vmem:[#allocation10 + $0x198] sm:$0xff]  ;;  %v970_v8 = vld [vmem:[#allocation10 + $0x310] sm:$0xff]  ;;  %v965_v17 = vld [vmem:[#allocation10 + $0x2e8] sm:$0xff] }
 0x354   :  { %v1122_v26 = vunpack.c.h.s8.bf16 %v930_v24  ;;  %v1250_v21 = vunpack.c.h.s8.bf16 %v994_v25  ;;  %v1115_v27 = vunpack.c.l.s8.bf16 %v931_v53  ;;  %v1243_v6 = vunpack.c.l.s8.bf16 %v995_v9  ;;  %v987_v14 = vld [vmem:[#allocation10 + $0x398] sm:$0xff]  ;;  %v900_v53 = vld [vmem:[#allocation10 + $0xe0] sm:$0xff] }
 0x355   :  { %1292 = vmatprep.mubr.bf16.mxu0 %v4097_v30  ;;  %1333 = vmatprep.mubr.bf16.mxu1 %v4099_v31  ;;  %v964_v9 = vld [vmem:[#allocation10 + $0x2e0] sm:$0xff] }
 0x356   :  { %1293 = vmatmul.mubr.bf16.vlgmr.msra.gmra.mxu0 %v4101_v32  ;;  %1334 = vmatmul.mubr.bf16.vlgmr.msra.gmra.mxu1 %v4103_v33 }
 0x357   :  { %1343 = vmatpush1.bf16.msra.mxu0 %v1058_v29  ;;  %1384 = vmatpush1.bf16.msra.mxu1 %v1186_v15  ;;  %v1114_v29 = vunpack.c.l.s8.bf16 %v930_v24  ;;  %v1242_v15 = vunpack.c.l.s8.bf16 %v994_v25  ;;  %v893_v24 = vld [vmem:[#allocation10 + $0xa8] sm:$0xff] }
 0x358   :  { %1374 = vmatprep.mubr.bf16.mxu0 %v4097_v30  ;;  %1415 = vmatprep.mubr.bf16.mxu1 %v4099_v31  ;;  %v957_v25 = vld [vmem:[#allocation10 + $0x2a8] sm:$0xff] }
 0x359   :  { %1344 = vmatprep.subr.bf16.mxu0 %v1051_v34  ;;  %1385 = vmatprep.subr.bf16.mxu1 %v1179_v35  ;;  %v1107_v34 = vunpack.c.h.s8.bf16 %v923_v28  ;;  %v1235_v35 = vunpack.c.h.s8.bf16 %v987_v14 }
 0x35b   :  { %1345 = vmatpush1.bf16.msra.mxu0 %v1050_v38  ;;  %1386 = vmatpush1.bf16.msra.mxu1 %v1178_v39  ;;  %v1106_v38 = vunpack.c.h.s8.bf16 %v922_v36  ;;  %v1234_v39 = vunpack.c.h.s8.bf16 %v986_v37 }
 0x35c   :  { %1346 = vmatprep.subr.bf16.mxu0 %v1043_v40  ;;  %1387 = vmatprep.subr.bf16.mxu1 %v1171_v41  ;;  %v1099_v40 = vunpack.c.l.s8.bf16 %v923_v28  ;;  %v1227_v41 = vunpack.c.l.s8.bf16 %v987_v14  ;;  %v1173_v28 = vunpack.c.h.s8.bf16 %v957_v25  ;;  %v956_v14 = vld [vmem:[#allocation10 + $0x2a0] sm:$0xff] }
 0x35f   :  { %1347 = vmatpush1.bf16.msra.mxu0 %v1042_v52  ;;  %1388 = vmatpush1.bf16.msra.mxu1 %v1170_v43  ;;  %v1098_v52 = vunpack.c.l.s8.bf16 %v922_v36  ;;  %v1226_v43 = vunpack.c.l.s8.bf16 %v986_v37  ;;  %v885_v36 = vld [vmem:[#allocation10 + $0x68] sm:$0xff] }
 0x360   :  { %1348 = vmatprep.subr.bf16.mxu0 %v1035_v46  ;;  %1389 = vmatprep.subr.bf16.mxu1 %v1163_v47  ;;  %v1091_v46 = vunpack.c.h.s8.bf16 %v915_v42  ;;  %v1219_v47 = vunpack.c.h.s8.bf16 %v979_v51  ;;  %v949_v37 = vld [vmem:[#allocation10 + $0x268] sm:$0xff] }
 0x363   :  { %1349 = vmatpush1.bf16.msra.mxu0 %v1034_v56  ;;  %1390 = vmatpush1.bf16.msra.mxu1 %v1162_v58  ;;  %v1090_v56 = vunpack.c.h.s8.bf16 %v914_v48  ;;  %v1218_v58 = vunpack.c.h.s8.bf16 %v978_v50 }
 0x364   :  { %1350 = vmatprep.subr.bf16.mxu0 %v1027_v59  ;;  %1391 = vmatprep.subr.bf16.mxu1 %v1155_v60  ;;  %v1083_v59 = vunpack.c.l.s8.bf16 %v915_v42  ;;  %v1211_v60 = vunpack.c.l.s8.bf16 %v979_v51  ;;  %v1157_v42 = vunpack.c.h.s8.bf16 %v949_v37  ;;  %v948_v51 = vld [vmem:[#allocation10 + $0x260] sm:$0xff] }
 0x367   :  { %1351 = vmatpush1.bf16.msra.mxu0 %v1026_v1  ;;  %1392 = vmatpush1.bf16.msra.mxu1 %v1154_v3  ;;  %v1082_v1 = vunpack.c.l.s8.bf16 %v914_v48  ;;  %v1210_v3 = vunpack.c.l.s8.bf16 %v978_v50  ;;  %v877_v48 = vld [vmem:[#allocation10 + $0x28] sm:$0xff] }
 0x368   :  { %1352 = vmatprep.subr.bf16.mxu0 %v1019_v4  ;;  %1393 = vmatprep.subr.bf16.mxu1 %v1147_v5  ;;  %v1075_v4 = vunpack.c.h.s8.bf16 %v907_v61  ;;  %v1203_v5 = vunpack.c.h.s8.bf16 %v971_v62  ;;  %v941_v50 = vld [vmem:[#allocation10 + $0x228] sm:$0xff] }
 0x36b   :  { %1353 = vmatpush1.bf16.msra.mxu0 %v1018_v10  ;;  %1394 = vmatpush1.bf16.msra.mxu1 %v1146_v11  ;;  %v1074_v10 = vunpack.c.h.s8.bf16 %v906_v7  ;;  %v1202_v11 = vunpack.c.h.s8.bf16 %v970_v8 }
 0x36c   :  { %1354 = vmatprep.subr.bf16.mxu0 %v1011_v12  ;;  %1395 = vmatprep.subr.bf16.mxu1 %v1139_v13  ;;  %v1067_v12 = vunpack.c.l.s8.bf16 %v907_v61  ;;  %v1195_v13 = vunpack.c.l.s8.bf16 %v971_v62  ;;  %v1141_v61 = vunpack.c.h.s8.bf16 %v941_v50  ;;  %v940_v62 = vld [vmem:[#allocation10 + $0x220] sm:$0xff] }
 0x36f   :  { %1355 = vmatpush1.bf16.msra.mxu0 %v1010_v18  ;;  %1396 = vmatpush1.bf16.msra.mxu1 %v1138_v45  ;;  %v1066_v18 = vunpack.c.l.s8.bf16 %v906_v7  ;;  %v1194_v45 = vunpack.c.l.s8.bf16 %v970_v8  ;;  %v933_v7 = vld [vmem:[#allocation10 + $0x1e8] sm:$0xff] }
 0x370   :  { %1356 = vmatprep.subr.bf16.mxu0 %v1003_v54  ;;  %1397 = vmatprep.subr.bf16.mxu1 %v1131_v44  ;;  %v1061_v54 = vunpack.c.h.s8.bf16 %v901_v16  ;;  %v1189_v44 = vunpack.c.h.s8.bf16 %v965_v17  ;;  %v997_v8 = vld [vmem:[#allocation10 + $0x3e8] sm:$0xff] }
 0x373   :  { %1357 = vmatpush1.bf16.msra.mxu0 %v1002_v19  ;;  %1398 = vmatpush1.bf16.msra.mxu1 %v1130_v20  ;;  %v1060_v19 = vunpack.c.h.s8.bf16 %v900_v53  ;;  %v1188_v20 = vunpack.c.h.s8.bf16 %v964_v9 }
 0x374   :  { %1358 = vmatprep.subr.bf16.mxu0 %v1123_v22  ;;  %1399 = vmatprep.subr.bf16.mxu1 %v1251_v23  ;;  %v1053_v22 = vunpack.c.l.s8.bf16 %v901_v16  ;;  %v1181_v23 = vunpack.c.l.s8.bf16 %v965_v17  ;;  %v1253_v16 = vunpack.c.h.s8.bf16 %v997_v8  ;;  %v996_v17 = vld [vmem:[#allocation10 + $0x3e0] sm:$0xff] }
 0x377   :  { %1359 = vmatpush2.bf16.msra.mxu0 %v1122_v26  ;;  %1400 = vmatpush2.bf16.msra.mxu1 %v1250_v21  ;;  %v1052_v26 = vunpack.c.l.s8.bf16 %v900_v53  ;;  %v1180_v21 = vunpack.c.l.s8.bf16 %v964_v9  ;;  %v925_v53 = vld [vmem:[#allocation10 + $0x1a8] sm:$0xff] }
 0x378   :  { %1360 = vmatprep.subr.bf16.mxu0 %v1115_v27  ;;  %1401 = vmatprep.subr.bf16.mxu1 %v1243_v6  ;;  %v1045_v27 = vunpack.c.h.s8.bf16 %v893_v24  ;;  %v892_v6 = vld [vmem:[#allocation10 + $0xa0] sm:$0xff]  ;;  %v989_v9 = vld [vmem:[#allocation10 + $0x3a8] sm:$0xff] }
 0x37b   :  { %1361 = vmatpush2.bf16.msra.mxu0 %v1114_v29  ;;  %1402 = vmatpush2.bf16.msra.mxu1 %v1242_v15  ;;  %v1044_v29 = vunpack.c.h.s8.bf16 %v892_v6  ;;  %v1172_v15 = vunpack.c.h.s8.bf16 %v956_v14 }
 0x37c   :  { %1362 = vmatprep.subr.bf16.mxu0 %v1107_v34  ;;  %1403 = vmatprep.subr.bf16.mxu1 %v1235_v35  ;;  %v1037_v34 = vunpack.c.l.s8.bf16 %v893_v24  ;;  %v1165_v35 = vunpack.c.l.s8.bf16 %v957_v25  ;;  %v1237_v24 = vunpack.c.h.s8.bf16 %v989_v9  ;;  %v988_v25 = vld [vmem:[#allocation10 + $0x3a0] sm:$0xff] }
 0x37f   :  { %1363 = vmatpush2.bf16.msra.mxu0 %v1106_v38  ;;  %1404 = vmatpush2.bf16.msra.mxu1 %v1234_v39  ;;  %v1036_v38 = vunpack.c.l.s8.bf16 %v892_v6  ;;  %v1164_v39 = vunpack.c.l.s8.bf16 %v956_v14  ;;  %v1229_v6 = vunpack.c.l.s8.bf16 %v989_v9  ;;  %v981_v14 = vld [vmem:[#allocation10 + $0x368] sm:$0xff]  ;;  %v958_v9 = vld [vmem:[#allocation10 + $0x2b0] sm:$0xff] }
 0x380   :  { %1364 = vmatprep.subr.bf16.mxu0 %v1099_v40  ;;  %1405 = vmatprep.subr.bf16.mxu1 %v1227_v41  ;;  %v1029_v40 = vunpack.c.h.s8.bf16 %v885_v36  ;;  %v884_v41 = vld [vmem:[#allocation10 + $0x60] sm:$0xff] }
 0x383   :  { %1365 = vmatpush2.bf16.msra.mxu0 %v1098_v52  ;;  %1406 = vmatpush2.bf16.msra.mxu1 %v1226_v43  ;;  %v1028_v52 = vunpack.c.h.s8.bf16 %v884_v41  ;;  %v1156_v43 = vunpack.c.h.s8.bf16 %v948_v51 }
 0x384   :  { %1366 = vmatprep.subr.bf16.mxu0 %v1091_v46  ;;  %1407 = vmatprep.subr.bf16.mxu1 %v1219_v47  ;;  %v1021_v46 = vunpack.c.l.s8.bf16 %v885_v36  ;;  %v1149_v47 = vunpack.c.l.s8.bf16 %v949_v37  ;;  %v1221_v36 = vunpack.c.h.s8.bf16 %v981_v14  ;;  %v980_v37 = vld [vmem:[#allocation10 + $0x360] sm:$0xff] }
 0x387   :  { %1367 = vmatpush2.bf16.msra.mxu0 %v1090_v56  ;;  %1408 = vmatpush2.bf16.msra.mxu1 %v1218_v58  ;;  %v1020_v56 = vunpack.c.l.s8.bf16 %v884_v41  ;;  %v1148_v58 = vunpack.c.l.s8.bf16 %v948_v51  ;;  %v1213_v41 = vunpack.c.l.s8.bf16 %v981_v14  ;;  %v973_v51 = vld [vmem:[#allocation10 + $0x328] sm:$0xff] }
 0x388   :  { %1368 = vmatprep.subr.bf16.mxu0 %v1083_v59  ;;  %1409 = vmatprep.subr.bf16.mxu1 %v1211_v60  ;;  %v1013_v59 = vunpack.c.h.s8.bf16 %v877_v48  ;;  %v876_v60 = vld [vmem:[#allocation10 + $0x20] sm:$0xff] }
 0x38b   :  { %1369 = vmatpush2.bf16.msra.mxu0 %v1082_v1  ;;  %1410 = vmatpush2.bf16.msra.mxu1 %v1210_v3  ;;  %v1012_v1 = vunpack.c.h.s8.bf16 %v876_v60  ;;  %v1140_v3 = vunpack.c.h.s8.bf16 %v940_v62 }
 0x38c   :  { %1370 = vmatprep.subr.bf16.mxu0 %v1075_v4  ;;  %1411 = vmatprep.subr.bf16.mxu1 %v1203_v5  ;;  %v1005_v4 = vunpack.c.l.s8.bf16 %v877_v48  ;;  %v1133_v5 = vunpack.c.l.s8.bf16 %v941_v50  ;;  %v1205_v48 = vunpack.c.h.s8.bf16 %v973_v51  ;;  %v972_v50 = vld [vmem:[#allocation10 + $0x320] sm:$0xff] }
 0x38f   :  { %1371 = vmatpush2.bf16.msra.mxu0 %v1074_v10  ;;  %1412 = vmatpush2.bf16.msra.mxu1 %v1202_v11  ;;  %v1004_v10 = vunpack.c.l.s8.bf16 %v876_v60  ;;  %v1132_v11 = vunpack.c.l.s8.bf16 %v940_v62  ;;  %v1197_v60 = vunpack.c.l.s8.bf16 %v973_v51  ;;  %v967_v62 = vld [vmem:[#allocation10 + $0x2f8] sm:$0xff] }
 0x390   :  { %1372 = vmatprep.subr.bf16.mxu0 %v1067_v12  ;;  %1413 = vmatprep.subr.bf16.mxu1 %v1195_v13  ;;  %v1125_v12 = vunpack.c.h.s8.bf16 %v933_v7  ;;  %v932_v13 = vld [vmem:[#allocation10 + $0x1e0] sm:$0xff] }
 0x393   :  { %1373 = vmatpush2.bf16.msra.mxu0 %v1066_v18  ;;  %1414 = vmatpush2.bf16.msra.mxu1 %v1194_v45  ;;  %v1124_v18 = vunpack.c.h.s8.bf16 %v932_v13  ;;  %v1252_v45 = vunpack.c.h.s8.bf16 %v996_v17 }
 0x394   :  { %1424 = vmatprep.subr.bf16.mxu0 %v1061_v54  ;;  %1465 = vmatprep.subr.bf16.mxu1 %v1189_v44  ;;  %v1117_v54 = vunpack.c.l.s8.bf16 %v933_v7  ;;  %v1245_v44 = vunpack.c.l.s8.bf16 %v997_v8  ;;  %v1191_v7 = vunpack.c.h.s8.bf16 %v967_v62  ;;  %v966_v8 = vld [vmem:[#allocation10 + $0x2f0] sm:$0xff] }
 0x396   :  { %1375 = vmatmul.mubr.bf16.vlgmr.msra.gmra.mxu0 %v4101_v32  ;;  %1416 = vmatmul.mubr.bf16.vlgmr.msra.gmra.mxu1 %v4103_v33 }
 0x397   :  { %1425 = vmatpush1.bf16.msra.mxu0 %v1060_v19  ;;  %1456 = vmatprep.mubr.bf16.mxu0 %v4097_v30  ;;  %v1116_v19 = vunpack.c.l.s8.bf16 %v932_v13  ;;  %v895_v13 = vld [vmem:[#allocation10 + $0xb8] sm:$0xff] }
 0x398   :  { %1466 = vmatpush1.bf16.msra.mxu1 %v1188_v20  ;;  %1497 = vmatprep.mubr.bf16.mxu1 %v4099_v31  ;;  %v1244_v20 = vunpack.c.l.s8.bf16 %v996_v17  ;;  %v959_v17 = vld [vmem:[#allocation10 + $0x2b8] sm:$0xff] }
 0x399   :  { %1426 = vmatprep.subr.bf16.mxu0 %v1053_v22  ;;  %1467 = vmatprep.subr.bf16.mxu1 %v1181_v23  ;;  %v1109_v22 = vunpack.c.h.s8.bf16 %v925_v53  ;;  %v924_v23 = vld [vmem:[#allocation10 + $0x1a0] sm:$0xff] }
 0x39b   :  { %1427 = vmatpush1.bf16.msra.mxu0 %v1052_v26  ;;  %v1108_v26 = vunpack.c.h.s8.bf16 %v924_v23 }
 0x39c   :  { %1468 = vmatpush1.bf16.msra.mxu1 %v1180_v21  ;;  %1428 = vmatprep.subr.bf16.mxu0 %v1045_v27  ;;  %v1236_v21 = vunpack.c.h.s8.bf16 %v988_v25  ;;  %v1101_v27 = vunpack.c.l.s8.bf16 %v925_v53  ;;  %v1175_v53 = vunpack.c.h.s8.bf16 %v959_v17 }
 0x39d   :  { %1469 = vmatprep.subr.bf16.mxu1 %v1173_v28  ;;  %v917_v28 = vld [vmem:[#allocation10 + $0x168] sm:$0xff] }
 0x39f   :  { %1429 = vmatpush1.bf16.msra.mxu0 %v1044_v29  ;;  %v1100_v29 = vunpack.c.l.s8.bf16 %v924_v23  ;;  %v1167_v23 = vunpack.c.l.s8.bf16 %v959_v17 }
 0x3a0   :  { %1470 = vmatpush1.bf16.msra.mxu1 %v1172_v15  ;;  %1430 = vmatprep.subr.bf16.mxu0 %v1037_v34  ;;  %v1228_v15 = vunpack.c.l.s8.bf16 %v988_v25  ;;  %v1093_v34 = vunpack.c.h.s8.bf16 %v917_v28 }
 0x3a1   :  { %1471 = vmatprep.subr.bf16.mxu1 %v1165_v35  ;;  %v916_v35 = vld [vmem:[#allocation10 + $0x160] sm:$0xff] }
 0x3a3   :  { %1431 = vmatpush1.bf16.msra.mxu0 %v1036_v38  ;;  %v1092_v38 = vunpack.c.h.s8.bf16 %v916_v35 }
 0x3a4   :  { %1472 = vmatpush1.bf16.msra.mxu1 %v1164_v39  ;;  %1432 = vmatprep.subr.bf16.mxu0 %v1029_v40  ;;  %v1220_v39 = vunpack.c.h.s8.bf16 %v980_v37  ;;  %v1085_v40 = vunpack.c.l.s8.bf16 %v917_v28 }
 0x3a5   :  { %1473 = vmatprep.subr.bf16.mxu1 %v1157_v42  ;;  %v909_v42 = vld [vmem:[#allocation10 + $0x128] sm:$0xff] }
 0x3a7   :  { %1433 = vmatpush1.bf16.msra.mxu0 %v1028_v52  ;;  %v1084_v52 = vunpack.c.l.s8.bf16 %v916_v35  ;;  %v943_v35 = vld [vmem:[#allocation10 + $0x238] sm:$0xff] }
 0x3a8   :  { %1474 = vmatpush1.bf16.msra.mxu1 %v1156_v43  ;;  %1434 = vmatprep.subr.bf16.mxu0 %v1021_v46  ;;  %v1212_v43 = vunpack.c.l.s8.bf16 %v980_v37  ;;  %v1077_v46 = vunpack.c.h.s8.bf16 %v909_v42 }
 0x3a9   :  { %1475 = vmatprep.subr.bf16.mxu1 %v1149_v47  ;;  %v908_v47 = vld [vmem:[#allocation10 + $0x120] sm:$0xff] }
 0x3ab   :  { %1435 = vmatpush1.bf16.msra.mxu0 %v1020_v56  ;;  %v1076_v56 = vunpack.c.h.s8.bf16 %v908_v47 }
 0x3ac   :  { %1476 = vmatpush1.bf16.msra.mxu1 %v1148_v58  ;;  %1436 = vmatprep.subr.bf16.mxu0 %v1013_v59  ;;  %v1204_v58 = vunpack.c.h.s8.bf16 %v972_v50  ;;  %v1069_v59 = vunpack.c.l.s8.bf16 %v909_v42 }
 0x3ad   :  { %1477 = vmatprep.subr.bf16.mxu1 %v1141_v61  ;;  %v903_v61 = vld [vmem:[#allocation10 + $0xf8] sm:$0xff] }
 0x3af   :  { %1437 = vmatpush1.bf16.msra.mxu0 %v1012_v1  ;;  %v1068_v1 = vunpack.c.l.s8.bf16 %v908_v47  ;;  %v999_v47 = vld [vmem:[#allocation10 + $0x3f8] sm:$0xff] }
 0x3b0   :  { %1478 = vmatpush1.bf16.msra.mxu1 %v1140_v3  ;;  %1438 = vmatprep.subr.bf16.mxu0 %v1005_v4  ;;  %v1196_v3 = vunpack.c.l.s8.bf16 %v972_v50  ;;  %v1063_v4 = vunpack.c.h.s8.bf16 %v903_v61 }
 0x3b1   :  { %1479 = vmatprep.subr.bf16.mxu1 %v1133_v5  ;;  %v902_v5 = vld [vmem:[#allocation10 + $0xf0] sm:$0xff] }
 0x3b3   :  { %1439 = vmatpush1.bf16.msra.mxu0 %v1004_v10  ;;  %v1062_v10 = vunpack.c.h.s8.bf16 %v902_v5 }
 0x3b4   :  { %1480 = vmatpush1.bf16.msra.mxu1 %v1132_v11  ;;  %1440 = vmatprep.subr.bf16.mxu0 %v1125_v12  ;;  %v1190_v11 = vunpack.c.h.s8.bf16 %v966_v8  ;;  %v1055_v12 = vunpack.c.l.s8.bf16 %v903_v61 }
 0x3b5   :  { %1481 = vmatprep.subr.bf16.mxu1 %v1253_v16  ;;  %v1183_v16 = vunpack.c.l.s8.bf16 %v967_v62 }
 0x3b7   :  { %1441 = vmatpush2.bf16.msra.mxu0 %v1124_v18  ;;  %v1054_v18 = vunpack.c.l.s8.bf16 %v902_v5  ;;  %v991_v5 = vld [vmem:[#allocation10 + $0x3b8] sm:$0xff] }
 0x3b8   :  { %1482 = vmatpush2.bf16.msra.mxu1 %v1252_v45  ;;  %1442 = vmatprep.subr.bf16.mxu0 %v1117_v54  ;;  %v1182_v45 = vunpack.c.l.s8.bf16 %v966_v8  ;;  %v1047_v54 = vunpack.c.h.s8.bf16 %v895_v13 }
 0x3b9   :  { %1483 = vmatprep.subr.bf16.mxu1 %v1245_v44  ;;  %v894_v44 = vld [vmem:[#allocation10 + $0xb0] sm:$0xff] }
 0x3ba   :  { %v1038_v25 = vunpack.c.l.s8.bf16 %v894_v44 }
 0x3bb   :  { %1443 = vmatpush2.bf16.msra.mxu0 %v1116_v19  ;;  %v1046_v19 = vunpack.c.h.s8.bf16 %v894_v44  ;;  %v983_v44 = vld [vmem:[#allocation10 + $0x378] sm:$0xff] }
 0x3bc   :  { %1484 = vmatpush2.bf16.msra.mxu1 %v1244_v20  ;;  %1444 = vmatprep.subr.bf16.mxu0 %v1109_v22  ;;  %v1174_v20 = vunpack.c.h.s8.bf16 %v958_v9  ;;  %v1039_v22 = vunpack.c.l.s8.bf16 %v895_v13  ;;  %v990_v13 = vld [vmem:[#allocation10 + $0x3b0] sm:$0xff] }
 0x3bd   :  { %1485 = vmatprep.subr.bf16.mxu1 %v1237_v24  ;;  %v887_v24 = vld [vmem:[#allocation10 + $0x78] sm:$0xff]  ;;  %v1238_v17 = vunpack.c.h.s8.bf16 %v990_v13 }
 0x3bf   :  { %1445 = vmatpush2.bf16.msra.mxu0 %v1108_v26  ;;  %v1166_v26 = vunpack.c.l.s8.bf16 %v958_v9  ;;  %v1230_v9 = vunpack.c.l.s8.bf16 %v990_v13 }
 0x3c0   :  { %1486 = vmatpush2.bf16.msra.mxu1 %v1236_v21  ;;  %1446 = vmatprep.subr.bf16.mxu0 %v1101_v27  ;;  %v886_v21 = vld [vmem:[#allocation10 + $0x70] sm:$0xff] }
 0x3c1   :  { %1487 = vmatprep.subr.bf16.mxu1 %v1229_v6  ;;  %v950_v6 = vld [vmem:[#allocation10 + $0x270] sm:$0xff]  ;;  %v1030_v28 = vunpack.c.h.s8.bf16 %v886_v21 }
 0x3c2   :  { %v1158_v14 = vunpack.c.h.s8.bf16 %v950_v6  ;;  %v1150_v37 = vunpack.c.l.s8.bf16 %v950_v6 }
 0x3c3   :  { %1447 = vmatpush2.bf16.msra.mxu0 %v1100_v29  ;;  %v1023_v29 = vunpack.c.l.s8.bf16 %v887_v24 }
 0x3c4   :  { %1488 = vmatpush2.bf16.msra.mxu1 %v1228_v15  ;;  %1448 = vmatprep.subr.bf16.mxu0 %v1093_v34  ;;  %v879_v34 = vld [vmem:[#allocation10 + $0x38] sm:$0xff] }
 0x3c5   :  { %1489 = vmatprep.subr.bf16.mxu1 %v1221_v36  ;;  %v1022_v36 = vunpack.c.l.s8.bf16 %v886_v21  ;;  %v975_v21 = vld [vmem:[#allocation10 + $0x338] sm:$0xff] }
 0x3c7   :  { %1449 = vmatpush2.bf16.msra.mxu0 %v1092_v38  ;;  %v1015_v38 = vunpack.c.h.s8.bf16 %v879_v34 }
 0x3c8   :  { %1490 = vmatpush2.bf16.msra.mxu1 %v1220_v39  ;;  %1450 = vmatprep.subr.bf16.mxu0 %v1085_v40  ;;  %v878_v39 = vld [vmem:[#allocation10 + $0x30] sm:$0xff]  ;;  %v1143_v40 = vunpack.c.h.s8.bf16 %v943_v35 }
 0x3c9   :  { %1491 = vmatprep.subr.bf16.mxu1 %v1213_v41  ;;  %v942_v41 = vld [vmem:[#allocation10 + $0x230] sm:$0xff]  ;;  %v1014_v42 = vunpack.c.h.s8.bf16 %v878_v39 }
 0x3ca   :  { %v1142_v51 = vunpack.c.h.s8.bf16 %v942_v41  ;;  %v1134_v50 = vunpack.c.l.s8.bf16 %v942_v41 }
 0x3cb   :  { %1451 = vmatpush2.bf16.msra.mxu0 %v1084_v52  ;;  %v1007_v52 = vunpack.c.l.s8.bf16 %v879_v34 }
 0x3cc   :  { %1492 = vmatpush2.bf16.msra.mxu1 %v1212_v43  ;;  %1452 = vmatprep.subr.bf16.mxu0 %v1077_v46  ;;  %v1135_v43 = vunpack.c.l.s8.bf16 %v943_v35  ;;  %v935_v46 = vld [vmem:[#allocation10 + $0x1f8] sm:$0xff] }
 0x3cd   :  { %1493 = vmatprep.subr.bf16.mxu1 %v1205_v48  ;;  %v1006_v48 = vunpack.c.l.s8.bf16 %v878_v39 }
 0x3cf   :  { %1453 = vmatpush2.bf16.msra.mxu0 %v1076_v56  ;;  %v1127_v56 = vunpack.c.h.s8.bf16 %v935_v46 }
 0x3d0   :  { %1494 = vmatpush2.bf16.msra.mxu1 %v1204_v58  ;;  %1454 = vmatprep.subr.bf16.mxu0 %v1069_v59  ;;  %v934_v58 = vld [vmem:[#allocation10 + $0x1f0] sm:$0xff]  ;;  %v1255_v59 = vunpack.c.h.s8.bf16 %v999_v47 }
 0x3d1   :  { %1495 = vmatprep.subr.bf16.mxu1 %v1197_v60  ;;  %v998_v60 = vld [vmem:[#allocation10 + $0x3f0] sm:$0xff]  ;;  %v1126_v61 = vunpack.c.h.s8.bf16 %v934_v58 }
 0x3d2   :  { %v1254_v62 = vunpack.c.h.s8.bf16 %v998_v60  ;;  %v1246_v8 = vunpack.c.l.s8.bf16 %v998_v60 }
 0x3d3   :  { %1455 = vmatpush2.bf16.msra.mxu0 %v1068_v1  ;;  %v1119_v1 = vunpack.c.l.s8.bf16 %v935_v46 }
 0x3d4   :  { %1496 = vmatpush2.bf16.msra.mxu1 %v1196_v3  ;;  %1506 = vmatprep.subr.bf16.mxu0 %v1063_v4  ;;  %v1247_v3 = vunpack.c.l.s8.bf16 %v999_v47  ;;  %v927_v4 = vld [vmem:[#allocation10 + $0x1b8] sm:$0xff] }
 0x3d5   :  { %1547 = vmatprep.subr.bf16.mxu1 %v1191_v7  ;;  %v1118_v7 = vunpack.c.l.s8.bf16 %v934_v58 }
 0x3d6   :  { %1457 = vmatmul.mubr.bf16.vlgmr.msra.gmra.mxu0 %v4101_v32 }
 0x3d7   :  { %1498 = vmatmul.mubr.bf16.vlgmr.msra.gmra.mxu1 %v4103_v33  ;;  %1507 = vmatpush1.bf16.msra.mxu0 %v1062_v10  ;;  %v1111_v10 = vunpack.c.h.s8.bf16 %v927_v4 }
 0x3d8   :  { %1538 = vmatprep.mubr.bf16.mxu0 %v4097_v30  ;;  %1548 = vmatpush1.bf16.msra.mxu1 %v1190_v11  ;;  %v951_v30 = vld [vmem:[#allocation10 + $0x278] sm:$0xff]  ;;  %v926_v11 = vld [vmem:[#allocation10 + $0x1b0] sm:$0xff] }
 0x3d9   :  { %1579 = vmatprep.mubr.bf16.mxu1 %v4099_v31  ;;  %1508 = vmatprep.subr.bf16.mxu0 %v1055_v12  ;;  %v1031_v31 = vunpack.c.h.s8.bf16 %v887_v24  ;;  %v1159_v27 = vunpack.c.h.s8.bf16 %v951_v30  ;;  %v1151_v15 = vunpack.c.l.s8.bf16 %v951_v30  ;;  %v1239_v12 = vunpack.c.h.s8.bf16 %v991_v5 }
 0x3da   :  { %1549 = vmatprep.subr.bf16.mxu1 %v1183_v16  ;;  %v1110_v16 = vunpack.c.h.s8.bf16 %v926_v11 }
 0x3db   :  { %1509 = vmatpush1.bf16.msra.mxu0 %v1054_v18  ;;  %v1103_v18 = vunpack.c.l.s8.bf16 %v927_v4  ;;  %v2088_v4 = vld [vmem:[#allocation11 + $0xb0] sm:$0xff] }
 0x3dc   :  { %1550 = vmatpush1.bf16.msra.mxu1 %v1182_v45  ;;  %1510 = vmatprep.subr.bf16.mxu0 %v1047_v54  ;;  %v1231_v45 = vunpack.c.l.s8.bf16 %v991_v5  ;;  %v919_v54 = vld [vmem:[#allocation10 + $0x178] sm:$0xff]  ;;  %v2144_v5 = vld [vmem:[#allocation11 + $0x270] sm:$0xff] }
 0x3dd   :  { %1551 = vmatprep.subr.bf16.mxu1 %v1175_v53  ;;  %v1102_v53 = vunpack.c.l.s8.bf16 %v926_v11  ;;  %v2143_v11 = vld [vmem:[#allocation11 + $0x268] sm:$0xff] }
 0x3de   :  { %v2451_v13 = vunpack.c.h.s8.bf16 %v2143_v11 }
 0x3df   :  { %1511 = vmatpush1.bf16.msra.mxu0 %v1046_v19  ;;  %v1095_v19 = vunpack.c.h.s8.bf16 %v919_v54 }
 0x3e0   :  { %1552 = vmatpush1.bf16.msra.mxu1 %v1174_v20  ;;  %1512 = vmatprep.subr.bf16.mxu0 %v1039_v22  ;;  %v918_v20 = vld [vmem:[#allocation10 + $0x170] sm:$0xff]  ;;  %v1223_v22 = vunpack.c.h.s8.bf16 %v983_v44 }
 0x3e1   :  { %1553 = vmatprep.subr.bf16.mxu1 %v1167_v23  ;;  %v982_v23 = vld [vmem:[#allocation10 + $0x370] sm:$0xff]  ;;  %v1094_v24 = vunpack.c.h.s8.bf16 %v918_v20 }
 0x3e2   :  { %v1222_v30 = vunpack.c.h.s8.bf16 %v982_v23  ;;  %v1214_v6 = vunpack.c.l.s8.bf16 %v982_v23 }
 0x3e3   :  { %1513 = vmatpush1.bf16.msra.mxu0 %v1038_v25  ;;  %v1087_v25 = vunpack.c.l.s8.bf16 %v919_v54  ;;  %v2081_v54 = vld [vmem:[#allocation11 + $0x78] sm:$0xff] }
 0x3e4   :  { %1554 = vmatpush1.bf16.msra.mxu1 %v1166_v26  ;;  %1514 = vmatprep.subr.bf16.mxu0 %v1031_v31  ;;  %v1215_v26 = vunpack.c.l.s8.bf16 %v983_v44  ;;  %v911_v31 = vld [vmem:[#allocation10 + $0x138] sm:$0xff] }
 0x3e5   :  { %1555 = vmatprep.subr.bf16.mxu1 %v1159_v27  ;;  %v1086_v27 = vunpack.c.l.s8.bf16 %v918_v20  ;;  %v2137_v44 = vld [vmem:[#allocation11 + $0x238] sm:$0xff]  ;;  %v2136_v20 = vld [vmem:[#allocation11 + $0x230] sm:$0xff] }
 0x3e6   :  { %v2437_v23 = vunpack.c.h.s8.bf16 %v2136_v20 }
 0x3e7   :  { %1515 = vmatpush1.bf16.msra.mxu0 %v1030_v28  ;;  %v1079_v28 = vunpack.c.h.s8.bf16 %v911_v31 }
 0x3e8   :  { %1556 = vmatpush1.bf16.msra.mxu1 %v1158_v14  ;;  %1516 = vmatprep.subr.bf16.mxu0 %v1023_v29  ;;  %v910_v14 = vld [vmem:[#allocation10 + $0x130] sm:$0xff]  ;;  %v1207_v29 = vunpack.c.h.s8.bf16 %v975_v21 }
 0x3e9   :  { %1557 = vmatprep.subr.bf16.mxu1 %v1151_v15  ;;  %v974_v15 = vld [vmem:[#allocation10 + $0x330] sm:$0xff]  ;;  %v1078_v34 = vunpack.c.h.s8.bf16 %v910_v14 }
 0x3ea   :  { %v1206_v35 = vunpack.c.h.s8.bf16 %v974_v15  ;;  %v1198_v39 = vunpack.c.l.s8.bf16 %v974_v15 }
 0x3eb   :  { %1517 = vmatpush1.bf16.msra.mxu0 %v1022_v36  ;;  %v1071_v36 = vunpack.c.l.s8.bf16 %v911_v31  ;;  %v2074_v31 = vld [vmem:[#allocation11 + $0x40] sm:$0xff] }
 0x3ec   :  { %1558 = vmatpush1.bf16.msra.mxu1 %v1150_v37  ;;  %1518 = vmatprep.subr.bf16.mxu0 %v1015_v38  ;;  %v1199_v37 = vunpack.c.l.s8.bf16 %v975_v21  ;;  %v1070_v38 = vunpack.c.l.s8.bf16 %v910_v14  ;;  %v2130_v21 = vld [vmem:[#allocation11 + $0x200] sm:$0xff]  ;;  %v2129_v14 = vld [vmem:[#allocation11 + $0x1f8] sm:$0xff] }
 0x3ed   :  { %1559 = vmatprep.subr.bf16.mxu1 %v1143_v40  ;;  %v2423_v15 = vunpack.c.h.s8.bf16 %v2129_v14 }
 0x3ef   :  { %1519 = vmatpush1.bf16.msra.mxu0 %v1014_v42 }
 0x3f0   :  { %1560 = vmatpush1.bf16.msra.mxu1 %v1142_v51  ;;  %1520 = vmatprep.subr.bf16.mxu0 %v1007_v52 }
 0x3f1   :  { %1561 = vmatprep.subr.bf16.mxu1 %v1135_v43 }
 0x3f3   :  { %1521 = vmatpush1.bf16.msra.mxu0 %v1006_v48 }
 0x3f4   :  { %1562 = vmatpush1.bf16.msra.mxu1 %v1134_v50  ;;  %1522 = vmatprep.subr.bf16.mxu0 %v1127_v56 }
 0x3f5   :  { %1563 = vmatprep.subr.bf16.mxu1 %v1255_v59 }
 0x3f7   :  { %1523 = vmatpush2.bf16.msra.mxu0 %v1126_v61 }
 0x3f8   :  { %1564 = vmatpush2.bf16.msra.mxu1 %v1254_v62  ;;  %1524 = vmatprep.subr.bf16.mxu0 %v1119_v1 }
 0x3f9   :  { %1565 = vmatprep.subr.bf16.mxu1 %v1247_v3 }
 0x3fb   :  { %1525 = vmatpush2.bf16.msra.mxu0 %v1118_v7  ;;  %v2340_v7 = vunpack.c.h.s8.bf16 %v2088_v4 }
 0x3fc   :  { %1566 = vmatpush2.bf16.msra.mxu1 %v1246_v8  ;;  %1526 = vmatprep.subr.bf16.mxu0 %v1111_v10  ;;  %v2452_v8 = vunpack.c.h.s8.bf16 %v2144_v5  ;;  %v2087_v10 = vld [vmem:[#allocation11 + $0xa8] sm:$0xff] }
 0x3fd   :  { %1567 = vmatprep.subr.bf16.mxu1 %v1239_v12  ;;  %v2339_v12 = vunpack.c.h.s8.bf16 %v2087_v10 }
 0x3ff   :  { %1527 = vmatpush2.bf16.msra.mxu0 %v1110_v16  ;;  %v2333_v16 = vunpack.c.l.s8.bf16 %v2088_v4 }
 0x400   :  { %1568 = vmatpush2.bf16.msra.mxu1 %v1238_v17  ;;  %1528 = vmatprep.subr.bf16.mxu0 %v1103_v18  ;;  %v2445_v17 = vunpack.c.l.s8.bf16 %v2144_v5  ;;  %v2332_v18 = vunpack.c.l.s8.bf16 %v2087_v10 }
 0x401   :  { %1569 = vmatprep.subr.bf16.mxu1 %v1231_v45  ;;  %v2444_v45 = vunpack.c.l.s8.bf16 %v2143_v11 }
 0x403   :  { %1529 = vmatpush2.bf16.msra.mxu0 %v1102_v53  ;;  %v2326_v53 = vunpack.c.h.s8.bf16 %v2081_v54 }
 0x404   :  { %1570 = vmatpush2.bf16.msra.mxu1 %v1230_v9  ;;  %1530 = vmatprep.subr.bf16.mxu0 %v1095_v19  ;;  %v2438_v9 = vunpack.c.h.s8.bf16 %v2137_v44  ;;  %v2080_v19 = vld [vmem:[#allocation11 + $0x70] sm:$0xff] }
 0x405   :  { %1571 = vmatprep.subr.bf16.mxu1 %v1223_v22  ;;  %v2325_v22 = vunpack.c.h.s8.bf16 %v2080_v19 }
 0x407   :  { %1531 = vmatpush2.bf16.msra.mxu0 %v1094_v24  ;;  %v2319_v24 = vunpack.c.l.s8.bf16 %v2081_v54 }
 0x408   :  { %1572 = vmatpush2.bf16.msra.mxu1 %v1222_v30  ;;  %1532 = vmatprep.subr.bf16.mxu0 %v1087_v25  ;;  %v2431_v30 = vunpack.c.l.s8.bf16 %v2137_v44  ;;  %v2318_v25 = vunpack.c.l.s8.bf16 %v2080_v19  ;;  %v2109_v44 = vld [vmem:[#allocation11 + $0x158] sm:$0xff] }
 0x409   :  { %1573 = vmatprep.subr.bf16.mxu1 %v1215_v26  ;;  %v2430_v26 = vunpack.c.l.s8.bf16 %v2136_v20  ;;  %v2382_v19 = vunpack.c.h.s8.bf16 %v2109_v44 }
 0x40b   :  { %1533 = vmatpush2.bf16.msra.mxu0 %v1086_v27  ;;  %v2312_v27 = vunpack.c.h.s8.bf16 %v2074_v31 }
 0x40c   :  { %1574 = vmatpush2.bf16.msra.mxu1 %v1214_v6  ;;  %1534 = vmatprep.subr.bf16.mxu0 %v1079_v28  ;;  %v2424_v6 = vunpack.c.h.s8.bf16 %v2130_v21  ;;  %v2073_v28 = vld [vmem:[#allocation11 + $0x38] sm:$0xff] }
 0x40d   :  { %1575 = vmatprep.subr.bf16.mxu1 %v1207_v29  ;;  %v2311_v29 = vunpack.c.h.s8.bf16 %v2073_v28 }
 0x40f   :  { %1535 = vmatpush2.bf16.msra.mxu0 %v1078_v34  ;;  %v2305_v34 = vunpack.c.l.s8.bf16 %v2074_v31  ;;  %v2375_v31 = vunpack.c.l.s8.bf16 %v2109_v44 }
 0x410   :  { %1576 = vmatpush2.bf16.msra.mxu1 %v1206_v35  ;;  %1536 = vmatprep.subr.bf16.mxu0 %v1071_v36  ;;  %v2417_v35 = vunpack.c.l.s8.bf16 %v2130_v21  ;;  %v2304_v36 = vunpack.c.l.s8.bf16 %v2073_v28  ;;  %v2102_v28 = vld [vmem:[#allocation11 + $0x120] sm:$0xff] }
 0x411   :  { %1577 = vmatprep.subr.bf16.mxu1 %v1199_v37  ;;  %v2416_v37 = vunpack.c.l.s8.bf16 %v2129_v14  ;;  %v2158_v14 = vld [vmem:[#allocation11 + $0x2e0] sm:$0xff] }
 0x413   :  { %1537 = vmatpush2.bf16.msra.mxu0 %v1070_v38  ;;  %v2067_v38 = vld [vmem:[#allocation11 + $0x8] sm:$0xff] }
 0x414   :  { %1578 = vmatpush2.bf16.msra.mxu1 %v1198_v39  ;;  %2746 = vmatprep.subr.bf16.mxu0 %v2340_v7  ;;  %v2123_v39 = vld [vmem:[#allocation11 + $0x1c8] sm:$0xff] }
 0x415   :  { %2787 = vmatprep.subr.bf16.mxu1 %v2452_v8 }
 0x416   :  { %1539 = vmatmul.mubr.bf16.vlgmr.msra.gmra.mxu0 %v4101_v32  ;;  %v1294_v40 = vpop.f32.mrf.mxu0  ;;  %v1335_v41 = vpop.f32.mrf.mxu1 }
 0x417   :  { %1580 = vmatmul.mubr.bf16.vlgmr.msra.gmra.mxu1 %v4103_v33  ;;  %v4123_v42 = vadd.f32 %v1335_v41, %v1294_v40  ;;  %2747 = vmatpush1.bf16.msra.mxu0 %v2339_v12  ;;  %v2298_v40 = vunpack.c.h.s8.bf16 %v2067_v38  ;;  %v2410_v41 = vunpack.c.h.s8.bf16 %v2123_v39 }
 0x418   :  { %v1296_v51 = vpop.f32.mrf.mxu0  ;;  %v1337_v52 = vpop.f32.mrf.mxu1  ;;  %2788 = vmatpush1.bf16.msra.mxu1 %v2451_v13  ;;  %2748 = vmatprep.subr.bf16.mxu0 %v2333_v16 }
 0x419   :  { %v4125_v43 = vadd.f32 %v1337_v52, %v1296_v51  ;;  %2789 = vmatprep.subr.bf16.mxu1 %v2445_v17  ;;  %v2066_v51 = vld [vmem:[#allocation11] sm:$0xff] }
 0x41a   :  { %v1298_v46 = vpop.f32.mrf.mxu0  ;;  %v1339_v47 = vpop.f32.mrf.mxu1  ;;  %v2122_v52 = vld [vmem:[#allocation11 + $0x1c0] sm:$0xff] }
 0x41b   :  { %2749 = vmatpush1.bf16.msra.mxu0 %v2332_v18  ;;  %v2297_v46 = vunpack.c.h.s8.bf16 %v2066_v51  ;;  %v2409_v47 = vunpack.c.h.s8.bf16 %v2122_v52 }
 0x41c   :  { %v1299_v48 = vpop.f32.mrf.mxu0  ;;  %v1340_v50 = vpop.f32.mrf.mxu1  ;;  %2790 = vmatpush1.bf16.msra.mxu1 %v2444_v45  ;;  %2750 = vmatprep.subr.bf16.mxu0 %v2326_v53  ;;  %v2165_v53 = vld [vmem:[#allocation11 + $0x318] sm:$0xff] }
 0x41d   :  { %2791 = vmatprep.subr.bf16.mxu1 %v2438_v9  ;;  %v2291_v48 = vunpack.c.l.s8.bf16 %v2067_v38  ;;  %v2403_v50 = vunpack.c.l.s8.bf16 %v2123_v39  ;;  %v2494_v20 = vunpack.c.h.s8.bf16 %v2165_v53  ;;  %v2487_v21 = vunpack.c.l.s8.bf16 %v2165_v53 }
 0x41e   :  { %v2361_v38 = vunpack.c.l.s8.bf16 %v2102_v28  ;;  %v2473_v39 = vunpack.c.l.s8.bf16 %v2158_v14 }
 0x41f   :  { %2751 = vmatpush1.bf16.msra.mxu0 %v2325_v22  ;;  %v2108_v22 = vld [vmem:[#allocation11 + $0x150] sm:$0xff] }
 0x420   :  { %2792 = vmatpush1.bf16.msra.mxu1 %v2437_v23  ;;  %2752 = vmatprep.subr.bf16.mxu0 %v2319_v24  ;;  %v2164_v23 = vld [vmem:[#allocation11 + $0x310] sm:$0xff] }
 0x421   :  { %2793 = vmatprep.subr.bf16.mxu1 %v2431_v30  ;;  %v2381_v30 = vunpack.c.h.s8.bf16 %v2108_v22 }
 0x423   :  { %2753 = vmatpush1.bf16.msra.mxu0 %v2318_v25  ;;  %v2493_v25 = vunpack.c.h.s8.bf16 %v2164_v23 }
 0x424   :  { %2794 = vmatpush1.bf16.msra.mxu1 %v2430_v26  ;;  %2754 = vmatprep.subr.bf16.mxu0 %v2312_v27  ;;  %v2374_v27 = vunpack.c.l.s8.bf16 %v2108_v22 }
 0x425   :  { %2795 = vmatprep.subr.bf16.mxu1 %v2424_v6  ;;  %v2486_v6 = vunpack.c.l.s8.bf16 %v2164_v23 }
 0x427   :  { %2755 = vmatpush1.bf16.msra.mxu0 %v2311_v29  ;;  %v2368_v29 = vunpack.c.h.s8.bf16 %v2102_v28 }
 0x428   :  { %2796 = vmatpush1.bf16.msra.mxu1 %v2423_v15  ;;  %2756 = vmatprep.subr.bf16.mxu0 %v2305_v34  ;;  %v2480_v15 = vunpack.c.h.s8.bf16 %v2158_v14  ;;  %v2101_v34 = vld [vmem:[#allocation11 + $0x118] sm:$0xff] }
 0x429   :  { %2797 = vmatprep.subr.bf16.mxu1 %v2417_v35  ;;  %v2157_v35 = vld [vmem:[#allocation11 + $0x2d8] sm:$0xff] }
 0x42b   :  { %2757 = vmatpush1.bf16.msra.mxu0 %v2304_v36  ;;  %v2367_v36 = vunpack.c.h.s8.bf16 %v2101_v34 }
 0x42c   :  { %2798 = vmatpush1.bf16.msra.mxu1 %v2416_v37  ;;  %2758 = vmatprep.subr.bf16.mxu0 %v2298_v40  ;;  %v2479_v37 = vunpack.c.h.s8.bf16 %v2157_v35  ;;  %v2095_v40 = vld [vmem:[#allocation11 + $0xe8] sm:$0xff] }
 0x42d   :  { %2799 = vmatprep.subr.bf16.mxu1 %v2410_v41  ;;  %v2151_v41 = vld [vmem:[#allocation11 + $0x2a8] sm:$0xff] }
 0x42f   :  { %2759 = vmatpush1.bf16.msra.mxu0 %v2297_v46  ;;  %v2354_v46 = vunpack.c.h.s8.bf16 %v2095_v40 }
 0x430   :  { %2800 = vmatpush1.bf16.msra.mxu1 %v2409_v47  ;;  %2760 = vmatprep.subr.bf16.mxu0 %v2291_v48  ;;  %v2466_v47 = vunpack.c.h.s8.bf16 %v2151_v41  ;;  %v2094_v48 = vld [vmem:[#allocation11 + $0xe0] sm:$0xff] }
 0x431   :  { %2801 = vmatprep.subr.bf16.mxu1 %v2403_v50  ;;  %v2150_v50 = vld [vmem:[#allocation11 + $0x2a0] sm:$0xff] }
 0x456   :  { %v1376_v56 = vpop.f32.mrf.mxu0  ;;  %v1417_v58 = vpop.f32.mrf.mxu1 }
 0x457   :  { %v4127_v59 = vadd.f32 %v1417_v58, %v1376_v56  ;;  %v2290_v56 = vunpack.c.l.s8.bf16 %v2066_v51  ;;  %v2402_v58 = vunpack.c.l.s8.bf16 %v2122_v52  ;;  %v2360_v51 = vunpack.c.l.s8.bf16 %v2101_v34 }
 0x458   :  { %v1378_v60 = vpop.f32.mrf.mxu0  ;;  %v1419_v32 = vpop.f32.mrf.mxu1  ;;  %v2472_v52 = vunpack.c.l.s8.bf16 %v2157_v35 }
 0x459   :  { %v4129_v61 = vadd.f32 %v1419_v32, %v1378_v60  ;;  %2761 = vmatpush1.bf16.msra.mxu0 %v2290_v56  ;;  %2802 = vmatpush1.bf16.msra.mxu1 %v2402_v58  ;;  %v2116_v60 = vld [vmem:[#allocation11 + $0x190] sm:$0xff] }
 0x45a   :  { %v1380_v62 = vpop.f32.mrf.mxu0  ;;  %v1421_v33 = vpop.f32.mrf.mxu1  ;;  %v2172_v32 = vld [vmem:[#allocation11 + $0x350] sm:$0xff]  ;;  %v2389_v10 = vunpack.c.l.s8.bf16 %v2116_v60 }
 0x45b   :  { %v2396_v62 = vunpack.c.h.s8.bf16 %v2116_v60  ;;  %v2508_v33 = vunpack.c.h.s8.bf16 %v2172_v32  ;;  %v2501_v11 = vunpack.c.l.s8.bf16 %v2172_v32  ;;  %v4135_v56 = vld [vmem:[#allocation13 + $0x36] sm:$0xff]  ;;  %v4140_v60 = vsub.s32 5, %v4000_v63 }
 0x45c   :  { %v1381_v1 = vpop.f32.mrf.mxu0  ;;  %v1422_v3 = vpop.f32.mrf.mxu1  ;;  %v1604_v58 = vrot.slane %v4135_v56, %v4037_v57  ;;  %v2353_v32 = vunpack.c.h.s8.bf16 %v2094_v48 }
 0x45d   :  { %v2115_v1 = vld [vmem:[#allocation11 + $0x188] sm:$0xff]  ;;  %2762 = vmatprep.subr.bf16.mxu0 %v2396_v62  ;;  %2803 = vmatprep.subr.bf16.mxu1 %v2508_v33  ;;  %v2465_v62 = vunpack.c.h.s8.bf16 %v2150_v50  ;;  %v1596_v33 = vrot.slane %v4135_v56, %v4006_v2 }
 0x45e   :  { %v2171_v3 = vld [vmem:[#allocation11 + $0x348] sm:$0xff]  ;;  %v2395_v4 = vunpack.c.h.s8.bf16 %v2115_v1  ;;  %v2388_v16 = vunpack.c.l.s8.bf16 %v2115_v1  ;;  %v2347_v1 = vunpack.c.l.s8.bf16 %v2095_v40 }
 0x45f   :  { %v2507_v5 = vunpack.c.h.s8.bf16 %v2171_v3  ;;  %v2500_v17 = vunpack.c.l.s8.bf16 %v2171_v3  ;;  %v2459_v3 = vunpack.c.l.s8.bf16 %v2151_v41 }
 0x460   :  { %2763 = vmatpush2.bf16.msra.mxu0 %v2395_v4  ;;  %v4144_v4 = vld [vmem:[#allocation13 + $0x7] sm:$0xff] }
 0x461   :  { %2804 = vmatpush2.bf16.msra.mxu1 %v2507_v5  ;;  %2764 = vmatprep.subr.bf16.mxu0 %v2389_v10  ;;  %v1600_v5 = vrot.slane %v4135_v56, %v4034_v55  ;;  %v1653_v10 = vrot.slane %v4144_v4, %v4037_v57  ;;  %v1649_v53 = vrot.slane %v4144_v4, %v4034_v55 }
 0x462   :  { %2805 = vmatprep.subr.bf16.mxu1 %v2501_v11  ;;  %v1632_v11 = vmul.f32 %v1604_v58, %v4129_v61  ;;  %v1661_v22 = vrot.slane %v4144_v4, %v4140_v60 }
 0x463   :  { %v1631_v44 = vmul.f32 %v1600_v5, %v4127_v59 }
 0x464   :  { %2765 = vmatpush2.bf16.msra.mxu0 %v2388_v16  ;;  %v2346_v16 = vunpack.c.l.s8.bf16 %v2094_v48 }
 0x465   :  { %2806 = vmatpush2.bf16.msra.mxu1 %v2500_v17  ;;  %2766 = vmatprep.subr.bf16.mxu0 %v2382_v19  ;;  %v2458_v17 = vunpack.c.l.s8.bf16 %v2150_v50  ;;  %v1641_v19 = vrot.slane %v4144_v4, %v4003_v0 }
 0x466   :  { %2807 = vmatprep.subr.bf16.mxu1 %v2494_v20  ;;  %v4169_v20 = vadd.f32 %v1653_v10, %v1632_v11 }
 0x468   :  { %2767 = vmatpush2.bf16.msra.mxu0 %v2381_v30  ;;  %v4182_v30 = vadd.f32 %v1649_v53, %v1631_v44 }
 0x469   :  { %2808 = vmatpush2.bf16.msra.mxu1 %v2493_v25  ;;  %2768 = vmatprep.subr.bf16.mxu0 %v2375_v31 }
 0x46a   :  { %2809 = vmatprep.subr.bf16.mxu1 %v2487_v21  ;;  %v1706_v21 = vrot.slane %v4169_v20, 4  ;;  %v1700_v28 = vrot.slane %v4182_v30, 4 }
 0x46c   :  { %2769 = vmatpush2.bf16.msra.mxu0 %v2374_v27  ;;  %v1701_v35 = vadd.f32 %v1700_v28, %v4182_v30 }
 0x46d   :  { %2810 = vmatpush2.bf16.msra.mxu1 %v2486_v6  ;;  %2770 = vmatprep.subr.bf16.mxu0 %v2368_v29  ;;  %v1707_v29 = vadd.f32 %v1706_v21, %v4169_v20  ;;  %v4227_v21 = vsub.s32 7, %v4000_v63 }
 0x46e   :  { %2811 = vmatprep.subr.bf16.mxu1 %v2480_v15  ;;  %v1702_v41 = vrot.slane %v1701_v35, 2 }
 0x470   :  { %2771 = vmatpush2.bf16.msra.mxu0 %v2367_v36  ;;  %v1703_v50 = vadd.f32 %v1702_v41, %v1701_v35 }
 0x471   :  { %2812 = vmatpush2.bf16.msra.mxu1 %v2479_v37  ;;  %2772 = vmatprep.subr.bf16.mxu0 %v2361_v38  ;;  %v1708_v38 = vrot.slane %v1707_v29, 2 }
 0x472   :  { %2813 = vmatprep.subr.bf16.mxu1 %v2473_v39 }
 0x474   :  { %2773 = vmatpush2.bf16.msra.mxu0 %v2360_v51 }
 0x475   :  { %2814 = vmatpush2.bf16.msra.mxu1 %v2472_v52  ;;  %2774 = vmatprep.subr.bf16.mxu0 %v2354_v46  ;;  %v1709_v46 = vadd.f32 %v1708_v38, %v1707_v29 }
 0x476   :  { %2815 = vmatprep.subr.bf16.mxu1 %v2466_v47 }
 0x478   :  { %2775 = vmatpush2.bf16.msra.mxu0 %v2353_v32 }
 0x479   :  { %2816 = vmatpush2.bf16.msra.mxu1 %v2465_v62  ;;  %2776 = vmatprep.subr.bf16.mxu0 %v2347_v1  ;;  %v1710_v62 = vrot.slane %v1709_v46, 1 }
 0x47a   :  { %2817 = vmatprep.subr.bf16.mxu1 %v2459_v3  ;;  %v1704_v3 = vrot.slane %v1703_v50, 1 }
 0x47b   :  { %v1711_v10 = vadd.f32 %v1710_v62, %v1709_v46 }
 0x47c   :  { %2777 = vmatpush2.bf16.msra.mxu0 %v2346_v16  ;;  %v1705_v16 = vadd.f32 %v1704_v3, %v1703_v50 }
 0x47d   :  { %2818 = vmatpush2.bf16.msra.mxu1 %v2458_v17 }
 0x496   :  { %v1458_v7 = vpop.f32.mrf.mxu0 }
 0x497   :  { %v1499_v8 = vpop.f32.mrf.mxu1 }
 0x498   :  { %v4131_v12 = vadd.f32 %v1499_v8, %v1458_v7  ;;  %v1460_v13 = vpop.f32.mrf.mxu0  ;;  %v4149_v7 = vsub.s32 4, %v4000_v63  ;;  %v1592_v8 = vrot.slane %v4135_v56, %v4003_v0 }
 0x499   :  { %v1501_v18 = vpop.f32.mrf.mxu1 }
 0x49a   :  { %v4133_v45 = vadd.f32 %v1501_v18, %v1460_v13  ;;  %v1462_v54 = vpop.f32.mrf.mxu0  ;;  %v1612_v13 = vrot.slane %v4135_v56, %v4140_v60  ;;  %v1630_v18 = vmul.f32 %v1596_v33, %v4125_v43  ;;  %v1608_v61 = vrot.slane %v4135_v56, %v4149_v7 }
 0x49b   :  { %v1503_v9 = vpop.f32.mrf.mxu1  ;;  %v1645_v54 = vrot.slane %v4144_v4, %v4006_v2  ;;  %v1657_v23 = vrot.slane %v4144_v4, %v4149_v7 }
 0x49c   :  { %v1463_v24 = vpop.f32.mrf.mxu0  ;;  %v1629_v9 = vmul.f32 %v1592_v8, %v4123_v42  ;;  %v1634_v43 = vmul.f32 %v1612_v13, %v4133_v45  ;;  %v4180_v42 = vld [vmem:[#allocation11 + $0x5f0] sm:$0xff]  ;;  %v1633_v25 = vmul.f32 %v1608_v61, %v4131_v12  ;;  %v4209_v61 = vmul.f32 0.125, %v1705_v16 }
 0x49d   :  { %v1504_v26 = vpop.f32.mrf.mxu1  ;;  %v4174_v59 = vadd.f32 %v1645_v54, %v1630_v18  ;;  %v4178_v24 = vld [vmem:[#allocation11 + $0x430] sm:$0xff]  ;;  %v4205_v54 = vmul.f32 0.125, %v1711_v10 }
 0x49e   :  { %v2564_v45 = vunpack.c.h.s8.bf16 %v4178_v24  ;;  %v2676_v26 = vunpack.c.h.s8.bf16 %v4180_v42  ;;  %v4187_v31 = vadd.f32 %v1641_v19, %v1629_v9  ;;  %v4190_v27 = vadd.f32 %v1661_v22, %v1634_v43 }
 0x49f   :  { %v1694_v6 = vrot.slane %v4174_v59, 4  ;;  %v4194_v14 = vadd.f32 %v1657_v23, %v1633_v25  ;;  %v1747_v43 = vsub.f32 %v4169_v20, %v4205_v54  ;;  %v4218_v23 = vsub.s32 6, %v4000_v63 }
 0x4a0   :  { %2828 = vmatprep.subr.bf16.mxu0 %v2564_v45  ;;  %2869 = vmatprep.subr.bf16.mxu1 %v2676_v26  ;;  %v1688_v12 = vrot.slane %v4187_v31, 4  ;;  %v1718_v15 = vrot.slane %v4190_v27, 4  ;;  %v1746_v45 = vsub.f32 %v4182_v30, %v4209_v61 }
 0x4a1   :  { %v1695_v34 = vadd.f32 %v1694_v6, %v4174_v59  ;;  %v1712_v36 = vrot.slane %v4194_v14, 4  ;;  %v1755_v28 = vmul.f32 %v1747_v43, %v1747_v43 }
 0x4a2   :  { %v1689_v37 = vadd.f32 %v1688_v12, %v4187_v31  ;;  %v1719_v39 = vadd.f32 %v1718_v15, %v4190_v27  ;;  %v1616_v15 = vrot.slane %v4135_v56, %v4218_v23 }
 0x4a3   :  { %v1696_v40 = vrot.slane %v1695_v34, 2  ;;  %v1713_v51 = vadd.f32 %v1712_v36, %v4194_v14  ;;  %v1665_v36 = vrot.slane %v4144_v4, %v4218_v23  ;;  %v1778_v46 = vrot.slane %v1755_v28, 4 }
 0x4a4   :  { %v1690_v52 = vrot.slane %v1689_v37, 2  ;;  %v1720_v47 = vrot.slane %v1719_v39, 2 }
 0x4a5   :  { %v1697_v48 = vadd.f32 %v1696_v40, %v1695_v34  ;;  %v1714_v58 = vrot.slane %v1713_v51, 2  ;;  %v1620_v40 = vrot.slane %v4135_v56, %v4227_v21 }
 0x4a6   :  { %v1691_v32 = vadd.f32 %v1690_v52, %v1689_v37  ;;  %v1721_v33 = vadd.f32 %v1720_v47, %v1719_v39  ;;  %v1754_v37 = vmul.f32 %v1746_v45, %v1746_v45  ;;  %v1669_v52 = vrot.slane %v4144_v4, %v4227_v21 }
 0x4a7   :  { %v1698_v1 = vrot.slane %v1697_v48, 1  ;;  %v1715_v5 = vadd.f32 %v1714_v58, %v1713_v51 }
 0x4a8   :  { %v1692_v8 = vrot.slane %v1691_v32, 1  ;;  %v1722_v11 = vrot.slane %v1721_v33, 1 }
 0x4a9   :  { %v1699_v13 = vadd.f32 %v1698_v1, %v1697_v48  ;;  %v1716_v17 = vrot.slane %v1715_v5, 1 }
 0x4aa   :  { %v1693_v18 = vadd.f32 %v1692_v8, %v1691_v32  ;;  %v1723_v44 = vadd.f32 %v1722_v11, %v1721_v33  ;;  %v1772_v33 = vrot.slane %v1754_v37, 4  ;;  %v1779_v11 = vadd.f32 %v1778_v46, %v1755_v28 }
 0x4ab   :  { %v4207_v53 = vmul.f32 0.125, %v1699_v13  ;;  %v1717_v9 = vadd.f32 %v1716_v17, %v1715_v5 }
 0x4ac   :  { %v4211_v19 = vmul.f32 0.125, %v1693_v18  ;;  %v4215_v22 = vmul.f32 0.125, %v1723_v44  ;;  %v1773_v18 = vadd.f32 %v1772_v33, %v1754_v37  ;;  %v1780_v45 = vrot.slane %v1779_v11, 2 }
 0x4ad   :  { %v1745_v25 = vsub.f32 %v4174_v59, %v4207_v53  ;;  %v4224_v26 = vmul.f32 0.125, %v1717_v9 }
 0x4ae   :  { %v1744_v6 = vsub.f32 %v4187_v31, %v4211_v19  ;;  %v1749_v12 = vsub.f32 %v4190_v27, %v4215_v22  ;;  %v1774_v28 = vrot.slane %v1773_v18, 2 }
 0x4af   :  { %v1753_v34 = vmul.f32 %v1745_v25, %v1745_v25  ;;  %v1748_v63 = vsub.f32 %v4194_v14, %v4224_v26 }
 0x4b0   :  { %v1752_v41 = vmul.f32 %v1744_v6, %v1744_v6  ;;  %v1757_v47 = vmul.f32 %v1749_v12, %v1749_v12 }
 0x4b1   :  { %v1766_v32 = vrot.slane %v1753_v34, 4  ;;  %v1756_v1 = vmul.f32 %v1748_v63, %v1748_v63 }
 0x4b2   :  { %v1760_v10 = vrot.slane %v1752_v41, 4  ;;  %v1790_v13 = vrot.slane %v1757_v47, 4 }
 0x4b3   :  { %v1767_v17 = vadd.f32 %v1766_v32, %v1753_v34  ;;  %v1784_v44 = vrot.slane %v1756_v1, 4 }
 0x4b4   :  { %v1761_v25 = vadd.f32 %v1760_v10, %v1752_v41  ;;  %v1791_v6 = vadd.f32 %v1790_v13, %v1757_v47 }
 0x4b6   :  { %v1792_v34 = vrot.slane %v1791_v6, 2 }
 0x4d6   :  { %v1540_v29 = vpop.f32.mrf.mxu0 }
 0x4d7   :  { %v1581_v35 = vpop.f32.mrf.mxu1 }
 0x4d8   :  { %v1582_v38 = vadd.f32 %v1581_v35, %v1540_v29  ;;  %v1542_v39 = vpop.f32.mrf.mxu0  ;;  %v1785_v35 = vadd.f32 %v1784_v44, %v1756_v1 }
 0x4d9   :  { %v1583_v51 = vpop.f32.mrf.mxu1 }
 0x4da   :  { %v1635_v48 = vmul.f32 %v1616_v15, %v1582_v38  ;;  %v1584_v50 = vadd.f32 %v1583_v51, %v1542_v39  ;;  %v1544_v58 = vpop.f32.mrf.mxu0  ;;  %v1768_v15 = vrot.slane %v1767_v17, 2  ;;  %v1762_v38 = vrot.slane %v1761_v25, 2 }
 0x4db   :  { %v1585_v62 = vpop.f32.mrf.mxu1  ;;  %v1781_v39 = vadd.f32 %v1780_v45, %v1779_v11  ;;  %v1786_v46 = vrot.slane %v1785_v35, 2  ;;  %v1793_v58 = vadd.f32 %v1792_v34, %v1791_v6 }
 0x4dc   :  { %v4243_v3 = vadd.f32 %v1665_v36, %v1635_v48  ;;  %v1636_v5 = vmul.f32 %v1620_v40, %v1584_v50  ;;  %v1545_v8 = vpop.f32.mrf.mxu0  ;;  %v1769_v51 = vadd.f32 %v1768_v15, %v1767_v17  ;;  %v1763_v50 = vadd.f32 %v1762_v38, %v1761_v25 }
 0x4dd   :  { %v1586_v56 = vpop.f32.mrf.mxu1  ;;  %v1782_v47 = vrot.slane %v1781_v39, 1  ;;  %v1794_v13 = vrot.slane %v1793_v58, 1 }
 0x4de   :  { %v1724_v16 = vrot.slane %v4243_v3, 4  ;;  %v4246_v4 = vadd.f32 %v1669_v52, %v1636_v5  ;;  %v1775_v52 = vadd.f32 %v1774_v28, %v1773_v18  ;;  %v1770_v33 = vrot.slane %v1769_v51, 1 }
 0x4df   :  { %v1787_v5 = vadd.f32 %v1786_v46, %v1785_v35  ;;  %v1764_v56 = vrot.slane %v1763_v50, 1  ;;  %v1783_v11 = vadd.f32 %v1782_v47, %v1781_v39 }
 0x4e0   :  { %v1725_v9 = vadd.f32 %v1724_v16, %v4243_v3  ;;  %v1730_v43 = vrot.slane %v4246_v4, 4  ;;  %v1776_v1 = vrot.slane %v1775_v52, 1  ;;  %v1771_v18 = vadd.f32 %v1770_v33, %v1769_v51 }
 0x4e1   :  { %v1765_v45 = vadd.f32 %v1764_v56, %v1763_v50  ;;  %v1811_v6 = vmul.f32 0.125, %v1783_v11 }
 0x4e2   :  { %v1726_v12 = vrot.slane %v1725_v9, 2  ;;  %v1731_v29 = vadd.f32 %v1730_v43, %v4246_v4  ;;  %v1777_v44 = vadd.f32 %v1776_v1, %v1775_v52  ;;  %v1809_v28 = vmul.f32 0.125, %v1771_v18 }
 0x4e3   :  { %v1808_v39 = vmul.f32 0.125, %v1765_v45  ;;  %v1819_v34 = vadd.f32 0.8, %v1811_v6 }
 0x4e4   :  { %v1727_v36 = vadd.f32 %v1726_v12, %v1725_v9  ;;  %v1732_v63 = vrot.slane %v1731_v29, 2  ;;  %v1788_v9 = vrot.slane %v1787_v5, 1  ;;  %v1795_v12 = vadd.f32 %v1794_v13, %v1793_v58 }
 0x4e5   :  { %v1810_v35 = vmul.f32 0.125, %v1777_v44  ;;  %v1817_v51 = vadd.f32 0.8, %v1809_v28  ;;  %v1816_v50 = vadd.f32 0.8, %v1808_v39  ;;  %3715 = vrsqrt.f32 %v1819_v34 }
 0x4e6   :  { %v1728_v37 = vrot.slane %v1727_v36, 1  ;;  %v1733_v40 = vadd.f32 %v1732_v63, %v1731_v29 }
 0x4e7   :  { %v1818_v52 = vadd.f32 0.8, %v1810_v35  ;;  %3717 = vrsqrt.f32 %v1817_v51 }
 0x4e8   :  { %v1729_v48 = vadd.f32 %v1728_v37, %v1727_v36  ;;  %v1734_v41 = vrot.slane %v1733_v40, 1  ;;  %v1789_v36 = vadd.f32 %v1788_v9, %v1787_v5  ;;  %v1813_v37 = vmul.f32 0.125, %v1795_v12 }
 0x4e9   :  { %3719 = vrsqrt.f32 %v1818_v52 }
 0x4ea   :  { %v4251_v32 = vmul.f32 0.125, %v1729_v48  ;;  %v1735_v62 = vadd.f32 %v1734_v41, %v1733_v40  ;;  %v1812_v48 = vmul.f32 0.125, %v1789_v36  ;;  %v1821_v58 = vadd.f32 0.8, %v1813_v37 }
 0x4eb   :  { %3721 = vrsqrt.f32 %v1816_v50 }
 0x4ec   :  { %v1750_v8 = vsub.f32 %v4243_v3, %v4251_v32  ;;  %v4255_v10 = vmul.f32 0.125, %v1735_v62  ;;  %v1820_v1 = vadd.f32 0.8, %v1812_v48  ;;  %3723 = vrsqrt.f32 %v1821_v58 }
 0x4ee   :  { %v1758_v16 = vmul.f32 %v1750_v8, %v1750_v8  ;;  %v1751_v17 = vsub.f32 %v4246_v4, %v4255_v10  ;;  %3725 = vrsqrt.f32 %v1820_v1 }
 0x4f0   :  { %v1796_v43 = vrot.slane %v1758_v16, 4  ;;  %v1759_v25 = vmul.f32 %v1751_v17, %v1751_v17 }
 0x4f2   :  { %v1797_v29 = vadd.f32 %v1796_v43, %v1758_v16  ;;  %v1802_v15 = vrot.slane %v1759_v25, 4  ;;  %v3716_v16 = vpop.eup %3715 }
 0x4f4   :  { %v1798_v63 = vrot.slane %v1797_v29, 2  ;;  %v1803_v38 = vadd.f32 %v1802_v15, %v1759_v25  ;;  %v3718_v17 = vpop.eup %3717 }
 0x4f6   :  { %v1799_v40 = vadd.f32 %v1798_v63, %v1797_v29  ;;  %v1804_v46 = vrot.slane %v1803_v38, 2  ;;  %v3720_v18 = vpop.eup %3719 }
 0x4f7   :  { %v1841_v9 = vcombine.low %v3720_v18, %v3716_v16 }
 0x4f8   :  { %v1800_v41 = vrot.slane %v1799_v40, 1  ;;  %v1805_v47 = vadd.f32 %v1804_v46, %v1803_v38  ;;  %v3722_v44 = vpop.eup %3721 }
 0x4f9   :  { %v3724_v43 = vpop.eup %3723  ;;  %v1840_v25 = vcombine.low %v3722_v44, %v3718_v17  ;;  %v1857_v12 = vrot.slane %v1841_v9, %v4016_v49 }
 0x4fa   :  { %v1801_v62 = vadd.f32 %v1800_v41, %v1799_v40  ;;  %v1806_v33 = vrot.slane %v1805_v47, 1  ;;  %v1686_v40 = vld [vmem:[#allocation13 + $0x1c] sm:$0xff] }
 0x4fb   :  { %v3726_v45 = vpop.eup %3725  ;;  %v1850_v28 = vrot.slane %v1840_v25, %v4016_v49 }
 0x4fc   :  { %v1814_v5 = vmul.f32 0.125, %v1801_v62  ;;  %v1807_v8 = vadd.f32 %v1806_v33, %v1805_v47  ;;  %v1842_v29 = vcombine.low %v3726_v45, %v3724_v43  ;;  %v1687_v45 = vld [vmem:[#allocation13 + $0x2a] sm:$0xff] }
 0x4fd   :  { %v1872_v36 = vcombine.low %v1850_v28, %v1857_v12 }
 0x4fe   :  { %v1822_v56 = vadd.f32 0.8, %v1814_v5  ;;  %v1815_v11 = vmul.f32 0.125, %v1807_v8  ;;  %v1864_v63 = vrot.slane %v1842_v29, %v4016_v49 }
 0x4ff   :  { %v1880_v34 = vrot.slane %v1872_v36, %v4016_v49 }
 0x500   :  { %v1823_v13 = vadd.f32 0.8, %v1815_v11  ;;  %3727 = vrsqrt.f32 %v1822_v56 }
 0x502   :  { %3729 = vrsqrt.f32 %v1823_v13 }
 0x50d   :  { %v3728_v6 = vpop.eup %3727 }
 0x50f   :  { %v3730_v15 = vpop.eup %3729 }
 0x510   :  { %v1843_v35 = vcombine.low %v3728_v6, %v3730_v15 }
 0x512   :  { %v1871_v38 = vrot.slane %v1843_v35, %v4016_v49 }
 0x514   :  { %v1873_v39 = vcombine.low %v1864_v63, %v1871_v38 }
 0x516   :  { %v1887_v37 = vrot.slane %v1873_v39, %v4016_v49 }
 0x518   :  { %v1888_v46 = vcombine.low %v1880_v34, %v1887_v37 }
 0x51a   :  { %v1890_v51 = vmul.f32 %v1888_v46, %v1686_v40  ;;  %v2199_v40 = vld [vmem:[#allocation11 + $0x428] sm:$0xff] }
 0x51b   :  { %v2255_v46 = vld [vmem:[#allocation11 + $0x5e8] sm:$0xff] }
 0x51c   :  { %v1911_v52 = vrot.slane %v1890_v51, %v4149_v7  ;;  %v1915_v48 = vrot.slane %v1890_v51, %v4140_v60  ;;  %v1919_v41 = vrot.slane %v1890_v51, %v4218_v23  ;;  %v1923_v47 = vrot.slane %v1890_v51, %v4227_v21 }
 0x51d   :  { %v1895_v50 = vrot.slane %v1890_v51, %v4003_v0  ;;  %v1899_v58 = vrot.slane %v1890_v51, %v4006_v2  ;;  %v1903_v62 = vrot.slane %v1890_v51, %v4034_v55  ;;  %v1907_v33 = vrot.slane %v1890_v51, %v4037_v57 }
 0x51e   :  { %v1936_v1 = vmul.f32 %v1911_v52, %v4224_v26  ;;  %v1937_v5 = vmul.f32 %v1915_v48, %v4215_v22  ;;  %v1938_v8 = vmul.f32 %v1919_v41, %v4251_v32  ;;  %v1939_v56 = vmul.f32 %v1923_v47, %v4255_v10 }
 0x51f   :  { %v1932_v11 = vmul.f32 %v1895_v50, %v4211_v19  ;;  %v1933_v13 = vmul.f32 %v1899_v58, %v4207_v53  ;;  %v1934_v16 = vmul.f32 %v1903_v62, %v4209_v61  ;;  %v1935_v17 = vmul.f32 %v1907_v33, %v4205_v54 }
 0x520   :  { %v1950_v18 = vcombine.low %v1936_v1, %v1937_v5  ;;  %v1951_v44 = vcombine.low %v1938_v8, %v1939_v56  ;;  %v2000_v6 = vmul.f32 %v1899_v58, %v4174_v59  ;;  %v2002_v29 = vmul.f32 %v1907_v33, %v4169_v20 }
 0x521   :  { %v1948_v9 = vcombine.low %v1932_v11, %v1933_v13  ;;  %v1949_v43 = vcombine.low %v1934_v16, %v1935_v17  ;;  %v1999_v15 = vmul.f32 %v1895_v50, %v4187_v31  ;;  %v2001_v28 = vmul.f32 %v1903_v62, %v4182_v30 }
 0x522   :  { %v1972_v26 = vrot.slane %v1950_v18, %v4016_v49  ;;  %v1979_v22 = vrot.slane %v1951_v44, %v4016_v49  ;;  %v2004_v35 = vmul.f32 %v1915_v48, %v4190_v27  ;;  %v2006_v36 = vmul.f32 %v1923_v47, %v4246_v4  ;;  %v2193_v18 = vld [vmem:[#allocation11 + $0x3f8] sm:$0xff] }
 0x523   :  { %v1958_v32 = vrot.slane %v1948_v9, %v4016_v49  ;;  %v1965_v10 = vrot.slane %v1949_v43, %v4016_v49  ;;  %v2003_v63 = vmul.f32 %v1911_v52, %v4194_v14  ;;  %v2005_v38 = vmul.f32 %v1919_v41, %v4243_v3  ;;  %v2249_v44 = vld [vmem:[#allocation11 + $0x5b8] sm:$0xff] }
 0x524   :  { %v1981_v25 = vcombine.low %v1972_v26, %v1979_v22  ;;  %v2563_v62 = vunpack.c.h.s8.bf16 %v2199_v40  ;;  %v2675_v33 = vunpack.c.h.s8.bf16 %v2255_v46  ;;  %v2557_v16 = vunpack.c.l.s8.bf16 %v4178_v24 }
 0x525   :  { %v1980_v19 = vcombine.low %v1958_v32, %v1965_v10  ;;  %v2669_v17 = vunpack.c.l.s8.bf16 %v4180_v42  ;;  %v2556_v26 = vunpack.c.l.s8.bf16 %v2199_v40  ;;  %v2668_v22 = vunpack.c.l.s8.bf16 %v2255_v46  ;;  %v2192_v32 = vld [vmem:[#allocation11 + $0x3f0] sm:$0xff] }
 0x526   :  { %v1995_v53 = vrot.slane %v1981_v25, %v4016_v49  ;;  %v2550_v24 = vunpack.c.h.s8.bf16 %v2193_v18  ;;  %v2662_v42 = vunpack.c.h.s8.bf16 %v2249_v44  ;;  %v2248_v10 = vld [vmem:[#allocation11 + $0x5b0] sm:$0xff]  ;;  %v2549_v25 = vunpack.c.h.s8.bf16 %v2192_v32 }
 0x527   :  { %v1988_v61 = vrot.slane %v1980_v19, %v4016_v49  ;;  %v2661_v19 = vunpack.c.h.s8.bf16 %v2248_v10  ;;  %v2228_v46 = vld [vmem:[#allocation11 + $0x510] sm:$0xff] }
 0x529   :  { %v1996_v54 = vcombine.low %v1988_v61, %v1995_v53  ;;  %v2543_v53 = vunpack.c.l.s8.bf16 %v2193_v18  ;;  %v2655_v61 = vunpack.c.l.s8.bf16 %v2249_v44  ;;  %v2277_v18 = vld [vmem:[#allocation11 + $0x698] sm:$0xff] }
 0x52b   :  { %v1998_v12 = vsub.f32 %v1687_v45, %v1996_v54  ;;  %v2186_v45 = vld [vmem:[#allocation11 + $0x3c0] sm:$0xff] }
 0x52c   :  { %v2242_v54 = vld [vmem:[#allocation11 + $0x580] sm:$0xff] }
 0x52d   :  { %v2015_v49 = vrot.slane %v1998_v12, %v4006_v2  ;;  %v2023_v39 = vrot.slane %v1998_v12, %v4037_v57  ;;  %v2011_v59 = vrot.slane %v1998_v12, %v4003_v0  ;;  %v2019_v20 = vrot.slane %v1998_v12, %v4034_v55 }
 0x52e   :  { %v2031_v31 = vrot.slane %v1998_v12, %v4140_v60  ;;  %v2039_v30 = vrot.slane %v1998_v12, %v4227_v21  ;;  %v2027_v27 = vrot.slane %v1998_v12, %v4149_v7  ;;  %v2035_v4 = vrot.slane %v1998_v12, %v4218_v23 }
 0x52f   :  { %v2049_v34 = vadd.f32 %v2015_v49, %v2000_v6  ;;  %v2051_v14 = vadd.f32 %v2023_v39, %v2002_v29  ;;  %v2048_v37 = vadd.f32 %v2011_v59, %v1999_v15  ;;  %v2050_v3 = vadd.f32 %v2019_v20, %v2001_v28  ;;  %v2185_v28 = vld [vmem:[#allocation11 + $0x3b8] sm:$0xff]  ;;  %v2179_v39 = vld [vmem:[#allocation11 + $0x388] sm:$0xff] }
 0x530   :  { %v2053_v51 = vadd.f32 %v2031_v31, %v2004_v35  ;;  %v2055_v52 = vadd.f32 %v2039_v30, %v2006_v36  ;;  %v4303_v48 = vadd.f32 %v2027_v27, %v2003_v63  ;;  %v4305_v41 = vadd.f32 %v2035_v4, %v2005_v38  ;;  %v2241_v35 = vld [vmem:[#allocation11 + $0x578] sm:$0xff]  ;;  %v2235_v59 = vld [vmem:[#allocation11 + $0x548] sm:$0xff]  ;;  %v2178_v4 = vld [vmem:[#allocation11 + $0x380] sm:$0xff] }
 0x531   :  { %v2057_v47 = vmax.f32 %v2049_v34, 0.0  ;;  %v2059_v50 = vmax.f32 %v2051_v14, 0.0  ;;  %v2056_v58 = vmax.f32 %v2048_v37, 0.0  ;;  %v2058_v21 = vmax.f32 %v2050_v3, 0.0  ;;  %v2234_v34 = vld [vmem:[#allocation11 + $0x540] sm:$0xff] }
 0x532   :  { %v2061_v1 = vmax.f32 %v2053_v51, 0.0  ;;  %v2063_v5 = vmax.f32 %v2055_v52, 0.0  ;;  %v2542_v6 = vunpack.c.l.s8.bf16 %v2192_v32  ;;  %v2654_v12 = vunpack.c.l.s8.bf16 %v2248_v10  ;;  %v2284_v51 = vld [vmem:[#allocation11 + $0x6d0] sm:$0xff] }
 0x533   :  { %v4307_v8 = vpack.c.bf16 %v2057_v47, %v2057_v47  ;;  %v4309_v56 = vpack.c.bf16 %v2059_v50, %v2059_v50  ;;  %v4311_v11 = vpack.c.bf16 %v2056_v58, %v2056_v58  ;;  %v4313_v13 = vpack.c.bf16 %v2058_v21, %v2058_v21  ;;  %v2227_v21 = vld [vmem:[#allocation11 + $0x508] sm:$0xff]  ;;  %v2276_v32 = vld [vmem:[#allocation11 + $0x690] sm:$0xff] }
 0x534   :  { %v4321_v9 = vpack.c.bf16 %v2061_v1, %v2061_v1  ;;  %v4323_v43 = vpack.c.bf16 %v2063_v5, %v2063_v5  ;;  %v2536_v29 = vunpack.c.h.s8.bf16 %v2186_v45  ;;  %v2648_v15 = vunpack.c.h.s8.bf16 %v2242_v54 }
 0x535   :  { %2778 = vmatprep.mubr.bf16.mxu0 %v4307_v8  ;;  %2819 = vmatprep.mubr.bf16.mxu1 %v4309_v56  ;;  %v2535_v36 = vunpack.c.h.s8.bf16 %v2185_v28  ;;  %v2647_v63 = vunpack.c.h.s8.bf16 %v2241_v35  ;;  %v2529_v38 = vunpack.c.l.s8.bf16 %v2186_v45  ;;  %v2641_v49 = vunpack.c.l.s8.bf16 %v2242_v54  ;;  %v2270_v45 = vld [vmem:[#allocation11 + $0x660] sm:$0xff] }
 0x536   :  { %2779 = vmatmul.mubr.bf16.vlgmr.msra.gmra.mxu0 %v4311_v11  ;;  %2820 = vmatmul.mubr.bf16.vlgmr.msra.gmra.mxu1 %v4313_v13  ;;  %v2528_v20 = vunpack.c.l.s8.bf16 %v2185_v28  ;;  %v2640_v31 = vunpack.c.l.s8.bf16 %v2241_v35  ;;  %v2522_v30 = vunpack.c.h.s8.bf16 %v2179_v39  ;;  %v2634_v27 = vunpack.c.h.s8.bf16 %v2235_v59  ;;  %v2269_v28 = vld [vmem:[#allocation11 + $0x658] sm:$0xff] }
 0x537   :  { %2829 = vmatpush1.bf16.msra.mxu0 %v2563_v62  ;;  %2870 = vmatpush1.bf16.msra.mxu1 %v2675_v33  ;;  %v2521_v14 = vunpack.c.h.s8.bf16 %v2178_v4  ;;  %v2633_v37 = vunpack.c.h.s8.bf16 %v2234_v34  ;;  %v2515_v3 = vunpack.c.l.s8.bf16 %v2179_v39  ;;  %v2627_v40 = vunpack.c.l.s8.bf16 %v2235_v59  ;;  %v2283_v62 = vld [vmem:[#allocation11 + $0x6c8] sm:$0xff] }
 0x538   :  { %2860 = vmatprep.mubr.bf16.mxu0 %v4321_v9  ;;  %2901 = vmatprep.mubr.bf16.mxu1 %v4323_v43  ;;  %v2514_v52 = vunpack.c.l.s8.bf16 %v2178_v4  ;;  %v2626_v47 = vunpack.c.l.s8.bf16 %v2234_v34  ;;  %v2620_v50 = vunpack.c.h.s8.bf16 %v2228_v46  ;;  %v2732_v58 = vunpack.c.h.s8.bf16 %v2284_v51  ;;  %v2263_v39 = vld [vmem:[#allocation11 + $0x628] sm:$0xff]  ;;  %v2262_v4 = vld [vmem:[#allocation11 + $0x620] sm:$0xff] }
 0x539   :  { %2830 = vmatprep.subr.bf16.mxu0 %v2557_v16  ;;  %2871 = vmatprep.subr.bf16.mxu1 %v2669_v17  ;;  %v2619_v33 = vunpack.c.h.s8.bf16 %v2227_v21  ;;  %v2731_v1 = vunpack.c.h.s8.bf16 %v2283_v62  ;;  %v2613_v5 = vunpack.c.l.s8.bf16 %v2228_v46  ;;  %v2725_v16 = vunpack.c.l.s8.bf16 %v2284_v51  ;;  %v2221_v17 = vld [vmem:[#allocation11 + $0x4d8] sm:$0xff]  ;;  %v2146_v46 = vld [vmem:[#allocation11 + $0x280] sm:$0xff] }
 0x53a   :  { %v2612_v44 = vunpack.c.l.s8.bf16 %v2227_v21  ;;  %v2454_v21 = vunpack.c.h.s8.bf16 %v2146_v46 }
 0x53b   :  { %2831 = vmatpush1.bf16.msra.mxu0 %v2556_v26  ;;  %2872 = vmatpush1.bf16.msra.mxu1 %v2668_v22  ;;  %v2724_v26 = vunpack.c.l.s8.bf16 %v2283_v62  ;;  %v2606_v22 = vunpack.c.h.s8.bf16 %v2221_v17  ;;  %v2089_v62 = vld [vmem:[#allocation11 + $0xb8] sm:$0xff] }
 0x53c   :  { %2832 = vmatprep.subr.bf16.mxu0 %v2550_v24  ;;  %2873 = vmatprep.subr.bf16.mxu1 %v2662_v42  ;;  %v2718_v24 = vunpack.c.h.s8.bf16 %v2277_v18  ;;  %v2220_v42 = vld [vmem:[#allocation11 + $0x4d0] sm:$0xff] }
 0x53d   :  { %v2605_v10 = vunpack.c.h.s8.bf16 %v2220_v42  ;;  %v2598_v54 = vunpack.c.l.s8.bf16 %v2220_v42  ;;  %v2082_v42 = vld [vmem:[#allocation11 + $0x80] sm:$0xff] }
 0x53f   :  { %2833 = vmatpush1.bf16.msra.mxu0 %v2549_v25  ;;  %2874 = vmatpush1.bf16.msra.mxu1 %v2661_v19  ;;  %v2717_v25 = vunpack.c.h.s8.bf16 %v2276_v32  ;;  %v2599_v19 = vunpack.c.l.s8.bf16 %v2221_v17 }
 0x540   :  { %2834 = vmatprep.subr.bf16.mxu0 %v2543_v53  ;;  %2875 = vmatprep.subr.bf16.mxu1 %v2655_v61  ;;  %v2711_v53 = vunpack.c.l.s8.bf16 %v2277_v18  ;;  %v2214_v61 = vld [vmem:[#allocation11 + $0x4a0] sm:$0xff] }
 0x543   :  { %2835 = vmatpush1.bf16.msra.mxu0 %v2542_v6  ;;  %2876 = vmatpush1.bf16.msra.mxu1 %v2654_v12  ;;  %v2710_v6 = vunpack.c.l.s8.bf16 %v2276_v32  ;;  %v2592_v12 = vunpack.c.h.s8.bf16 %v2214_v61 }
 0x544   :  { %2836 = vmatprep.subr.bf16.mxu0 %v2536_v29  ;;  %2877 = vmatprep.subr.bf16.mxu1 %v2648_v15  ;;  %v2704_v29 = vunpack.c.h.s8.bf16 %v2270_v45  ;;  %v2213_v15 = vld [vmem:[#allocation11 + $0x498] sm:$0xff] }
 0x545   :  { %v2591_v35 = vunpack.c.h.s8.bf16 %v2213_v15  ;;  %v2584_v59 = vunpack.c.l.s8.bf16 %v2213_v15  ;;  %v2075_v15 = vld [vmem:[#allocation11 + $0x48] sm:$0xff] }
 0x547   :  { %2837 = vmatpush1.bf16.msra.mxu0 %v2535_v36  ;;  %2878 = vmatpush1.bf16.msra.mxu1 %v2647_v63  ;;  %v2703_v36 = vunpack.c.h.s8.bf16 %v2269_v28  ;;  %v2585_v63 = vunpack.c.l.s8.bf16 %v2214_v61 }
 0x548   :  { %2838 = vmatprep.subr.bf16.mxu0 %v2529_v38  ;;  %2879 = vmatprep.subr.bf16.mxu1 %v2641_v49  ;;  %v2697_v38 = vunpack.c.l.s8.bf16 %v2270_v45  ;;  %v2207_v49 = vld [vmem:[#allocation11 + $0x468] sm:$0xff]  ;;  %v2076_v45 = vld [vmem:[#allocation11 + $0x50] sm:$0xff] }
 0x54b   :  { %2839 = vmatpush1.bf16.msra.mxu0 %v2528_v20  ;;  %2880 = vmatpush1.bf16.msra.mxu1 %v2640_v31  ;;  %v2696_v20 = vunpack.c.l.s8.bf16 %v2269_v28  ;;  %v2578_v31 = vunpack.c.h.s8.bf16 %v2207_v49 }
 0x54c   :  { %2840 = vmatprep.subr.bf16.mxu0 %v2522_v30  ;;  %2881 = vmatprep.subr.bf16.mxu1 %v2634_v27  ;;  %v2690_v30 = vunpack.c.h.s8.bf16 %v2263_v39  ;;  %v2206_v27 = vld [vmem:[#allocation11 + $0x460] sm:$0xff] }
 0x54d   :  { %v2577_v34 = vunpack.c.h.s8.bf16 %v2206_v27  ;;  %v2570_v51 = vunpack.c.l.s8.bf16 %v2206_v27  ;;  %v2068_v27 = vld [vmem:[#allocation11 + $0x10] sm:$0xff] }
 0x54f   :  { %2841 = vmatpush1.bf16.msra.mxu0 %v2521_v14  ;;  %2882 = vmatpush1.bf16.msra.mxu1 %v2633_v37  ;;  %v2689_v14 = vunpack.c.h.s8.bf16 %v2262_v4  ;;  %v2571_v37 = vunpack.c.l.s8.bf16 %v2207_v49 }
 0x550   :  { %2842 = vmatprep.subr.bf16.mxu0 %v2515_v3  ;;  %2883 = vmatprep.subr.bf16.mxu1 %v2627_v40  ;;  %v2683_v3 = vunpack.c.l.s8.bf16 %v2263_v39  ;;  %v2090_v40 = vld [vmem:[#allocation11 + $0xc0] sm:$0xff]  ;;  %v2069_v39 = vld [vmem:[#allocation11 + $0x18] sm:$0xff] }
 0x551   :  { %v2335_v18 = vunpack.c.l.s8.bf16 %v2090_v40 }
 0x553   :  { %2843 = vmatpush1.bf16.msra.mxu0 %v2514_v52  ;;  %2884 = vmatpush1.bf16.msra.mxu1 %v2626_v47  ;;  %v2682_v52 = vunpack.c.l.s8.bf16 %v2262_v4  ;;  %v2060_v47 = vmax.f32 %v4303_v48, 0.0  ;;  %v2139_v48 = vld [vmem:[#allocation11 + $0x248] sm:$0xff] }
 0x554   :  { %2844 = vmatprep.subr.bf16.mxu0 %v2620_v50  ;;  %2885 = vmatprep.subr.bf16.mxu1 %v2732_v58  ;;  %v2062_v50 = vmax.f32 %v4305_v41, 0.0  ;;  %v2342_v58 = vunpack.c.h.s8.bf16 %v2090_v40  ;;  %v2334_v41 = vunpack.c.l.s8.bf16 %v2089_v62  ;;  %v2440_v32 = vunpack.c.h.s8.bf16 %v2139_v48 }
 0x555   :  { %v2433_v61 = vunpack.c.l.s8.bf16 %v2139_v48 }
 0x557   :  { %2845 = vmatpush2.bf16.msra.mxu0 %v2619_v33  ;;  %2886 = vmatpush2.bf16.msra.mxu1 %v2731_v1  ;;  %v2145_v33 = vld [vmem:[#allocation11 + $0x278] sm:$0xff]  ;;  %v2341_v1 = vunpack.c.h.s8.bf16 %v2089_v62 }
 0x558   :  { %2846 = vmatprep.subr.bf16.mxu0 %v2613_v5  ;;  %2887 = vmatprep.subr.bf16.mxu1 %v2725_v16  ;;  %v4329_v5 = vpack.c.bf16 %v2060_v47, %v2060_v47  ;;  %v4331_v16 = vpack.c.bf16 %v2062_v50, %v2062_v50  ;;  %v2453_v17 = vunpack.c.h.s8.bf16 %v2145_v33  ;;  %v2173_v62 = vld [vmem:[#allocation11 + $0x358] sm:$0xff] }
 0x55b   :  { %2847 = vmatpush2.bf16.msra.mxu0 %v2612_v44  ;;  %2888 = vmatpush2.bf16.msra.mxu1 %v2724_v26  ;;  %v2447_v44 = vunpack.c.l.s8.bf16 %v2146_v46  ;;  %v2083_v26 = vld [vmem:[#allocation11 + $0x88] sm:$0xff]  ;;  %v2118_v46 = vld [vmem:[#allocation11 + $0x1a0] sm:$0xff] }
 0x55c   :  { %2848 = vmatprep.subr.bf16.mxu0 %v2606_v22  ;;  %2889 = vmatprep.subr.bf16.mxu1 %v2718_v24  ;;  %v2446_v22 = vunpack.c.l.s8.bf16 %v2145_v33  ;;  %v2328_v24 = vunpack.c.h.s8.bf16 %v2083_v26  ;;  %v2398_v50 = vunpack.c.h.s8.bf16 %v2118_v46 }
 0x55f   :  { %2849 = vmatpush2.bf16.msra.mxu0 %v2605_v10  ;;  %2890 = vmatpush2.bf16.msra.mxu1 %v2717_v25  ;;  %v2138_v10 = vld [vmem:[#allocation11 + $0x240] sm:$0xff]  ;;  %v2327_v25 = vunpack.c.h.s8.bf16 %v2082_v42 }
 0x560   :  { %2850 = vmatprep.subr.bf16.mxu0 %v2599_v19  ;;  %2891 = vmatprep.subr.bf16.mxu1 %v2711_v53  ;;  %v2439_v19 = vunpack.c.h.s8.bf16 %v2138_v10  ;;  %v2321_v53 = vunpack.c.l.s8.bf16 %v2083_v26  ;;  %v2167_v26 = vld [vmem:[#allocation11 + $0x328] sm:$0xff] }
 0x563   :  { %2851 = vmatpush2.bf16.msra.mxu0 %v2598_v54  ;;  %2892 = vmatpush2.bf16.msra.mxu1 %v2710_v6  ;;  %v2132_v54 = vld [vmem:[#allocation11 + $0x210] sm:$0xff]  ;;  %v2320_v6 = vunpack.c.l.s8.bf16 %v2082_v42  ;;  %v2496_v42 = vunpack.c.h.s8.bf16 %v2167_v26 }
 0x564   :  { %2852 = vmatprep.subr.bf16.mxu0 %v2592_v12  ;;  %2893 = vmatprep.subr.bf16.mxu1 %v2704_v29  ;;  %v2432_v12 = vunpack.c.l.s8.bf16 %v2138_v10  ;;  %v2314_v29 = vunpack.c.h.s8.bf16 %v2076_v45  ;;  %v2426_v28 = vunpack.c.h.s8.bf16 %v2132_v54  ;;  %v2419_v49 = vunpack.c.l.s8.bf16 %v2132_v54 }
 0x567   :  { %2853 = vmatpush2.bf16.msra.mxu0 %v2591_v35  ;;  %2894 = vmatpush2.bf16.msra.mxu1 %v2703_v36  ;;  %v2131_v35 = vld [vmem:[#allocation11 + $0x208] sm:$0xff]  ;;  %v2313_v36 = vunpack.c.h.s8.bf16 %v2075_v15 }
 0x568   :  { %2854 = vmatprep.subr.bf16.mxu0 %v2585_v63  ;;  %2895 = vmatprep.subr.bf16.mxu1 %v2697_v38  ;;  %v2425_v63 = vunpack.c.h.s8.bf16 %v2131_v35  ;;  %v2307_v38 = vunpack.c.l.s8.bf16 %v2076_v45  ;;  %v2160_v45 = vld [vmem:[#allocation11 + $0x2f0] sm:$0xff] }
 0x56b   :  { %2855 = vmatpush2.bf16.msra.mxu0 %v2584_v59  ;;  %2896 = vmatpush2.bf16.msra.mxu1 %v2696_v20  ;;  %v2125_v59 = vld [vmem:[#allocation11 + $0x1d8] sm:$0xff]  ;;  %v2306_v20 = vunpack.c.l.s8.bf16 %v2075_v15  ;;  %v2482_v15 = vunpack.c.h.s8.bf16 %v2160_v45 }
 0x56c   :  { %2856 = vmatprep.subr.bf16.mxu0 %v2578_v31  ;;  %2897 = vmatprep.subr.bf16.mxu1 %v2690_v30  ;;  %v2418_v31 = vunpack.c.l.s8.bf16 %v2131_v35  ;;  %v2300_v30 = vunpack.c.h.s8.bf16 %v2069_v39  ;;  %v2412_v4 = vunpack.c.h.s8.bf16 %v2125_v59  ;;  %v2405_v40 = vunpack.c.l.s8.bf16 %v2125_v59 }
 0x56f   :  { %2857 = vmatpush2.bf16.msra.mxu0 %v2577_v34  ;;  %2898 = vmatpush2.bf16.msra.mxu1 %v2689_v14  ;;  %v2124_v34 = vld [vmem:[#allocation11 + $0x1d0] sm:$0xff]  ;;  %v2299_v14 = vunpack.c.h.s8.bf16 %v2068_v27 }
 0x570   :  { %2858 = vmatprep.subr.bf16.mxu0 %v2571_v37  ;;  %2899 = vmatprep.subr.bf16.mxu1 %v2683_v3  ;;  %v2411_v37 = vunpack.c.h.s8.bf16 %v2124_v34  ;;  %v2293_v3 = vunpack.c.l.s8.bf16 %v2069_v39  ;;  %v2404_v47 = vunpack.c.l.s8.bf16 %v2124_v34  ;;  %v2153_v39 = vld [vmem:[#allocation11 + $0x2b8] sm:$0xff] }
 0x573   :  { %2859 = vmatpush2.bf16.msra.mxu0 %v2570_v51  ;;  %2900 = vmatpush2.bf16.msra.mxu1 %v2682_v52  ;;  %v2174_v51 = vld [vmem:[#allocation11 + $0x360] sm:$0xff]  ;;  %v2292_v52 = vunpack.c.l.s8.bf16 %v2068_v27  ;;  %v2468_v27 = vunpack.c.h.s8.bf16 %v2153_v39 }
 0x574   :  { %2910 = vmatprep.subr.bf16.mxu0 %v2342_v58  ;;  %2951 = vmatprep.subr.bf16.mxu1 %v2454_v21  ;;  %v2117_v58 = vld [vmem:[#allocation11 + $0x198] sm:$0xff]  ;;  %v2510_v21 = vunpack.c.h.s8.bf16 %v2174_v51 }
 0x575   :  { %v2397_v33 = vunpack.c.h.s8.bf16 %v2117_v58  ;;  %v2390_v48 = vunpack.c.l.s8.bf16 %v2117_v58 }
 0x576   :  { %2861 = vmatmul.mubr.bf16.vlgmr.msra.gmra.mxu0 %v4329_v5  ;;  %2902 = vmatmul.mubr.bf16.vlgmr.msra.gmra.mxu1 %v4331_v16 }
 0x577   :  { %2911 = vmatpush1.bf16.msra.mxu0 %v2341_v1  ;;  %2942 = vmatprep.mubr.bf16.mxu0 %v4307_v8  ;;  %v2509_v1 = vunpack.c.h.s8.bf16 %v2173_v62 }
 0x578   :  { %2952 = vmatpush1.bf16.msra.mxu1 %v2453_v17  ;;  %2983 = vmatprep.mubr.bf16.mxu1 %v4309_v56  ;;  %v2391_v17 = vunpack.c.l.s8.bf16 %v2118_v46  ;;  %v2258_v46 = vld [vmem:[#allocation11 + $0x600] sm:$0xff] }
 0x579   :  { %2912 = vmatprep.subr.bf16.mxu0 %v2335_v18  ;;  %2953 = vmatprep.subr.bf16.mxu1 %v2447_v44  ;;  %v2503_v18 = vunpack.c.l.s8.bf16 %v2174_v51  ;;  %v2111_v44 = vld [vmem:[#allocation11 + $0x168] sm:$0xff]  ;;  %v2678_v58 = vunpack.c.h.s8.bf16 %v2258_v46 }
 0x57b   :  { %2913 = vmatpush1.bf16.msra.mxu0 %v2334_v41  ;;  %v2502_v41 = vunpack.c.l.s8.bf16 %v2173_v62 }
 0x57c   :  { %2954 = vmatpush1.bf16.msra.mxu1 %v2446_v22  ;;  %2914 = vmatprep.subr.bf16.mxu0 %v2328_v24  ;;  %v2384_v22 = vunpack.c.h.s8.bf16 %v2111_v44  ;;  %v2110_v24 = vld [vmem:[#allocation11 + $0x160] sm:$0xff] }
 0x57d   :  { %2955 = vmatprep.subr.bf16.mxu1 %v2440_v32  ;;  %v2166_v32 = vld [vmem:[#allocation11 + $0x320] sm:$0xff]  ;;  %v2383_v10 = vunpack.c.h.s8.bf16 %v2110_v24  ;;  %v2376_v54 = vunpack.c.l.s8.bf16 %v2110_v24 }
 0x57f   :  { %2915 = vmatpush1.bf16.msra.mxu0 %v2327_v25  ;;  %v2495_v25 = vunpack.c.h.s8.bf16 %v2166_v32 }
 0x580   :  { %2956 = vmatpush1.bf16.msra.mxu1 %v2439_v19  ;;  %2916 = vmatprep.subr.bf16.mxu0 %v2321_v53  ;;  %v2377_v19 = vunpack.c.l.s8.bf16 %v2111_v44  ;;  %v2489_v53 = vunpack.c.l.s8.bf16 %v2167_v26  ;;  %v2251_v44 = vld [vmem:[#allocation11 + $0x5c8] sm:$0xff] }
 0x581   :  { %2957 = vmatprep.subr.bf16.mxu1 %v2433_v61  ;;  %v2104_v61 = vld [vmem:[#allocation11 + $0x130] sm:$0xff]  ;;  %v2664_v24 = vunpack.c.h.s8.bf16 %v2251_v44 }
 0x583   :  { %2917 = vmatpush1.bf16.msra.mxu0 %v2320_v6  ;;  %v2488_v6 = vunpack.c.l.s8.bf16 %v2166_v32 }
 0x584   :  { %2958 = vmatpush1.bf16.msra.mxu1 %v2432_v12  ;;  %2918 = vmatprep.subr.bf16.mxu0 %v2314_v29  ;;  %v2370_v12 = vunpack.c.h.s8.bf16 %v2104_v61  ;;  %v2103_v29 = vld [vmem:[#allocation11 + $0x128] sm:$0xff] }
 0x585   :  { %2959 = vmatprep.subr.bf16.mxu1 %v2426_v28  ;;  %v2159_v28 = vld [vmem:[#allocation11 + $0x2e8] sm:$0xff]  ;;  %v2369_v35 = vunpack.c.h.s8.bf16 %v2103_v29  ;;  %v2362_v59 = vunpack.c.l.s8.bf16 %v2103_v29 }
 0x587   :  { %2919 = vmatpush1.bf16.msra.mxu0 %v2313_v36  ;;  %v2481_v36 = vunpack.c.h.s8.bf16 %v2159_v28 }
 0x588   :  { %2960 = vmatpush1.bf16.msra.mxu1 %v2425_v63  ;;  %2920 = vmatprep.subr.bf16.mxu0 %v2307_v38  ;;  %v2363_v63 = vunpack.c.l.s8.bf16 %v2104_v61  ;;  %v2475_v38 = vunpack.c.l.s8.bf16 %v2160_v45  ;;  %v2244_v61 = vld [vmem:[#allocation11 + $0x590] sm:$0xff] }
 0x589   :  { %2961 = vmatprep.subr.bf16.mxu1 %v2419_v49  ;;  %v2097_v49 = vld [vmem:[#allocation11 + $0xf8] sm:$0xff]  ;;  %v2650_v29 = vunpack.c.h.s8.bf16 %v2244_v61 }
 0x58b   :  { %2921 = vmatpush1.bf16.msra.mxu0 %v2306_v20  ;;  %v2474_v20 = vunpack.c.l.s8.bf16 %v2159_v28 }
 0x58c   :  { %2962 = vmatpush1.bf16.msra.mxu1 %v2418_v31  ;;  %2922 = vmatprep.subr.bf16.mxu0 %v2300_v30  ;;  %v2356_v31 = vunpack.c.h.s8.bf16 %v2097_v49  ;;  %v2096_v30 = vld [vmem:[#allocation11 + $0xf0] sm:$0xff] }
 0x58d   :  { %2963 = vmatprep.subr.bf16.mxu1 %v2412_v4  ;;  %v2152_v4 = vld [vmem:[#allocation11 + $0x2b0] sm:$0xff]  ;;  %v2355_v34 = vunpack.c.h.s8.bf16 %v2096_v30  ;;  %v2348_v51 = vunpack.c.l.s8.bf16 %v2096_v30 }
 0x58f   :  { %2923 = vmatpush1.bf16.msra.mxu0 %v2299_v14  ;;  %v2467_v14 = vunpack.c.h.s8.bf16 %v2152_v4 }
 0x590   :  { %2964 = vmatpush1.bf16.msra.mxu1 %v2411_v37  ;;  %2924 = vmatprep.subr.bf16.mxu0 %v2293_v3  ;;  %v2349_v37 = vunpack.c.l.s8.bf16 %v2097_v49  ;;  %v2461_v3 = vunpack.c.l.s8.bf16 %v2153_v39  ;;  %v2237_v49 = vld [vmem:[#allocation11 + $0x558] sm:$0xff] }
 0x591   :  { %2965 = vmatprep.subr.bf16.mxu1 %v2405_v40  ;;  %v2202_v40 = vld [vmem:[#allocation11 + $0x440] sm:$0xff]  ;;  %v2636_v30 = vunpack.c.h.s8.bf16 %v2237_v49 }
 0x593   :  { %2925 = vmatpush1.bf16.msra.mxu0 %v2292_v52  ;;  %v2460_v52 = vunpack.c.l.s8.bf16 %v2152_v4 }
 0x594   :  { %2966 = vmatpush1.bf16.msra.mxu1 %v2404_v47  ;;  %2926 = vmatprep.subr.bf16.mxu0 %v2398_v50  ;;  %v2566_v47 = vunpack.c.h.s8.bf16 %v2202_v40  ;;  %v2201_v50 = vld [vmem:[#allocation11 + $0x438] sm:$0xff] }
 0x595   :  { %2967 = vmatprep.subr.bf16.mxu1 %v2510_v21  ;;  %v2257_v21 = vld [vmem:[#allocation11 + $0x5f8] sm:$0xff]  ;;  %v2565_v62 = vunpack.c.h.s8.bf16 %v2201_v50  ;;  %v2558_v26 = vunpack.c.l.s8.bf16 %v2201_v50 }
 0x597   :  { %2927 = vmatpush2.bf16.msra.mxu0 %v2397_v33  ;;  %v2677_v33 = vunpack.c.h.s8.bf16 %v2257_v21 }
 0x598   :  { %2968 = vmatpush2.bf16.msra.mxu1 %v2509_v1  ;;  %2928 = vmatprep.subr.bf16.mxu0 %v2391_v17  ;;  %v2559_v1 = vunpack.c.l.s8.bf16 %v2202_v40  ;;  %v2195_v17 = vld [vmem:[#allocation11 + $0x408] sm:$0xff]  ;;  %v2286_v40 = vld [vmem:[#allocation11 + $0x6e0] sm:$0xff] }
 0x599   :  { %2969 = vmatprep.subr.bf16.mxu1 %v2503_v18  ;;  %v2671_v18 = vunpack.c.l.s8.bf16 %v2258_v46  ;;  %v2734_v50 = vunpack.c.h.s8.bf16 %v2286_v40 }
 0x59b   :  { %2929 = vmatpush2.bf16.msra.mxu0 %v2390_v48  ;;  %v2670_v48 = vunpack.c.l.s8.bf16 %v2257_v21 }
 0x59c   :  { %2970 = vmatpush2.bf16.msra.mxu1 %v2502_v41  ;;  %2930 = vmatprep.subr.bf16.mxu0 %v2384_v22  ;;  %v2552_v41 = vunpack.c.h.s8.bf16 %v2195_v17  ;;  %v2194_v22 = vld [vmem:[#allocation11 + $0x400] sm:$0xff] }
 0x59d   :  { %2971 = vmatprep.subr.bf16.mxu1 %v2496_v42  ;;  %v2250_v42 = vld [vmem:[#allocation11 + $0x5c0] sm:$0xff]  ;;  %v2551_v32 = vunpack.c.h.s8.bf16 %v2194_v22  ;;  %v2544_v45 = vunpack.c.l.s8.bf16 %v2194_v22 }
 0x59f   :  { %2931 = vmatpush2.bf16.msra.mxu0 %v2383_v10  ;;  %v2663_v10 = vunpack.c.h.s8.bf16 %v2250_v42 }
 0x5a0   :  { %2972 = vmatpush2.bf16.msra.mxu1 %v2495_v25  ;;  %2932 = vmatprep.subr.bf16.mxu0 %v2377_v19  ;;  %v2545_v25 = vunpack.c.l.s8.bf16 %v2195_v17  ;;  %v2657_v19 = vunpack.c.l.s8.bf16 %v2251_v44  ;;  %v2223_v17 = vld [vmem:[#allocation11 + $0x4e8] sm:$0xff] }
 0x5a1   :  { %2973 = vmatprep.subr.bf16.mxu1 %v2489_v53  ;;  %v2188_v53 = vld [vmem:[#allocation11 + $0x3d0] sm:$0xff] }
 0x5a3   :  { %2933 = vmatpush2.bf16.msra.mxu0 %v2376_v54  ;;  %v2656_v54 = vunpack.c.l.s8.bf16 %v2250_v42 }
 0x5a4   :  { %2974 = vmatpush2.bf16.msra.mxu1 %v2488_v6  ;;  %2934 = vmatprep.subr.bf16.mxu0 %v2370_v12  ;;  %v2538_v6 = vunpack.c.h.s8.bf16 %v2188_v53  ;;  %v2187_v12 = vld [vmem:[#allocation11 + $0x3c8] sm:$0xff] }
 0x5a5   :  { %2975 = vmatprep.subr.bf16.mxu1 %v2482_v15  ;;  %v2243_v15 = vld [vmem:[#allocation11 + $0x588] sm:$0xff]  ;;  %v2537_v28 = vunpack.c.h.s8.bf16 %v2187_v12  ;;  %v2530_v39 = vunpack.c.l.s8.bf16 %v2187_v12 }
 0x5a7   :  { %2935 = vmatpush2.bf16.msra.mxu0 %v2369_v35  ;;  %v2649_v35 = vunpack.c.h.s8.bf16 %v2243_v15 }
 0x5a8   :  { %2976 = vmatpush2.bf16.msra.mxu1 %v2481_v36  ;;  %2936 = vmatprep.subr.bf16.mxu0 %v2363_v63  ;;  %v2531_v36 = vunpack.c.l.s8.bf16 %v2188_v53  ;;  %v2643_v63 = vunpack.c.l.s8.bf16 %v2244_v61  ;;  %v2272_v53 = vld [vmem:[#allocation11 + $0x670] sm:$0xff] }
 0x5a9   :  { %2977 = vmatprep.subr.bf16.mxu1 %v2475_v38  ;;  %v2181_v38 = vld [vmem:[#allocation11 + $0x398] sm:$0xff]  ;;  %v2706_v12 = vunpack.c.h.s8.bf16 %v2272_v53 }
 0x5ab   :  { %2937 = vmatpush2.bf16.msra.mxu0 %v2362_v59  ;;  %v2642_v59 = vunpack.c.l.s8.bf16 %v2243_v15 }
 0x5ac   :  { %2978 = vmatpush2.bf16.msra.mxu1 %v2474_v20  ;;  %2938 = vmatprep.subr.bf16.mxu0 %v2356_v31  ;;  %v2524_v20 = vunpack.c.h.s8.bf16 %v2181_v38  ;;  %v2180_v31 = vld [vmem:[#allocation11 + $0x390] sm:$0xff] }
 0x5ad   :  { %2979 = vmatprep.subr.bf16.mxu1 %v2468_v27  ;;  %v2236_v27 = vld [vmem:[#allocation11 + $0x550] sm:$0xff]  ;;  %v2523_v4 = vunpack.c.h.s8.bf16 %v2180_v31  ;;  %v2516_v46 = vunpack.c.l.s8.bf16 %v2180_v31 }
 0x5af   :  { %2939 = vmatpush2.bf16.msra.mxu0 %v2355_v34  ;;  %v2635_v34 = vunpack.c.h.s8.bf16 %v2236_v27 }
 0x5b0   :  { %2980 = vmatpush2.bf16.msra.mxu1 %v2467_v14  ;;  %2940 = vmatprep.subr.bf16.mxu0 %v2349_v37  ;;  %v2517_v14 = vunpack.c.l.s8.bf16 %v2181_v38  ;;  %v2629_v37 = vunpack.c.l.s8.bf16 %v2237_v49  ;;  %v2265_v38 = vld [vmem:[#allocation11 + $0x638] sm:$0xff] }
 0x5b1   :  { %2981 = vmatprep.subr.bf16.mxu1 %v2461_v3  ;;  %v2230_v3 = vld [vmem:[#allocation11 + $0x520] sm:$0xff]  ;;  %v2692_v31 = vunpack.c.h.s8.bf16 %v2265_v38 }
 0x5b3   :  { %2941 = vmatpush2.bf16.msra.mxu0 %v2348_v51  ;;  %v2628_v51 = vunpack.c.l.s8.bf16 %v2236_v27 }
 0x5b4   :  { %2982 = vmatpush2.bf16.msra.mxu1 %v2460_v52  ;;  %2992 = vmatprep.subr.bf16.mxu0 %v2566_v47  ;;  %v2622_v52 = vunpack.c.h.s8.bf16 %v2230_v3  ;;  %v2229_v47 = vld [vmem:[#allocation11 + $0x518] sm:$0xff] }
 0x5b5   :  { %3033 = vmatprep.subr.bf16.mxu1 %v2678_v58  ;;  %v2285_v58 = vld [vmem:[#allocation11 + $0x6d8] sm:$0xff]  ;;  %v2621_v21 = vunpack.c.h.s8.bf16 %v2229_v47  ;;  %v2614_v44 = vunpack.c.l.s8.bf16 %v2229_v47 }
 0x5b6   :  { %2943 = vmatmul.mubr.bf16.vlgmr.msra.gmra.mxu0 %v4311_v11 }
 0x5b7   :  { %2984 = vmatmul.mubr.bf16.vlgmr.msra.gmra.mxu1 %v4313_v13  ;;  %2993 = vmatpush1.bf16.msra.mxu0 %v2565_v62  ;;  %v2733_v62 = vunpack.c.h.s8.bf16 %v2285_v58 }
 0x5b8   :  { %3024 = vmatprep.mubr.bf16.mxu0 %v4321_v9  ;;  %3034 = vmatpush1.bf16.msra.mxu1 %v2677_v33  ;;  %v2615_v33 = vunpack.c.l.s8.bf16 %v2230_v3  ;;  %v2148_v3 = vld [vmem:[#allocation11 + $0x290] sm:$0xff] }
 0x5b9   :  { %3065 = vmatprep.mubr.bf16.mxu1 %v4323_v43  ;;  %2994 = vmatprep.subr.bf16.mxu0 %v2559_v1  ;;  %v2727_v1 = vunpack.c.l.s8.bf16 %v2286_v40  ;;  %v2456_v47 = vunpack.c.h.s8.bf16 %v2148_v3 }
 0x5ba   :  { %3035 = vmatprep.subr.bf16.mxu1 %v2671_v18  ;;  %v2279_v18 = vld [vmem:[#allocation11 + $0x6a8] sm:$0xff] }
 0x5bb   :  { %2995 = vmatpush1.bf16.msra.mxu0 %v2558_v26  ;;  %v2726_v26 = vunpack.c.l.s8.bf16 %v2285_v58  ;;  %v2720_v22 = vunpack.c.h.s8.bf16 %v2279_v18 }
 0x5bc   :  { %3036 = vmatpush1.bf16.msra.mxu1 %v2670_v48  ;;  %2996 = vmatprep.subr.bf16.mxu0 %v2552_v41  ;;  %v2608_v48 = vunpack.c.h.s8.bf16 %v2223_v17  ;;  %v2222_v41 = vld [vmem:[#allocation11 + $0x4e0] sm:$0xff] }
 0x5bd   :  { %3037 = vmatprep.subr.bf16.mxu1 %v2664_v24  ;;  %v2278_v24 = vld [vmem:[#allocation11 + $0x6a0] sm:$0xff]  ;;  %v2607_v42 = vunpack.c.h.s8.bf16 %v2222_v41  ;;  %v2600_v61 = vunpack.c.l.s8.bf16 %v2222_v41 }
 0x5bf   :  { %2997 = vmatpush1.bf16.msra.mxu0 %v2551_v32  ;;  %v2719_v32 = vunpack.c.h.s8.bf16 %v2278_v24 }
 0x5c0   :  { %3038 = vmatpush1.bf16.msra.mxu1 %v2663_v10  ;;  %2998 = vmatprep.subr.bf16.mxu0 %v2545_v25  ;;  %v2601_v10 = vunpack.c.l.s8.bf16 %v2223_v17  ;;  %v2713_v25 = vunpack.c.l.s8.bf16 %v2279_v18  ;;  %v2449_v18 = vunpack.c.l.s8.bf16 %v2148_v3 }
 0x5c1   :  { %3039 = vmatprep.subr.bf16.mxu1 %v2657_v19  ;;  %v2216_v19 = vld [vmem:[#allocation11 + $0x4b0] sm:$0xff] }
 0x5c3   :  { %2999 = vmatpush1.bf16.msra.mxu0 %v2544_v45  ;;  %v2712_v45 = vunpack.c.l.s8.bf16 %v2278_v24 }
 0x5c4   :  { %3040 = vmatpush1.bf16.msra.mxu1 %v2656_v54  ;;  %3000 = vmatprep.subr.bf16.mxu0 %v2538_v6  ;;  %v2594_v54 = vunpack.c.h.s8.bf16 %v2216_v19  ;;  %v2215_v6 = vld [vmem:[#allocation11 + $0x4a8] sm:$0xff] }
 0x5c5   :  { %3041 = vmatprep.subr.bf16.mxu1 %v2650_v29  ;;  %v2271_v29 = vld [vmem:[#allocation11 + $0x668] sm:$0xff]  ;;  %v2593_v15 = vunpack.c.h.s8.bf16 %v2215_v6  ;;  %v2586_v49 = vunpack.c.l.s8.bf16 %v2215_v6 }
 0x5c7   :  { %3001 = vmatpush1.bf16.msra.mxu0 %v2537_v28  ;;  %v2705_v28 = vunpack.c.h.s8.bf16 %v2271_v29 }
 0x5c8   :  { %3042 = vmatpush1.bf16.msra.mxu1 %v2649_v35  ;;  %3002 = vmatprep.subr.bf16.mxu0 %v2531_v36  ;;  %v2587_v35 = vunpack.c.l.s8.bf16 %v2216_v19  ;;  %v2699_v36 = vunpack.c.l.s8.bf16 %v2272_v53 }
 0x5c9   :  { %3043 = vmatprep.subr.bf16.mxu1 %v2643_v63  ;;  %v2209_v63 = vld [vmem:[#allocation11 + $0x478] sm:$0xff] }
 0x5cb   :  { %3003 = vmatpush1.bf16.msra.mxu0 %v2530_v39  ;;  %v2698_v39 = vunpack.c.l.s8.bf16 %v2271_v29  ;;  %v2078_v29 = vld [vmem:[#allocation11 + $0x60] sm:$0xff] }
 0x5cc   :  { %3044 = vmatpush1.bf16.msra.mxu1 %v2642_v59  ;;  %3004 = vmatprep.subr.bf16.mxu0 %v2524_v20  ;;  %v2580_v59 = vunpack.c.h.s8.bf16 %v2209_v63  ;;  %v2208_v20 = vld [vmem:[#allocation11 + $0x470] sm:$0xff] }
 0x5cd   :  { %3045 = vmatprep.subr.bf16.mxu1 %v2636_v30  ;;  %v2264_v30 = vld [vmem:[#allocation11 + $0x630] sm:$0xff]  ;;  %v2579_v27 = vunpack.c.h.s8.bf16 %v2208_v20  ;;  %v2572_v40 = vunpack.c.l.s8.bf16 %v2208_v20  ;;  %v2309_v20 = vunpack.c.l.s8.bf16 %v2078_v29 }
 0x5cf   :  { %3005 = vmatpush1.bf16.msra.mxu0 %v2523_v4  ;;  %v2691_v4 = vunpack.c.h.s8.bf16 %v2264_v30 }
 0x5d0   :  { %3046 = vmatpush1.bf16.msra.mxu1 %v2635_v34  ;;  %3006 = vmatprep.subr.bf16.mxu0 %v2517_v14  ;;  %v2573_v34 = vunpack.c.l.s8.bf16 %v2209_v63  ;;  %v2685_v14 = vunpack.c.l.s8.bf16 %v2265_v38  ;;  %v2077_v63 = vld [vmem:[#allocation11 + $0x58] sm:$0xff] }
 0x5d1   :  { %3047 = vmatprep.subr.bf16.mxu1 %v2629_v37  ;;  %v2092_v37 = vld [vmem:[#allocation11 + $0xd0] sm:$0xff] }
 0x5d3   :  { %3007 = vmatpush1.bf16.msra.mxu0 %v2516_v46  ;;  %v2684_v46 = vunpack.c.l.s8.bf16 %v2264_v30  ;;  %v2071_v30 = vld [vmem:[#allocation11 + $0x28] sm:$0xff] }
 0x5d4   :  { %3048 = vmatpush1.bf16.msra.mxu1 %v2628_v51  ;;  %3008 = vmatprep.subr.bf16.mxu0 %v2622_v52  ;;  %v2344_v51 = vunpack.c.h.s8.bf16 %v2092_v37  ;;  %v2091_v52 = vld [vmem:[#allocation11 + $0xc8] sm:$0xff] }
 0x5d5   :  { %3049 = vmatprep.subr.bf16.mxu1 %v2734_v50  ;;  %v2147_v50 = vld [vmem:[#allocation11 + $0x288] sm:$0xff]  ;;  %v2343_v58 = vunpack.c.h.s8.bf16 %v2091_v52 }
 0x5d7   :  { %3009 = vmatpush2.bf16.msra.mxu0 %v2621_v21  ;;  %v2455_v21 = vunpack.c.h.s8.bf16 %v2147_v50 }
 0x5d8   :  { %3050 = vmatpush2.bf16.msra.mxu1 %v2733_v62  ;;  %3010 = vmatprep.subr.bf16.mxu0 %v2615_v33  ;;  %v2337_v62 = vunpack.c.l.s8.bf16 %v2092_v37  ;;  %v2085_v33 = vld [vmem:[#allocation11 + $0x98] sm:$0xff]  ;;  %v2070_v37 = vld [vmem:[#allocation11 + $0x20] sm:$0xff] }
 0x5d9   :  { %3051 = vmatprep.subr.bf16.mxu1 %v2727_v1  ;;  %v2330_v24 = vunpack.c.h.s8.bf16 %v2085_v33  ;;  %v2323_v6 = vunpack.c.l.s8.bf16 %v2085_v33 }
 0x5db   :  { %3011 = vmatpush2.bf16.msra.mxu0 %v2614_v44  ;;  %v2141_v44 = vld [vmem:[#allocation11 + $0x258] sm:$0xff] }
 0x5dc   :  { %3052 = vmatpush2.bf16.msra.mxu1 %v2726_v26  ;;  %3012 = vmatprep.subr.bf16.mxu0 %v2608_v48  ;;  %v2336_v26 = vunpack.c.l.s8.bf16 %v2091_v52  ;;  %v2295_v52 = vunpack.c.l.s8.bf16 %v2071_v30 }
 0x5dd   :  { %3053 = vmatprep.subr.bf16.mxu1 %v2720_v22  ;;  %v2448_v22 = vunpack.c.l.s8.bf16 %v2147_v50  ;;  %v2120_v50 = vld [vmem:[#allocation11 + $0x1b0] sm:$0xff] }
 0x5de   :  { %v2400_v33 = vunpack.c.h.s8.bf16 %v2120_v50 }
 0x5df   :  { %3013 = vmatpush2.bf16.msra.mxu0 %v2607_v42  ;;  %v2084_v42 = vld [vmem:[#allocation11 + $0x90] sm:$0xff] }
 0x5e0   :  { %3054 = vmatpush2.bf16.msra.mxu1 %v2719_v32  ;;  %3014 = vmatprep.subr.bf16.mxu0 %v2601_v10  ;;  %v2442_v32 = vunpack.c.h.s8.bf16 %v2141_v44  ;;  %v2140_v10 = vld [vmem:[#allocation11 + $0x250] sm:$0xff]  ;;  %v2329_v53 = vunpack.c.h.s8.bf16 %v2084_v42 }
 0x5e1   :  { %3055 = vmatprep.subr.bf16.mxu1 %v2713_v25 }
 0x5e3   :  { %3015 = vmatpush2.bf16.msra.mxu0 %v2600_v61 }
 0x5e4   :  { %3056 = vmatpush2.bf16.msra.mxu1 %v2712_v45  ;;  %3016 = vmatprep.subr.bf16.mxu0 %v2594_v54  ;;  %v2441_v54 = vunpack.c.h.s8.bf16 %v2140_v10 }
 0x5e5   :  { %3057 = vmatprep.subr.bf16.mxu1 %v2706_v12  ;;  %v2435_v12 = vunpack.c.l.s8.bf16 %v2141_v44 }
 0x5e7   :  { %3017 = vmatpush2.bf16.msra.mxu0 %v2593_v15  ;;  %v2134_v15 = vld [vmem:[#allocation11 + $0x220] sm:$0xff] }
 0x5e8   :  { %3058 = vmatpush2.bf16.msra.mxu1 %v2705_v28  ;;  %3018 = vmatprep.subr.bf16.mxu0 %v2587_v35  ;;  %v2322_v28 = vunpack.c.l.s8.bf16 %v2084_v42  ;;  %v2434_v35 = vunpack.c.l.s8.bf16 %v2140_v10  ;;  %v2428_v38 = vunpack.c.h.s8.bf16 %v2134_v15  ;;  %v2393_v42 = vunpack.c.l.s8.bf16 %v2120_v50  ;;  %v2113_v10 = vld [vmem:[#allocation11 + $0x178] sm:$0xff] }
 0x5e9   :  { %3059 = vmatprep.subr.bf16.mxu1 %v2699_v36  ;;  %v2316_v36 = vunpack.c.h.s8.bf16 %v2078_v29 }
 0x5eb   :  { %3019 = vmatpush2.bf16.msra.mxu0 %v2586_v49  ;;  %v2133_v49 = vld [vmem:[#allocation11 + $0x218] sm:$0xff] }
 0x5ec   :  { %3060 = vmatpush2.bf16.msra.mxu1 %v2698_v39  ;;  %3020 = vmatprep.subr.bf16.mxu0 %v2580_v59  ;;  %v2315_v39 = vunpack.c.h.s8.bf16 %v2077_v63  ;;  %v2427_v59 = vunpack.c.h.s8.bf16 %v2133_v49 }
 0x5ed   :  { %3061 = vmatprep.subr.bf16.mxu1 %v2692_v31  ;;  %v2421_v31 = vunpack.c.l.s8.bf16 %v2134_v15  ;;  %v2379_v15 = vunpack.c.l.s8.bf16 %v2113_v10 }
 0x5ef   :  { %3021 = vmatpush2.bf16.msra.mxu0 %v2579_v27  ;;  %v2127_v27 = vld [vmem:[#allocation11 + $0x1e8] sm:$0xff] }
 0x5f0   :  { %3062 = vmatpush2.bf16.msra.mxu1 %v2691_v4  ;;  %3022 = vmatprep.subr.bf16.mxu0 %v2573_v34  ;;  %v2308_v4 = vunpack.c.l.s8.bf16 %v2077_v63  ;;  %v2420_v34 = vunpack.c.l.s8.bf16 %v2133_v49  ;;  %v2414_v3 = vunpack.c.h.s8.bf16 %v2127_v27 }
 0x5f1   :  { %3063 = vmatprep.subr.bf16.mxu1 %v2685_v14  ;;  %v2302_v14 = vunpack.c.h.s8.bf16 %v2071_v30 }
 0x5f3   :  { %3023 = vmatpush2.bf16.msra.mxu0 %v2572_v40  ;;  %v2126_v40 = vld [vmem:[#allocation11 + $0x1e0] sm:$0xff] }
 0x5f4   :  { %3064 = vmatpush2.bf16.msra.mxu1 %v2684_v46  ;;  %3074 = vmatprep.subr.bf16.mxu0 %v2344_v51  ;;  %v2301_v46 = vunpack.c.h.s8.bf16 %v2070_v37  ;;  %v2413_v51 = vunpack.c.h.s8.bf16 %v2126_v40 }
 0x5f5   :  { %3115 = vmatprep.subr.bf16.mxu1 %v2456_v47  ;;  %v2407_v47 = vunpack.c.l.s8.bf16 %v2127_v27 }
 0x5f6   :  { %3025 = vmatmul.mubr.bf16.vlgmr.msra.gmra.mxu0 %v4329_v5  ;;  %v4342_v1 = vpop.f32.mrf.mxu0  ;;  %v4344_v17 = vpop.f32.mrf.mxu1 }
 0x5f7   :  { %3066 = vmatmul.mubr.bf16.vlgmr.msra.gmra.mxu1 %v4331_v16  ;;  %3075 = vmatpush1.bf16.msra.mxu0 %v2343_v58  ;;  %v2176_v58 = vld [vmem:[#allocation11 + $0x370] sm:$0xff] }
 0x5f8   :  { %3106 = vmatprep.mubr.bf16.mxu0 %v4307_v8  ;;  %3116 = vmatpush1.bf16.msra.mxu1 %v2455_v21  ;;  %v4348_v48 = vpop.f32.mrf.mxu0  ;;  %v4350_v41 = vpop.f32.mrf.mxu1  ;;  %v2294_v21 = vunpack.c.l.s8.bf16 %v2070_v37  ;;  %v2512_v44 = vunpack.c.h.s8.bf16 %v2176_v58 }
 0x5f9   :  { %3147 = vmatprep.mubr.bf16.mxu1 %v4309_v56  ;;  %3076 = vmatprep.subr.bf16.mxu0 %v2337_v62  ;;  %v2406_v62 = vunpack.c.l.s8.bf16 %v2126_v40 }
 0x5fa   :  { %3117 = vmatprep.subr.bf16.mxu1 %v2449_v18  ;;  %v2784_v25 = vpop.f32.mrf.mxu0  ;;  %v2825_v19 = vpop.f32.mrf.mxu1  ;;  %v2119_v18 = vld [vmem:[#allocation11 + $0x1a8] sm:$0xff] }
 0x5fb   :  { %3077 = vmatpush1.bf16.msra.mxu0 %v2336_v26  ;;  %v2175_v26 = vld [vmem:[#allocation11 + $0x368] sm:$0xff]  ;;  %v2169_v25 = vld [vmem:[#allocation11 + $0x338] sm:$0xff]  ;;  %v2392_v19 = vunpack.c.l.s8.bf16 %v2119_v18 }
 0x5fc   :  { %3118 = vmatpush1.bf16.msra.mxu1 %v2448_v22  ;;  %v2785_v61 = vpop.f32.mrf.mxu0  ;;  %v2826_v45 = vpop.f32.mrf.mxu1  ;;  %3078 = vmatprep.subr.bf16.mxu0 %v2330_v24  ;;  %v2399_v22 = vunpack.c.h.s8.bf16 %v2119_v18  ;;  %v2511_v24 = vunpack.c.h.s8.bf16 %v2175_v26 }
 0x5fd   :  { %3119 = vmatprep.subr.bf16.mxu1 %v2442_v32  ;;  %v2505_v32 = vunpack.c.l.s8.bf16 %v2176_v58  ;;  %v2386_v61 = vunpack.c.h.s8.bf16 %v2113_v10  ;;  %v2112_v45 = vld [vmem:[#allocation11 + $0x170] sm:$0xff]  ;;  %v4353_v10 = vld [vmem:[#allocation13 + $0x3e] sm:$0xff] }
 0x5fe   :  { %v2378_v63 = vunpack.c.l.s8.bf16 %v2112_v45 }
 0x5ff   :  { %3079 = vmatpush1.bf16.msra.mxu0 %v2329_v53  ;;  %v2504_v53 = vunpack.c.l.s8.bf16 %v2175_v26 }
 0x600   :  { %3120 = vmatpush1.bf16.msra.mxu1 %v2441_v54  ;;  %3080 = vmatprep.subr.bf16.mxu0 %v2323_v6  ;;  %v2498_v54 = vunpack.c.h.s8.bf16 %v2169_v25  ;;  %v2168_v6 = vld [vmem:[#allocation11 + $0x330] sm:$0xff] }
 0x601   :  { %3121 = vmatprep.subr.bf16.mxu1 %v2435_v12  ;;  %v2385_v12 = vunpack.c.h.s8.bf16 %v2112_v45  ;;  %v2497_v29 = vunpack.c.h.s8.bf16 %v2168_v6  ;;  %v2197_v45 = vld [vmem:[#allocation11 + $0x418] sm:$0xff] }
 0x603   :  { %3081 = vmatpush1.bf16.msra.mxu0 %v2322_v28  ;;  %v2491_v28 = vunpack.c.l.s8.bf16 %v2169_v25 }
 0x604   :  { %3122 = vmatpush1.bf16.msra.mxu1 %v2434_v35  ;;  %3082 = vmatprep.subr.bf16.mxu0 %v2316_v36  ;;  %v2106_v35 = vld [vmem:[#allocation11 + $0x140] sm:$0xff] }
 0x605   :  { %3123 = vmatprep.subr.bf16.mxu1 %v2428_v38  ;;  %v2162_v36 = vld [vmem:[#allocation11 + $0x300] sm:$0xff]  ;;  %v2490_v38 = vunpack.c.l.s8.bf16 %v2168_v6  ;;  %v2372_v49 = vunpack.c.h.s8.bf16 %v2106_v35  ;;  %v2365_v27 = vunpack.c.l.s8.bf16 %v2106_v35  ;;  %v3402_v35 = vrot.slane %v4353_v10, %v4003_v0 }
 0x607   :  { %3083 = vmatpush1.bf16.msra.mxu0 %v2315_v39  ;;  %v2105_v39 = vld [vmem:[#allocation11 + $0x138] sm:$0xff] }
 0x608   :  { %3124 = vmatpush1.bf16.msra.mxu1 %v2427_v59  ;;  %3084 = vmatprep.subr.bf16.mxu0 %v2309_v20  ;;  %v2484_v59 = vunpack.c.h.s8.bf16 %v2162_v36  ;;  %v2161_v20 = vld [vmem:[#allocation11 + $0x2f8] sm:$0xff]  ;;  %v2364_v37 = vunpack.c.l.s8.bf16 %v2105_v39 }
 0x609   :  { %3125 = vmatprep.subr.bf16.mxu1 %v2421_v31  ;;  %v2371_v31 = vunpack.c.h.s8.bf16 %v2105_v39  ;;  %v2483_v30 = vunpack.c.h.s8.bf16 %v2161_v20  ;;  %v2196_v39 = vld [vmem:[#allocation11 + $0x410] sm:$0xff] }
 0x60b   :  { %3085 = vmatpush1.bf16.msra.mxu0 %v2308_v4  ;;  %v2477_v4 = vunpack.c.l.s8.bf16 %v2162_v36 }
 0x60c   :  { %3126 = vmatpush1.bf16.msra.mxu1 %v2420_v34  ;;  %3086 = vmatprep.subr.bf16.mxu0 %v2302_v14  ;;  %v2099_v34 = vld [vmem:[#allocation11 + $0x108] sm:$0xff] }
 0x60d   :  { %3127 = vmatprep.subr.bf16.mxu1 %v2414_v3  ;;  %v2155_v14 = vld [vmem:[#allocation11 + $0x2c8] sm:$0xff]  ;;  %v2476_v3 = vunpack.c.l.s8.bf16 %v2161_v20  ;;  %v2358_v40 = vunpack.c.h.s8.bf16 %v2099_v34  ;;  %v2351_v58 = vunpack.c.l.s8.bf16 %v2099_v34 }
 0x60f   :  { %3087 = vmatpush1.bf16.msra.mxu0 %v2301_v46  ;;  %v2098_v46 = vld [vmem:[#allocation11 + $0x100] sm:$0xff] }
 0x610   :  { %3128 = vmatpush1.bf16.msra.mxu1 %v2413_v51  ;;  %3088 = vmatprep.subr.bf16.mxu0 %v2295_v52  ;;  %v2470_v51 = vunpack.c.h.s8.bf16 %v2155_v14  ;;  %v2154_v52 = vld [vmem:[#allocation11 + $0x2c0] sm:$0xff]  ;;  %v2350_v18 = vunpack.c.l.s8.bf16 %v2098_v46 }
 0x611   :  { %3129 = vmatprep.subr.bf16.mxu1 %v2407_v47  ;;  %v2357_v47 = vunpack.c.h.s8.bf16 %v2098_v46  ;;  %v2469_v50 = vunpack.c.h.s8.bf16 %v2154_v52  ;;  %v2547_v46 = vunpack.c.l.s8.bf16 %v2197_v45 }
 0x613   :  { %3089 = vmatpush1.bf16.msra.mxu0 %v2294_v21  ;;  %v2463_v21 = vunpack.c.l.s8.bf16 %v2155_v14  ;;  %v2553_v14 = vunpack.c.h.s8.bf16 %v2196_v39 }
 0x614   :  { %3130 = vmatpush1.bf16.msra.mxu1 %v2406_v62  ;;  %3090 = vmatprep.subr.bf16.mxu0 %v2400_v33  ;;  %v2204_v62 = vld [vmem:[#allocation11 + $0x450] sm:$0xff] }
 0x615   :  { %3131 = vmatprep.subr.bf16.mxu1 %v2512_v44  ;;  %v2260_v33 = vld [vmem:[#allocation11 + $0x610] sm:$0xff]  ;;  %v2462_v44 = vunpack.c.l.s8.bf16 %v2154_v52  ;;  %v2568_v26 = vunpack.c.h.s8.bf16 %v2204_v62 }
 0x617   :  { %3091 = vmatpush2.bf16.msra.mxu0 %v2399_v22  ;;  %v2203_v22 = vld [vmem:[#allocation11 + $0x448] sm:$0xff] }
 0x618   :  { %3132 = vmatpush2.bf16.msra.mxu1 %v2511_v24  ;;  %3092 = vmatprep.subr.bf16.mxu0 %v2393_v42  ;;  %v2680_v24 = vunpack.c.h.s8.bf16 %v2260_v33  ;;  %v2259_v42 = vld [vmem:[#allocation11 + $0x608] sm:$0xff] }
 0x619   :  { %3133 = vmatprep.subr.bf16.mxu1 %v2505_v32  ;;  %v2567_v32 = vunpack.c.h.s8.bf16 %v2203_v22  ;;  %v2679_v25 = vunpack.c.h.s8.bf16 %v2259_v42 }
 0x61b   :  { %3093 = vmatpush2.bf16.msra.mxu0 %v2392_v19  ;;  %v2822_v19 = vadd.f32 %v4344_v17, %v4342_v1  ;;  %v2560_v1 = vunpack.c.l.s8.bf16 %v2203_v22 }
 0x61c   :  { %3134 = vmatpush2.bf16.msra.mxu1 %v2504_v53  ;;  %3094 = vmatprep.subr.bf16.mxu0 %v2386_v61  ;;  %v4357_v53 = vld [vmem:[#allocation13 + $0xf] sm:$0xff]  ;;  %v2561_v61 = vunpack.c.l.s8.bf16 %v2204_v62 }
 0x61d   :  { %3135 = vmatprep.subr.bf16.mxu1 %v2498_v54  ;;  %v3445_v17 = vrot.slane %v4357_v53, %v4003_v0  ;;  %v3449_v34 = vrot.slane %v4357_v53, %v4006_v2 }
 0x61f   :  { %3095 = vmatpush2.bf16.msra.mxu0 %v2385_v12  ;;  %v2673_v12 = vunpack.c.l.s8.bf16 %v2260_v33  ;;  %v2546_v33 = vunpack.c.l.s8.bf16 %v2196_v39 }
 0x620   :  { %3136 = vmatpush2.bf16.msra.mxu1 %v2497_v29  ;;  %3096 = vmatprep.subr.bf16.mxu0 %v2379_v15  ;;  %v2253_v29 = vld [vmem:[#allocation11 + $0x5d8] sm:$0xff]  ;;  %v2824_v15 = vadd.f32 %v4350_v41, %v4348_v48 }
 0x621   :  { %3137 = vmatprep.subr.bf16.mxu1 %v2491_v28  ;;  %v2666_v20 = vunpack.c.h.s8.bf16 %v2253_v29 }
 0x623   :  { %3097 = vmatpush2.bf16.msra.mxu0 %v2378_v63 }
 0x624   :  { %3138 = vmatpush2.bf16.msra.mxu1 %v2490_v38  ;;  %3098 = vmatprep.subr.bf16.mxu0 %v2372_v49  ;;  %v2672_v38 = vunpack.c.l.s8.bf16 %v2259_v42  ;;  %v2554_v49 = vunpack.c.h.s8.bf16 %v2197_v45  ;;  %v2239_v45 = vld [vmem:[#allocation11 + $0x568] sm:$0xff] }
 0x625   :  { %3139 = vmatprep.subr.bf16.mxu1 %v2484_v59  ;;  %v3406_v59 = vrot.slane %v4353_v10, %v4006_v2 }
 0x627   :  { %3099 = vmatpush2.bf16.msra.mxu0 %v2371_v31  ;;  %v2252_v31 = vld [vmem:[#allocation11 + $0x5d0] sm:$0xff] }
 0x628   :  { %3140 = vmatpush2.bf16.msra.mxu1 %v2483_v30  ;;  %3100 = vmatprep.subr.bf16.mxu0 %v2365_v27  ;;  %v2658_v2 = vunpack.c.l.s8.bf16 %v2252_v31 }
 0x629   :  { %3141 = vmatprep.subr.bf16.mxu1 %v2477_v4 }
 0x62b   :  { %3101 = vmatpush2.bf16.msra.mxu0 %v2364_v37 }
 0x62c   :  { %3142 = vmatpush2.bf16.msra.mxu1 %v2476_v3  ;;  %3102 = vmatprep.subr.bf16.mxu0 %v2358_v40  ;;  %v2665_v40 = vunpack.c.h.s8.bf16 %v2252_v31  ;;  %v2231_v31 = vld [vmem:[#allocation11 + $0x528] sm:$0xff] }
 0x62d   :  { %3143 = vmatprep.subr.bf16.mxu1 %v2470_v51 }
 0x62f   :  { %3103 = vmatpush2.bf16.msra.mxu0 %v2357_v47  ;;  %v2659_v47 = vunpack.c.l.s8.bf16 %v2253_v29  ;;  %v2182_v29 = vld [vmem:[#allocation11 + $0x3a0] sm:$0xff] }
 0x630   :  { %3144 = vmatpush2.bf16.msra.mxu1 %v2469_v50  ;;  %3104 = vmatprep.subr.bf16.mxu0 %v2351_v58  ;;  %v2190_v50 = vld [vmem:[#allocation11 + $0x3e0] sm:$0xff] }
 0x631   :  { %3145 = vmatprep.subr.bf16.mxu1 %v2463_v21  ;;  %v2246_v58 = vld [vmem:[#allocation11 + $0x5a0] sm:$0xff] }
 0x632   :  { %v2652_v22 = vunpack.c.h.s8.bf16 %v2246_v58 }
 0x633   :  { %3105 = vmatpush2.bf16.msra.mxu0 %v2350_v18  ;;  %v2540_v18 = vunpack.c.h.s8.bf16 %v2190_v50 }
 0x634   :  { %3146 = vmatpush2.bf16.msra.mxu1 %v2462_v44  ;;  %3156 = vmatprep.subr.bf16.mxu0 %v2568_v26  ;;  %v2189_v44 = vld [vmem:[#allocation11 + $0x3d8] sm:$0xff] }
 0x635   :  { %3197 = vmatprep.subr.bf16.mxu1 %v2680_v24  ;;  %v2245_v24 = vld [vmem:[#allocation11 + $0x598] sm:$0xff]  ;;  %v2539_v42 = vunpack.c.h.s8.bf16 %v2189_v44 }
 0x636   :  { %v2862_v54 = vpop.f32.mrf.mxu0  ;;  %v2903_v6 = vpop.f32.mrf.mxu1  ;;  %3107 = vmatmul.mubr.bf16.vlgmr.msra.gmra.mxu0 %v4311_v11 }
 0x637   :  { %v2863_v28 = vadd.f32 %v2862_v54, %v2822_v19  ;;  %3148 = vmatmul.mubr.bf16.vlgmr.msra.gmra.mxu1 %v4313_v13  ;;  %3157 = vmatpush1.bf16.msra.mxu0 %v2567_v32  ;;  %v2651_v32 = vunpack.c.h.s8.bf16 %v2245_v24  ;;  %v2645_v19 = vunpack.c.l.s8.bf16 %v2246_v58  ;;  %v2532_v54 = vunpack.c.l.s8.bf16 %v2189_v44  ;;  %v2224_v58 = vld [vmem:[#allocation11 + $0x4f0] sm:$0xff] }
 0x638   :  { %3188 = vmatprep.mubr.bf16.mxu0 %v4321_v9  ;;  %3198 = vmatpush1.bf16.msra.mxu1 %v2679_v25  ;;  %v2864_v36 = vpop.f32.mrf.mxu0  ;;  %v2905_v63 = vpop.f32.mrf.mxu1  ;;  %v2533_v25 = vunpack.c.l.s8.bf16 %v2190_v50 }
 0x639   :  { %v2904_v48 = vadd.f32 %v2903_v6, %v2863_v28  ;;  %3229 = vmatprep.mubr.bf16.mxu1 %v4323_v43  ;;  %v2865_v41 = vadd.f32 %v2864_v36, %v2824_v15  ;;  %3158 = vmatprep.subr.bf16.mxu0 %v2561_v61  ;;  %v2183_v61 = vld [vmem:[#allocation11 + $0x3a8] sm:$0xff]  ;;  %v2644_v6 = vunpack.c.l.s8.bf16 %v2245_v24  ;;  %v2638_v15 = vunpack.c.h.s8.bf16 %v2239_v45  ;;  %v2238_v28 = vld [vmem:[#allocation11 + $0x560] sm:$0xff] }
 0x63a   :  { %v2866_v30 = vpop.f32.mrf.mxu0  ;;  %v2907_v0 = vpop.f32.mrf.mxu1  ;;  %3199 = vmatprep.subr.bf16.mxu1 %v2673_v12  ;;  %v2526_v12 = vunpack.c.h.s8.bf16 %v2183_v61  ;;  %v2631_v36 = vunpack.c.l.s8.bf16 %v2239_v45  ;;  %v2602_v24 = vunpack.c.l.s8.bf16 %v2224_v58 }
 0x63b   :  { %v3434_v27 = vmul.f32 %v3402_v35, %v2904_v48  ;;  %v2906_v4 = vadd.f32 %v2905_v63, %v2865_v41  ;;  %3159 = vmatpush1.bf16.msra.mxu0 %v2560_v1  ;;  %v2525_v35 = vunpack.c.h.s8.bf16 %v2182_v29  ;;  %v2637_v1 = vunpack.c.h.s8.bf16 %v2238_v28  ;;  %v2232_v63 = vld [vmem:[#allocation11 + $0x530] sm:$0xff] }
 0x63c   :  { %3200 = vmatpush1.bf16.msra.mxu1 %v2672_v38  ;;  %v2867_v37 = vpop.f32.mrf.mxu0  ;;  %v2908_v3 = vpop.f32.mrf.mxu1  ;;  %3160 = vmatprep.subr.bf16.mxu0 %v2554_v49  ;;  %v2288_v49 = vld [vmem:[#allocation11 + $0x6f0] sm:$0xff]  ;;  %v2518_v48 = vunpack.c.l.s8.bf16 %v2182_v29  ;;  %v2211_v29 = vld [vmem:[#allocation11 + $0x488] sm:$0xff] }
 0x63d   :  { %v3477_v51 = vadd.f32 %v3445_v17, %v3434_v27  ;;  %v3435_v52 = vmul.f32 %v3406_v59, %v2906_v4  ;;  %3201 = vmatprep.subr.bf16.mxu1 %v2666_v20  ;;  %v2519_v17 = vunpack.c.l.s8.bf16 %v2183_v61  ;;  %v2630_v59 = vunpack.c.l.s8.bf16 %v2238_v28  ;;  %v2287_v4 = vld [vmem:[#allocation11 + $0x6e8] sm:$0xff]  ;;  %v2273_v61 = vld [vmem:[#allocation11 + $0x678] sm:$0xff] }
 0x63e   :  { %v2624_v20 = vunpack.c.h.s8.bf16 %v2232_v63  ;;  %v2736_v27 = vunpack.c.h.s8.bf16 %v2288_v49  ;;  %v2735_v37 = vunpack.c.h.s8.bf16 %v2287_v4  ;;  %v2617_v3 = vunpack.c.l.s8.bf16 %v2232_v63  ;;  %v2266_v63 = vld [vmem:[#allocation11 + $0x640] sm:$0xff] }
 0x63f   :  { %v3484_v21 = vmul.f32 0.5, %v3477_v51  ;;  %v3478_v62 = vadd.f32 %v3449_v34, %v3435_v52  ;;  %3161 = vmatpush1.bf16.msra.mxu0 %v2553_v14  ;;  %v2623_v14 = vunpack.c.h.s8.bf16 %v2231_v31  ;;  %v2281_v51 = vld [vmem:[#allocation11 + $0x6b8] sm:$0xff]  ;;  %v2616_v52 = vunpack.c.l.s8.bf16 %v2231_v31 }
 0x640   :  { %3202 = vmatpush1.bf16.msra.mxu1 %v2665_v40  ;;  %3162 = vmatprep.subr.bf16.mxu0 %v2547_v46  ;;  %v2729_v40 = vunpack.c.l.s8.bf16 %v2288_v49  ;;  %v2225_v46 = vld [vmem:[#allocation11 + $0x4f8] sm:$0xff]  ;;  %v2715_v44 = vunpack.c.l.s8.bf16 %v2281_v51  ;;  %v2693_v49 = vunpack.c.h.s8.bf16 %v2266_v63  ;;  %v2686_v31 = vunpack.c.l.s8.bf16 %v2266_v63 }
 0x641   :  { %3731 = vtanh.f32 %v3484_v21  ;;  %v3485_v26 = vmul.f32 0.5, %v3478_v62  ;;  %3203 = vmatprep.subr.bf16.mxu1 %v2659_v47  ;;  %v2728_v47 = vunpack.c.l.s8.bf16 %v2287_v4  ;;  %v2610_v50 = vunpack.c.h.s8.bf16 %v2225_v46  ;;  %v2280_v62 = vld [vmem:[#allocation11 + $0x6b0] sm:$0xff]  ;;  %v2149_v4 = vld [vmem:[#allocation11 + $0x298] sm:$0xff] }
 0x642   :  { %v2722_v21 = vunpack.c.h.s8.bf16 %v2281_v51  ;;  %v2170_v51 = vld [vmem:[#allocation11 + $0x340] sm:$0xff] }
 0x643   :  { %3733 = vtanh.f32 %v3485_v26  ;;  %3163 = vmatpush1.bf16.msra.mxu0 %v2546_v33  ;;  %v2609_v33 = vunpack.c.h.s8.bf16 %v2224_v58  ;;  %v2218_v26 = vld [vmem:[#allocation11 + $0x4c0] sm:$0xff]  ;;  %v2450_v58 = vunpack.c.l.s8.bf16 %v2149_v4 }
 0x644   :  { %3204 = vmatpush1.bf16.msra.mxu1 %v2658_v2  ;;  %3164 = vmatprep.subr.bf16.mxu0 %v2540_v18  ;;  %v2721_v2 = vunpack.c.h.s8.bf16 %v2280_v62  ;;  %v2603_v18 = vunpack.c.l.s8.bf16 %v2225_v46 }
 0x645   :  { %3205 = vmatprep.subr.bf16.mxu1 %v2652_v22  ;;  %v2274_v22 = vld [vmem:[#allocation11 + $0x680] sm:$0xff] }
 0x647   :  { %3165 = vmatpush1.bf16.msra.mxu0 %v2539_v42  ;;  %v2714_v42 = vunpack.c.l.s8.bf16 %v2280_v62  ;;  %v2086_v62 = vld [vmem:[#allocation11 + $0xa0] sm:$0xff] }
 0x648   :  { %3206 = vmatpush1.bf16.msra.mxu1 %v2651_v32  ;;  %3166 = vmatprep.subr.bf16.mxu0 %v2533_v25  ;;  %v2596_v32 = vunpack.c.h.s8.bf16 %v2218_v26  ;;  %v2217_v25 = vld [vmem:[#allocation11 + $0x4b8] sm:$0xff] }
 0x649   :  { %3207 = vmatprep.subr.bf16.mxu1 %v2645_v19  ;;  %v2708_v19 = vunpack.c.h.s8.bf16 %v2274_v22  ;;  %v2595_v45 = vunpack.c.h.s8.bf16 %v2217_v25  ;;  %v2588_v28 = vunpack.c.l.s8.bf16 %v2217_v25  ;;  %v2492_v25 = vunpack.c.l.s8.bf16 %v2170_v51 }
 0x64b   :  { %3167 = vmatpush1.bf16.msra.mxu0 %v2532_v54  ;;  %v2707_v54 = vunpack.c.h.s8.bf16 %v2273_v61 }
 0x64c   :  { %3208 = vmatpush1.bf16.msra.mxu1 %v2644_v6  ;;  %3168 = vmatprep.subr.bf16.mxu0 %v2526_v12  ;;  %v2589_v6 = vunpack.c.l.s8.bf16 %v2218_v26  ;;  %v2701_v12 = vunpack.c.l.s8.bf16 %v2274_v22  ;;  %v2331_v22 = vunpack.c.h.s8.bf16 %v2086_v62 }
 0x64d   :  { %3209 = vmatprep.subr.bf16.mxu1 %v2638_v15  ;;  %v2267_v15 = vld [vmem:[#allocation11 + $0x648] sm:$0xff] }
 0x64e   :  { %v3732_v38 = vpop.eup %3731 }
 0x64f   :  { %v3498_v39 = vmul.f32 0.5, %v3732_v38  ;;  %3169 = vmatpush1.bf16.msra.mxu0 %v2525_v35  ;;  %v2700_v35 = vunpack.c.l.s8.bf16 %v2273_v61  ;;  %v2324_v61 = vunpack.c.l.s8.bf16 %v2086_v62 }
 0x650   :  { %v3734_v41 = vpop.eup %3733  ;;  %3210 = vmatpush1.bf16.msra.mxu1 %v2637_v1  ;;  %3170 = vmatprep.subr.bf16.mxu0 %v2519_v17  ;;  %v2582_v1 = vunpack.c.h.s8.bf16 %v2211_v29  ;;  %v2210_v17 = vld [vmem:[#allocation11 + $0x480] sm:$0xff] }
 0x651   :  { %v3505_v30 = vadd.f32 0.5, %v3498_v39  ;;  %v3499_v0 = vmul.f32 0.5, %v3734_v41  ;;  %3211 = vmatprep.subr.bf16.mxu1 %v2631_v36  ;;  %v2694_v36 = vunpack.c.h.s8.bf16 %v2267_v15  ;;  %v2581_v38 = vunpack.c.h.s8.bf16 %v2210_v17  ;;  %v2121_v41 = vld [vmem:[#allocation11 + $0x1b8] sm:$0xff] }
 0x652   :  { %v2575_v39 = vunpack.c.l.s8.bf16 %v2211_v29  ;;  %v2135_v29 = vld [vmem:[#allocation11 + $0x228] sm:$0xff] }
 0x653   :  { %3512 = vst [vmem:[#allocation14] sm:$0xff] %v3505_v30  ;;  %v3506_v34 = vadd.f32 0.5, %v3499_v0  ;;  %3171 = vmatpush1.bf16.msra.mxu0 %v2518_v48  ;;  %v2687_v48 = vunpack.c.l.s8.bf16 %v2267_v15  ;;  %v2401_v30 = vunpack.c.h.s8.bf16 %v2121_v41  ;;  %v2093_v0 = vld [vmem:[#allocation11 + $0xd8] sm:$0xff] }
 0x654   :  { %3212 = vmatpush1.bf16.msra.mxu1 %v2630_v59  ;;  %3172 = vmatprep.subr.bf16.mxu0 %v2624_v20  ;;  %v2177_v59 = vld [vmem:[#allocation11 + $0x378] sm:$0xff]  ;;  %v2574_v20 = vunpack.c.l.s8.bf16 %v2210_v17  ;;  %v2100_v17 = vld [vmem:[#allocation11 + $0x110] sm:$0xff] }
 0x655   :  { %3513 = vst [vmem:[#allocation14 + $0x8] sm:$0xff] %v3506_v34  ;;  %3213 = vmatprep.subr.bf16.mxu1 %v2736_v27  ;;  %v2513_v27 = vunpack.c.h.s8.bf16 %v2177_v59  ;;  %v2345_v34 = vunpack.c.h.s8.bf16 %v2093_v0  ;;  %v2506_v46 = vunpack.c.l.s8.bf16 %v2177_v59 }
 0x657   :  { %3173 = vmatpush2.bf16.msra.mxu0 %v2623_v14  ;;  %v2457_v14 = vunpack.c.h.s8.bf16 %v2149_v4 }
 0x658   :  { %3214 = vmatpush2.bf16.msra.mxu1 %v2735_v37  ;;  %3174 = vmatprep.subr.bf16.mxu0 %v2617_v3  ;;  %v2394_v37 = vunpack.c.l.s8.bf16 %v2121_v41  ;;  %v2114_v3 = vld [vmem:[#allocation11 + $0x180] sm:$0xff]  ;;  %v2128_v41 = vld [vmem:[#allocation11 + $0x1f0] sm:$0xff] }
 0x659   :  { %3215 = vmatprep.subr.bf16.mxu1 %v2729_v40 }
 0x65b   :  { %3175 = vmatpush2.bf16.msra.mxu0 %v2616_v52 }
 0x65c   :  { %3216 = vmatpush2.bf16.msra.mxu1 %v2728_v47  ;;  %3176 = vmatprep.subr.bf16.mxu0 %v2610_v50  ;;  %v2338_v47 = vunpack.c.l.s8.bf16 %v2093_v0  ;;  %v2233_v0 = vld [vmem:[#allocation11 + $0x538] sm:$0xff] }
 0x65d   :  { %3217 = vmatprep.subr.bf16.mxu1 %v2722_v21  ;;  %v2387_v21 = vunpack.c.h.s8.bf16 %v2114_v3 }
 0x65f   :  { %3177 = vmatpush2.bf16.msra.mxu0 %v2609_v33 }
 0x660   :  { %3218 = vmatpush2.bf16.msra.mxu1 %v2721_v2  ;;  %3178 = vmatprep.subr.bf16.mxu0 %v2603_v18  ;;  %v2499_v2 = vunpack.c.h.s8.bf16 %v2170_v51  ;;  %v2142_v18 = vld [vmem:[#allocation11 + $0x260] sm:$0xff] }
 0x661   :  { %3219 = vmatprep.subr.bf16.mxu1 %v2715_v44 }
 0x663   :  { %3179 = vmatpush2.bf16.msra.mxu0 %v2602_v24  ;;  %v2443_v24 = vunpack.c.h.s8.bf16 %v2142_v18 }
 0x664   :  { %3220 = vmatpush2.bf16.msra.mxu1 %v2714_v42  ;;  %3180 = vmatprep.subr.bf16.mxu0 %v2596_v32  ;;  %v2380_v42 = vunpack.c.l.s8.bf16 %v2114_v3 }
 0x665   :  { %3221 = vmatprep.subr.bf16.mxu1 %v2708_v19  ;;  %v2107_v19 = vld [vmem:[#allocation11 + $0x148] sm:$0xff] }
 0x667   :  { %3181 = vmatpush2.bf16.msra.mxu0 %v2595_v45  ;;  %v2436_v45 = vunpack.c.l.s8.bf16 %v2142_v18 }
 0x668   :  { %3222 = vmatpush2.bf16.msra.mxu1 %v2707_v54  ;;  %3182 = vmatprep.subr.bf16.mxu0 %v2589_v6  ;;  %v2373_v54 = vunpack.c.h.s8.bf16 %v2107_v19  ;;  %v2079_v6 = vld [vmem:[#allocation11 + $0x68] sm:$0xff] }
 0x669   :  { %3223 = vmatprep.subr.bf16.mxu1 %v2701_v12  ;;  %v2317_v15 = vunpack.c.h.s8.bf16 %v2079_v6  ;;  %v2310_v63 = vunpack.c.l.s8.bf16 %v2079_v6 }
 0x66b   :  { %3183 = vmatpush2.bf16.msra.mxu0 %v2588_v28  ;;  %v2429_v28 = vunpack.c.h.s8.bf16 %v2135_v29 }
 0x66c   :  { %3224 = vmatpush2.bf16.msra.mxu1 %v2700_v35  ;;  %3184 = vmatprep.subr.bf16.mxu0 %v2582_v1  ;;  %v2366_v35 = vunpack.c.l.s8.bf16 %v2107_v19 }
 0x66d   :  { %3225 = vmatprep.subr.bf16.mxu1 %v2694_v36  ;;  %v2156_v36 = vld [vmem:[#allocation11 + $0x2d0] sm:$0xff] }
 0x66f   :  { %3185 = vmatpush2.bf16.msra.mxu0 %v2581_v38  ;;  %v2422_v38 = vunpack.c.l.s8.bf16 %v2135_v29 }
 0x670   :  { %3226 = vmatpush2.bf16.msra.mxu1 %v2693_v49  ;;  %3186 = vmatprep.subr.bf16.mxu0 %v2575_v39  ;;  %v2359_v49 = vunpack.c.h.s8.bf16 %v2100_v17  ;;  %v2072_v39 = vld [vmem:[#allocation11 + $0x30] sm:$0xff] }
 0x671   :  { %3227 = vmatprep.subr.bf16.mxu1 %v2687_v48  ;;  %v2471_v48 = vunpack.c.h.s8.bf16 %v2156_v36  ;;  %v2303_v59 = vunpack.c.h.s8.bf16 %v2072_v39  ;;  %v2296_v4 = vunpack.c.l.s8.bf16 %v2072_v39 }
 0x673   :  { %3187 = vmatpush2.bf16.msra.mxu0 %v2574_v20  ;;  %v2415_v20 = vunpack.c.h.s8.bf16 %v2128_v41 }
 0x674   :  { %3228 = vmatpush2.bf16.msra.mxu1 %v2686_v31  ;;  %3560 = vmatprep.subr.bf16.mxu0 %v2401_v30  ;;  %v2352_v31 = vunpack.c.l.s8.bf16 %v2100_v17  ;;  %v2464_v30 = vunpack.c.l.s8.bf16 %v2156_v36 }
 0x675   :  { %3582 = vmatprep.subr.bf16.mxu1 %v2513_v27  ;;  %v2289_v27 = vld [vmem:[#allocation11 + $0x6f8] sm:$0xff] }
 0x676   :  { %v4373_v40 = vpop.f32.mrf.mxu0  ;;  %3189 = vmatmul.mubr.bf16.vlgmr.msra.gmra.mxu0 %v4329_v5  ;;  %v2737_v3 = vunpack.c.h.s8.bf16 %v2289_v27  ;;  %v2730_v62 = vunpack.c.l.s8.bf16 %v2289_v27 }
 0x677   :  { %v4376_v52 = vpop.f32.mrf.mxu1  ;;  %3230 = vmatmul.mubr.bf16.vlgmr.msra.gmra.mxu1 %v4331_v16  ;;  %3561 = vmatpush3.bf16.msra.mxu0 %v2345_v34  ;;  %v2408_v34 = vunpack.c.l.s8.bf16 %v2128_v41 }
 0x678   :  { %3270 = vmatprep.mubr.bf16.mxu0 %v4307_v8  ;;  %3583 = vmatpush3.bf16.msra.mxu1 %v2457_v14  ;;  %v4380_v50 = vpop.f32.mrf.mxu0  ;;  %v2625_v14 = vunpack.c.h.s8.bf16 %v2233_v0 }
 0x679   :  { %3310 = vmatprep.mubr.bf16.mxu1 %v4309_v56  ;;  %v4383_v33 = vpop.f32.mrf.mxu1  ;;  %3562 = vmatprep.subr.bf16.mxu0 %v2394_v37  ;;  %v2163_v56 = vld [vmem:[#allocation11 + $0x308] sm:$0xff]  ;;  %v2205_v37 = vld [vmem:[#allocation11 + $0x458] sm:$0xff] }
 0x67a   :  { %v2948_v44 = vpop.f32.mrf.mxu0  ;;  %3584 = vmatprep.subr.bf16.mxu1 %v2506_v46  ;;  %v2485_v12 = vunpack.c.h.s8.bf16 %v2163_v56  ;;  %v2478_v1 = vunpack.c.l.s8.bf16 %v2163_v56  ;;  %v2261_v46 = vld [vmem:[#allocation11 + $0x618] sm:$0xff]  ;;  %v2569_v51 = vunpack.c.h.s8.bf16 %v2205_v37  ;;  %v2562_v18 = vunpack.c.l.s8.bf16 %v2205_v37 }
 0x67b   :  { %v2989_v26 = vpop.f32.mrf.mxu1  ;;  %3563 = vmatpush3.bf16.msra.mxu0 %v2338_v47  ;;  %v2681_v47 = vunpack.c.h.s8.bf16 %v2261_v46  ;;  %v2674_v44 = vunpack.c.l.s8.bf16 %v2261_v46  ;;  %v2988_v27 = vadd.f32 %v4383_v33, %v4380_v50  ;;  %v3453_v46 = vrot.slane %v4357_v53, %v4034_v55 }
 0x67c   :  { %3585 = vmatpush3.bf16.msra.mxu1 %v2450_v58  ;;  %v2949_v8 = vpop.f32.mrf.mxu0  ;;  %3564 = vmatprep.subr.bf16.mxu0 %v2387_v21  ;;  %v2618_v58 = vunpack.c.l.s8.bf16 %v2233_v0  ;;  %v2226_v21 = vld [vmem:[#allocation11 + $0x500] sm:$0xff]  ;;  %v3457_v33 = vrot.slane %v4357_v53, %v4037_v57 }
 0x67d   :  { %v2990_v32 = vpop.f32.mrf.mxu1  ;;  %3586 = vmatprep.subr.bf16.mxu1 %v2499_v2  ;;  %v2282_v2 = vld [vmem:[#allocation11 + $0x6c0] sm:$0xff]  ;;  %v2611_v26 = vunpack.c.h.s8.bf16 %v2226_v21 }
 0x67e   :  { %v2723_v8 = vunpack.c.h.s8.bf16 %v2282_v2  ;;  %v2716_v32 = vunpack.c.l.s8.bf16 %v2282_v2 }
 0x67f   :  { %3565 = vmatpush3.bf16.msra.mxu0 %v2331_v22  ;;  %v2198_v22 = vld [vmem:[#allocation11 + $0x420] sm:$0xff] }
 0x680   :  { %3587 = vmatpush3.bf16.msra.mxu1 %v2443_v24  ;;  %3566 = vmatprep.subr.bf16.mxu0 %v2380_v42  ;;  %v2254_v24 = vld [vmem:[#allocation11 + $0x5e0] sm:$0xff]  ;;  %v2548_v19 = vunpack.c.l.s8.bf16 %v2198_v22 }
 0x681   :  { %3588 = vmatprep.subr.bf16.mxu1 %v2492_v25  ;;  %v2667_v42 = vunpack.c.h.s8.bf16 %v2254_v24  ;;  %v2219_v25 = vld [vmem:[#allocation11 + $0x4c8] sm:$0xff]  ;;  %v2660_v56 = vunpack.c.l.s8.bf16 %v2254_v24 }
 0x682   :  { %v2590_v29 = vunpack.c.l.s8.bf16 %v2219_v25 }
 0x683   :  { %3567 = vmatpush3.bf16.msra.mxu0 %v2324_v61  ;;  %v2191_v61 = vld [vmem:[#allocation11 + $0x3e8] sm:$0xff] }
 0x684   :  { %3589 = vmatpush3.bf16.msra.mxu1 %v2436_v45  ;;  %3568 = vmatprep.subr.bf16.mxu0 %v2373_v54  ;;  %v2247_v54 = vld [vmem:[#allocation11 + $0x5a8] sm:$0xff]  ;;  %v2541_v6 = vunpack.c.h.s8.bf16 %v2191_v61 }
 0x685   :  { %3590 = vmatprep.subr.bf16.mxu1 %v2485_v12  ;;  %v2653_v12 = vunpack.c.h.s8.bf16 %v2247_v54  ;;  %v2646_v17 = vunpack.c.l.s8.bf16 %v2247_v54 }
 0x687   :  { %3569 = vmatpush3.bf16.msra.mxu0 %v2317_v15 }
 0x688   :  { %3591 = vmatpush3.bf16.msra.mxu1 %v2429_v28  ;;  %3570 = vmatprep.subr.bf16.mxu0 %v2366_v35  ;;  %v2212_v28 = vld [vmem:[#allocation11 + $0x490] sm:$0xff] }
 0x689   :  { %3592 = vmatprep.subr.bf16.mxu1 %v2478_v1  ;;  %v2268_v35 = vld [vmem:[#allocation11 + $0x650] sm:$0xff]  ;;  %v2534_v1 = vunpack.c.l.s8.bf16 %v2191_v61  ;;  %v2583_v36 = vunpack.c.h.s8.bf16 %v2212_v28  ;;  %v2576_v41 = vunpack.c.l.s8.bf16 %v2212_v28 }
 0x68b   :  { %3571 = vmatpush3.bf16.msra.mxu0 %v2310_v63  ;;  %v2184_v63 = vld [vmem:[#allocation11 + $0x3b0] sm:$0xff] }
 0x68c   :  { %3593 = vmatpush3.bf16.msra.mxu1 %v2422_v38  ;;  %3572 = vmatprep.subr.bf16.mxu0 %v2359_v49  ;;  %v2695_v38 = vunpack.c.h.s8.bf16 %v2268_v35  ;;  %v2240_v49 = vld [vmem:[#allocation11 + $0x570] sm:$0xff]  ;;  %v2527_v39 = vunpack.c.h.s8.bf16 %v2184_v63 }
 0x68d   :  { %3594 = vmatprep.subr.bf16.mxu1 %v2471_v48  ;;  %v2639_v48 = vunpack.c.h.s8.bf16 %v2240_v49 }
 0x68f   :  { %3573 = vmatpush3.bf16.msra.mxu0 %v2303_v59  ;;  %v2688_v59 = vunpack.c.l.s8.bf16 %v2268_v35  ;;  %v3461_v35 = vrot.slane %v4357_v53, %v4149_v7 }
 0x690   :  { %3595 = vmatpush3.bf16.msra.mxu1 %v2415_v20  ;;  %3574 = vmatprep.subr.bf16.mxu0 %v2352_v31  ;;  %v2520_v20 = vunpack.c.l.s8.bf16 %v2184_v63  ;;  %v2632_v31 = vunpack.c.l.s8.bf16 %v2240_v49 }
 0x691   :  { %3596 = vmatprep.subr.bf16.mxu1 %v2464_v30  ;;  %v2986_v30 = vadd.f32 %v4376_v52, %v4373_v40 }
 0x693   :  { %3575 = vmatpush3.bf16.msra.mxu0 %v2296_v4 }
 0x694   :  { %3597 = vmatpush3.bf16.msra.mxu1 %v2408_v34  ;;  %3604 = vmatprep.subr.bf16.mxu0 %v2625_v14  ;;  %v3410_v14 = vrot.slane %v4353_v10, %v4034_v55 }
 0x695   :  { %3626 = vmatprep.subr.bf16.mxu1 %v2737_v3 }
 0x696   :  { %3271 = vmatmul.mubr.bf16.vlgmr.msra.gmra.mxu0 %v4311_v11  ;;  %v2555_v11 = vunpack.c.h.s8.bf16 %v2198_v22 }
 0x697   :  { %3311 = vmatmul.mubr.bf16.vlgmr.msra.gmra.mxu1 %v4313_v13  ;;  %3605 = vmatpush3.bf16.msra.mxu0 %v2569_v51  ;;  %v2604_v13 = vunpack.c.l.s8.bf16 %v2226_v21 }
 0x698   :  { %3350 = vmatprep.mubr.bf16.mxu0 %v4321_v9  ;;  %3627 = vmatpush3.bf16.msra.mxu1 %v2681_v47  ;;  %v2275_v9 = vld [vmem:[#allocation11 + $0x688] sm:$0xff] }
 0x699   :  { %3390 = vmatprep.mubr.bf16.mxu1 %v4323_v43  ;;  %3606 = vmatprep.subr.bf16.mxu0 %v2618_v58  ;;  %v2597_v43 = vunpack.c.h.s8.bf16 %v2219_v25  ;;  %v2709_v45 = vunpack.c.h.s8.bf16 %v2275_v9  ;;  %v2702_v15 = vunpack.c.l.s8.bf16 %v2275_v9 }
 0x69a   :  { %3628 = vmatprep.subr.bf16.mxu1 %v2730_v62 }
 0x69b   :  { %3607 = vmatpush3.bf16.msra.mxu0 %v2562_v18 }
 0x69c   :  { %3629 = vmatpush3.bf16.msra.mxu1 %v2674_v44  ;;  %3608 = vmatprep.subr.bf16.mxu0 %v2611_v26 }
 0x69d   :  { %3630 = vmatprep.subr.bf16.mxu1 %v2723_v8 }
 0x69f   :  { %3609 = vmatpush3.bf16.msra.mxu0 %v2555_v11 }
 0x6a0   :  { %3631 = vmatpush3.bf16.msra.mxu1 %v2667_v42  ;;  %3610 = vmatprep.subr.bf16.mxu0 %v2604_v13 }
 0x6a1   :  { %3632 = vmatprep.subr.bf16.mxu1 %v2716_v32 }
 0x6a3   :  { %3611 = vmatpush3.bf16.msra.mxu0 %v2548_v19 }
 0x6a4   :  { %3633 = vmatpush3.bf16.msra.mxu1 %v2660_v56  ;;  %3612 = vmatprep.subr.bf16.mxu0 %v2597_v43 }
 0x6a5   :  { %3634 = vmatprep.subr.bf16.mxu1 %v2709_v45 }
 0x6a7   :  { %3613 = vmatpush3.bf16.msra.mxu0 %v2541_v6 }
 0x6a8   :  { %3635 = vmatpush3.bf16.msra.mxu1 %v2653_v12  ;;  %3614 = vmatprep.subr.bf16.mxu0 %v2590_v29  ;;  %v3418_v29 = vrot.slane %v4353_v10, %v4149_v7 }
 0x6a9   :  { %3636 = vmatprep.subr.bf16.mxu1 %v2702_v15 }
 0x6ab   :  { %3615 = vmatpush3.bf16.msra.mxu0 %v2534_v1 }
 0x6ac   :  { %3637 = vmatpush3.bf16.msra.mxu1 %v2646_v17  ;;  %3616 = vmatprep.subr.bf16.mxu0 %v2583_v36  ;;  %v3422_v36 = vrot.slane %v4353_v10, %v4140_v60 }
 0x6ad   :  { %3638 = vmatprep.subr.bf16.mxu1 %v2695_v38 }
 0x6af   :  { %3617 = vmatpush3.bf16.msra.mxu0 %v2527_v39  ;;  %v3465_v39 = vrot.slane %v4357_v53, %v4140_v60 }
 0x6b0   :  { %3639 = vmatpush3.bf16.msra.mxu1 %v2639_v48  ;;  %3618 = vmatprep.subr.bf16.mxu0 %v2576_v41 }
 0x6b1   :  { %3640 = vmatprep.subr.bf16.mxu1 %v2688_v59 }
 0x6b3   :  { %3619 = vmatpush3.bf16.msra.mxu0 %v2520_v20 }
 0x6b4   :  { %3641 = vmatpush3.bf16.msra.mxu1 %v2632_v31 }
 0x6b6   :  { %v3026_v0 = vpop.f32.mrf.mxu0  ;;  %3351 = vmatmul.mubr.bf16.vlgmr.msra.gmra.mxu0 %v4329_v5  ;;  %v3414_v5 = vrot.slane %v4353_v10, %v4037_v57 }
 0x6b7   :  { %v3027_v4 = vadd.f32 %v3026_v0, %v2986_v30  ;;  %v3067_v34 = vpop.f32.mrf.mxu1  ;;  %3391 = vmatmul.mubr.bf16.vlgmr.msra.gmra.mxu1 %v4331_v16 }
 0x6b8   :  { %v3028_v37 = vpop.f32.mrf.mxu0 }
 0x6b9   :  { %v3068_v3 = vadd.f32 %v3067_v34, %v3027_v4  ;;  %v3029_v51 = vadd.f32 %v3028_v37, %v2988_v27  ;;  %v3069_v40 = vpop.f32.mrf.mxu1 }
 0x6ba   :  { %v3030_v52 = vpop.f32.mrf.mxu0 }
 0x6bb   :  { %v3436_v47 = vmul.f32 %v3410_v14, %v3068_v3  ;;  %v3070_v50 = vadd.f32 %v3069_v40, %v3029_v51  ;;  %v3071_v58 = vpop.f32.mrf.mxu1 }
 0x6bc   :  { %v3031_v21 = vpop.f32.mrf.mxu0 }
 0x6bd   :  { %v3479_v62 = vadd.f32 %v3453_v46, %v3436_v47  ;;  %v3437_v16 = vmul.f32 %v3414_v5, %v3070_v50  ;;  %v3072_v2 = vpop.f32.mrf.mxu1 }
 0x6bf   :  { %v3486_v18 = vmul.f32 0.5, %v3479_v62  ;;  %v3480_v44 = vadd.f32 %v3457_v33, %v3437_v16 }
 0x6c1   :  { %3735 = vtanh.f32 %v3486_v18  ;;  %v3487_v55 = vmul.f32 0.5, %v3480_v44 }
 0x6c3   :  { %3737 = vtanh.f32 %v3487_v55 }
 0x6ce   :  { %v3736_v26 = vpop.eup %3735 }
 0x6cf   :  { %v3500_v22 = vmul.f32 0.5, %v3736_v26 }
 0x6d0   :  { %v3738_v8 = vpop.eup %3737 }
 0x6d1   :  { %v3507_v24 = vadd.f32 0.5, %v3500_v22  ;;  %v3501_v11 = vmul.f32 0.5, %v3738_v8  ;;  %v3426_v8 = vrot.slane %v4353_v10, %v4218_v23 }
 0x6d3   :  { %3514 = vst [vmem:[#allocation14 + $0x10] sm:$0xff] %v3507_v24  ;;  %v3508_v42 = vadd.f32 0.5, %v3501_v11 }
 0x6d5   :  { %3515 = vst [vmem:[#allocation14 + $0x18] sm:$0xff] %v3508_v42 }
 0x6f6   :  { %v3108_v13 = vpop.f32.mrf.mxu0 }
 0x6f7   :  { %v3149_v57 = vpop.f32.mrf.mxu1 }
 0x6f8   :  { %v3110_v32 = vpop.f32.mrf.mxu0  ;;  %v3150_v61 = vadd.f32 %v3149_v57, %v3108_v13  ;;  %v3469_v13 = vrot.slane %v4357_v53, %v4218_v23 }
 0x6f9   :  { %v3151_v25 = vpop.f32.mrf.mxu1 }
 0x6fa   :  { %v3112_v9 = vpop.f32.mrf.mxu0  ;;  %v3152_v54 = vadd.f32 %v3151_v25, %v3110_v32 }
 0x6fb   :  { %v3153_v19 = vpop.f32.mrf.mxu1 }
 0x6fc   :  { %v3113_v56 = vpop.f32.mrf.mxu0 }
 0x6fd   :  { %v3154_v43 = vpop.f32.mrf.mxu1 }
 0x736   :  { %v3190_v45 = vpop.f32.mrf.mxu0 }
 0x737   :  { %v3191_v6 = vadd.f32 %v3190_v45, %v3150_v61  ;;  %v3231_v12 = vpop.f32.mrf.mxu1 }
 0x738   :  { %v3192_v15 = vpop.f32.mrf.mxu0 }
 0x739   :  { %v3232_v28 = vadd.f32 %v3231_v12, %v3191_v6  ;;  %v3193_v1 = vadd.f32 %v3192_v15, %v3152_v54  ;;  %v3233_v17 = vpop.f32.mrf.mxu1 }
 0x73a   :  { %v3194_v63 = vpop.f32.mrf.mxu0 }
 0x73b   :  { %v3438_v38 = vmul.f32 %v3418_v29, %v3232_v28  ;;  %v3234_v49 = vadd.f32 %v3233_v17, %v3193_v1  ;;  %v3235_v48 = vpop.f32.mrf.mxu1 }
 0x73c   :  { %v3195_v41 = vpop.f32.mrf.mxu0 }
 0x73d   :  { %v3481_v59 = vadd.f32 %v3461_v35, %v3438_v38  ;;  %v3439_v20 = vmul.f32 %v3422_v36, %v3234_v49  ;;  %v3236_v31 = vpop.f32.mrf.mxu1 }
 0x73f   :  { %v3488_v30 = vmul.f32 0.5, %v3481_v59  ;;  %v3482_v0 = vadd.f32 %v3465_v39, %v3439_v20 }
 0x741   :  { %3739 = vtanh.f32 %v3488_v30  ;;  %v3489_v7 = vmul.f32 0.5, %v3482_v0 }
 0x743   :  { %3741 = vtanh.f32 %v3489_v7 }
 0x74e   :  { %v3740_v27 = vpop.eup %3739 }
 0x74f   :  { %v3502_v4 = vmul.f32 0.5, %v3740_v27 }
 0x750   :  { %v3742_v34 = vpop.eup %3741 }
 0x751   :  { %v3509_v14 = vadd.f32 0.5, %v3502_v4  ;;  %v3503_v37 = vmul.f32 0.5, %v3742_v34 }
 0x753   :  { %3516 = vst [vmem:[#allocation14 + $0x20] sm:$0xff] %v3509_v14  ;;  %v3510_v3 = vadd.f32 0.5, %v3503_v37 }
 0x755   :  { %3517 = vst [vmem:[#allocation14 + $0x28] sm:$0xff] %v3510_v3 }
 0x756   :  { %v3576_v46 = vpop.f32.mrf.mxu0 }
 0x757   :  { %v3598_v60 = vpop.f32.mrf.mxu1 }
 0x758   :  { %v3577_v51 = vpop.f32.mrf.mxu0 }
 0x759   :  { %v3599_v40 = vpop.f32.mrf.mxu1  ;;  %v3578_v33 = vadd.f32 %v3577_v51, %v3576_v46 }
 0x75a   :  { %v3579_v5 = vpop.f32.mrf.mxu0  ;;  %v3600_v58 = vadd.f32 %v3599_v40, %v3598_v60 }
 0x75b   :  { %v3601_v52 = vpop.f32.mrf.mxu1 }
 0x75c   :  { %v3580_v47 = vpop.f32.mrf.mxu0  ;;  %v3313_v2 = vadd.f32 %v3600_v58, %v3578_v33 }
 0x75d   :  { %v3602_v50 = vpop.f32.mrf.mxu1 }
 0x776   :  { %v3620_v21 = vpop.f32.mrf.mxu0 }
 0x777   :  { %v3642_v62 = vpop.f32.mrf.mxu1 }
 0x778   :  { %v3621_v16 = vpop.f32.mrf.mxu0 }
 0x779   :  { %v3622_v18 = vadd.f32 %v3621_v16, %v3620_v21  ;;  %v3643_v44 = vpop.f32.mrf.mxu1 }
 0x77a   :  { %v3623_v55 = vpop.f32.mrf.mxu0  ;;  %v3644_v22 = vadd.f32 %v3643_v44, %v3642_v62 }
 0x77b   :  { %v3353_v26 = vadd.f32 %v3622_v18, %v3313_v2  ;;  %v3645_v24 = vpop.f32.mrf.mxu1 }
 0x77c   :  { %v3624_v11 = vpop.f32.mrf.mxu0 }
 0x77d   :  { %v3393_v42 = vadd.f32 %v3644_v22, %v3353_v26  ;;  %v3646_v57 = vpop.f32.mrf.mxu1 }
 0x77f   :  { %v3440_v32 = vmul.f32 %v3426_v8, %v3393_v42 }
 0x781   :  { %v3483_v25 = vadd.f32 %v3469_v13, %v3440_v32 }
 0x783   :  { %v3490_v9 = vmul.f32 0.5, %v3483_v25 }
 0x785   :  { %3743 = vtanh.f32 %v3490_v9 }
 0x792   :  { %v3744_v19 = vpop.eup %3743 }
 0x793   :  { %v3504_v56 = vmul.f32 0.5, %v3744_v19 }
 0x795   :  { %v3511_v43 = vadd.f32 0.5, %v3504_v56 }
 0x797   :  { %3518 = vst [vmem:[#allocation14 + $0x30] sm:$0xff] %v3511_v43 }
 0x798   :  { %3896 = shalt.err (!%p3893_p11)
}
 0x799   :  { %3528 = dma.vmem_to_hbm [thread:$0]  %s3526_s6, 896, %s4425_s7, [#allocation4]  }
 0x79a   :  { %3913 = dma.done.wait [#allocation4], 896  }
 0x79b   :  { %3914 = vsyncadd [#allocation4], 4294966400 }
 0x79c   :  { %3532 = vsyncpa [#allocation3], 1 }
 0x79d   :  { %3533 = vsyncpa [#allocation6], 1 }
 0x79e   :  { %3534 = vsyncpa [#allocation9], 1 }
 0x79f   :  { %3535 = vsyncpa [#allocation12], 1 }
 0x7a0   :  { %3536 = vsyncpa [#allocation4], 1 }

</bundles_post_ra>
